<compile_context>
chip_gen: v7x
topology: tpu7x:2x2x1
jax: 0.10.0
libtpu: 0.0.40
codegen_flags: <defaults>
</compile_context>

<pallas_src>
import functools
import math

import jax
import jax.numpy as jnp
from jax import lax
from jax.experimental import pallas as pl
from jax.experimental.pallas import tpu as pltpu


# ----------------------------------------------------------------------------
# Generic tiled linear:  y = x @ wT + b   (bf16 MXU operands, f32 accumulate)
# ----------------------------------------------------------------------------

def _linear_kernel(x_ref, wT_ref, b_ref, o_ref):
    y = jnp.dot(x_ref[...].astype(jnp.bfloat16), wT_ref[...],
                preferred_element_type=jnp.float32)
    y = y + b_ref[...]
    o_ref[...] = y.astype(o_ref.dtype)


def pallas_linear(x2d, wT_bf16, b, row_tile=256):
    """x2d:(N,Din) f32, wT:(Din,Dout) bf16, b:(Dout,) f32 -> (N,Dout) f32."""
    N, Din = x2d.shape
    Dout = wT_bf16.shape[1]
    tn = row_tile if (N % row_tile == 0) else N
    return pl.pallas_call(
        _linear_kernel,
        out_shape=jax.ShapeDtypeStruct((N, Dout), jnp.float32),
        grid=(N // tn,),
        in_specs=[
            pl.BlockSpec((tn, Din), lambda i: (i, 0)),
            pl.BlockSpec((Din, Dout), lambda i: (0, 0)),
            pl.BlockSpec((1, Dout), lambda i: (0, 0)),
        ],
        out_specs=pl.BlockSpec((tn, Dout), lambda i: (i, 0)),
        compiler_params=pltpu.CompilerParams(dimension_semantics=("parallel",)),
    )(x2d, wT_bf16, b.reshape(1, Dout))


# ----------------------------------------------------------------------------
# Fused bidirectional GRU layer: whole recurrence in ONE kernel invocation.
#   xg_ref   : (T, B, 6H) f32   pre-gated x@Wih^T + bih_eff ; [:, :, 0:3H]=fwd, [3H:6H]=bwd
#   whhT_ref : (2, H, 3H) bf16  [0]=Whh_fwd^T, [1]=Whh_bwd^T
#   bhhn_ref : (2, 1, H)  f32   recurrent bias of the n gate only (r/z folded into bih_eff)
#   out_ref  : (T, B, 2H) f32   [:, :, 0:H]=fwd output, [:, :, H:2H]=bwd output
# ----------------------------------------------------------------------------

def _bigru_kernel(xg_ref, whhT_ref, bhhn_ref, out_ref, *, hidden, seq_len):
    H, T = hidden, seq_len
    B = out_ref.shape[1]

    # Hoist weights/biases out of the time loop (resident in vregs/VMEM).
    wT_f = whhT_ref[0]          # (H, 3H) bf16
    wT_b = whhT_ref[1]
    bn_f = bhhn_ref[0]          # (1, H)  f32
    bn_b = bhhn_ref[1]

    def cell(gx, h, wT, bn):
        # gx already contains b_ih + (b_hr, b_hz folded); bn is b_hn.
        gh = jnp.dot(h.astype(jnp.bfloat16), wT,
                     preferred_element_type=jnp.float32)           # (B, 3H)
        r = jax.nn.sigmoid(gx[:, 0:H] + gh[:, 0:H])
        z = jax.nn.sigmoid(gx[:, H:2 * H] + gh[:, H:2 * H])
        n = jnp.tanh(gx[:, 2 * H:3 * H] + r * (gh[:, 2 * H:3 * H] + bn))
        return (1.0 - z) * n + z * h

    def body(t, carry):
        h_f, h_b = carry
        tb = T - 1 - t
        gx_t = xg_ref[t]                        # (B, 6H)
        gx_tb = xg_ref[tb]
        h_f = cell(gx_t[:, 0:3 * H], h_f, wT_f, bn_f)
        h_b = cell(gx_tb[:, 3 * H:6 * H], h_b, wT_b, bn_b)
        out_ref[t, :, 0:H] = h_f                # VMEM stores; HBM writeback happens once
        out_ref[tb, :, H:2 * H] = h_b
        return (h_f, h_b)

    h0 = jnp.zeros((B, H), jnp.float32)         # hp=None -> zero initial hidden state
    lax.fori_loop(0, T, body, (h0, h0), unroll=True)


def pallas_bigru(xg_tm, whhT_cat, bhhn):
    T, B, G6 = xg_tm.shape
    H = G6 // 6
    return pl.pallas_call(
        functools.partial(_bigru_kernel, hidden=H, seq_len=T),
        out_shape=jax.ShapeDtypeStruct((T, B, 2 * H), jnp.float32),
    )(xg_tm, whhT_cat, bhhn)


# ----------------------------------------------------------------------------
# Fused dual regressor head: both MLPs (Linear-ReLU-Linear-ReLU-Linear-Tanh)
# in one kernel; intermediates never leave vregs/VMEM.
# ----------------------------------------------------------------------------

def _dual_head_kernel(x_ref,
                      vw1, vb1, vw2, vb2, vw3, vb3,
                      aw1, ab1, aw2, ab2, aw3, ab3,
                      o_ref, *, out_dim):
    x = x_ref[...].astype(jnp.bfloat16)

    def mlp(w1, b1, w2, b2, w3, b3):
        y = jnp.dot(x, w1[...], preferred_element_type=jnp.float32) + b1[...]
        y = jnp.maximum(y, 0.0)
        y = jnp.dot(y.astype(jnp.bfloat16), w2[...],
                    preferred_element_type=jnp.float32) + b2[...]
        y = jnp.maximum(y, 0.0)
        y = jnp.dot(y.astype(jnp.bfloat16), w3[...],
                    preferred_element_type=jnp.float32) + b3[...]
        return jnp.tanh(y)

    v = mlp(vw1, vb1, vw2, vb2, vw3, vb3)               # (tn, out_dim)
    a = mlp(aw1, ab1, aw2, ab2, aw3, ab3)
    o_ref[:, 0:out_dim] = v.astype(o_ref.dtype)
    o_ref[:, out_dim:2 * out_dim] = a.astype(o_ref.dtype)


def pallas_dual_head(x2d, v_head, a_head, row_tile=256):
    N, Din = x2d.shape
    out_dim = v_head[-1][0].shape[1]
    tn = row_tile if (N % row_tile == 0) else N

    operands = [x2d]
    in_specs = [pl.BlockSpec((tn, Din), lambda i: (i, 0))]
    for (wT, b) in list(v_head) + list(a_head):
        b2 = b.reshape(1, -1)
        operands += [wT, b2]
        in_specs += [pl.BlockSpec(wT.shape, lambda i: (0, 0)),
                     pl.BlockSpec(b2.shape, lambda i: (0, 0))]

    return pl.pallas_call(
        functools.partial(_dual_head_kernel, out_dim=out_dim),
        out_shape=jax.ShapeDtypeStruct((N, 2 * out_dim), jnp.float32),
        grid=(N // tn,),
        in_specs=in_specs,
        out_specs=pl.BlockSpec((tn, 2 * out_dim), lambda i: (i, 0)),
        compiler_params=pltpu.CompilerParams(dimension_semantics=("parallel",)),
    )(*operands)


# ----------------------------------------------------------------------------
# Parameter construction (PyTorch-style uniform init, then fuse/transposed/bf16)
# ----------------------------------------------------------------------------

def _uniform(key, shape, bound):
    return jax.random.uniform(key, shape, jnp.float32, minval=-bound, maxval=bound)


def init_params(key, *, input_dim, affine_dim, hidden, num_layers, head_dims, out_dim):
    H = hidden
    keys = iter(jax.random.split(key, 512))
    params = {}

    # affine: nn.Linear(input_dim, affine_dim)
    kb = 1.0 / math.sqrt(input_dim)
    aw = _uniform(next(keys), (affine_dim, input_dim), kb)
    ab = _uniform(next(keys), (affine_dim,), kb)
    params["affine_wT"] = aw.T.astype(jnp.bfloat16)
    params["affine_b"] = ab

    # GRU layers (bidirectional), PyTorch gate order [r; z; n]
    kg = 1.0 / math.sqrt(H)
    params["gru"] = []
    for l in range(num_layers):
        in_size = affine_dim if l == 0 else 2 * H
        Wih, bih, Whh, bhh = [], [], [], []
        for _ in range(2):  # fwd, bwd
            Wih.append(_uniform(next(keys), (3 * H, in_size), kg))
            bih.append(_uniform(next(keys), (3 * H,), kg))
            Whh.append(_uniform(next(keys), (3 * H, H), kg))
            bhh.append(_uniform(next(keys), (3 * H,), kg))

        # fused pre-gating weight: columns [fwd 3H | bwd 3H]
        WihT_cat = jnp.concatenate([Wih[0].T, Wih[1].T], axis=1).astype(jnp.bfloat16)

        # fold recurrent r/z biases into the input-side bias (n bias stays separate)
        def fold(bi, bh):
            return bi + jnp.concatenate([bh[:2 * H], jnp.zeros((H,), jnp.float32)])

        bih_cat = jnp.concatenate([fold(bih[0], bhh[0]), fold(bih[1], bhh[1])])
        WhhT_cat = jnp.stack([Whh[0].T, Whh[1].T], axis=0).astype(jnp.bfloat16)  # (2,H,3H)
        bhhn = jnp.stack([bhh[0][2 * H:], bhh[1][2 * H:]], axis=0)[:, None, :]   # (2,1,H)

        params["gru"].append(dict(WihT_cat=WihT_cat, bih_cat=bih_cat,
                                  WhhT_cat=WhhT_cat, bhhn=bhhn))

    # Regressor heads: Linear(2H,d0)-ReLU-Linear(d0,d1)-ReLU-Linear(d1,out)-Tanh
    def make_head():
        dims = [2 * H] + list(head_dims) + [out_dim]
        layers = []
        for din, dout in zip(dims[:-1], dims[1:]):
            kb = 1.0 / math.sqrt(din)
            W = _uniform(next(keys), (dout, din), kb)
            b = _uniform(next(keys), (dout,), kb)
            layers.append((W.T.astype(jnp.bfloat16), b))
        return layers

    params["v_head"] = make_head()
    params["a_head"] = make_head()
    return params


# ----------------------------------------------------------------------------
# Forward pass (time-major internally; batch-first at the API boundary)
# ----------------------------------------------------------------------------

def bigru_encoder_forward(x, params, *, hidden, num_layers):
    B, T, Din = x.shape
    H = hidden

    # one transpose in: (B,T,D) -> time-major rows (T*B, D)
    rows = x.transpose(1, 0, 2).reshape(T * B, Din)

    # affine projection
    rows = pallas_linear(rows, params["affine_wT"], params["affine_b"])

    # stacked bidirectional GRU (hp=None -> zero initial hidden state)
    for l in range(num_layers):
        p = params["gru"][l]
        xg = pallas_linear(rows, p["WihT_cat"], p["bih_cat"])        # (T*B, 6H)
        out_tm = pallas_bigru(xg.reshape(T, B, 6 * H),
                              p["WhhT_cat"], p["bhhn"])              # (T, B, 2H)
        rows = out_tm.reshape(T * B, 2 * H)

    # fused v/a heads -> (T*B, 2*out_dim), then one transpose out
    out2 = pallas_dual_head(rows, params["v_head"], params["a_head"])
    return out2.reshape(T, B, -1).transpose(1, 0, 2)                 # (B, T, 2*out_dim)


# ----------------------------------------------------------------------------
# Main
# ----------------------------------------------------------------------------

if __name__ == "__main__":
    # small config consistent with the module (scaled down)
    B, T = 2, 8
    INPUT_DIM = 32
    AFFINE_DIM = 32
    HIDDEN = 32
    NUM_LAYERS = 2
    HEAD_DIMS = [16, 8]
    OUT_DIM = 1

    key = jax.random.PRNGKey(0)
    kx, kp = jax.random.split(key)
    x = jax.random.normal(kx, (B, T, INPUT_DIM), jnp.float32)

    params = init_params(kp, input_dim=INPUT_DIM, affine_dim=AFFINE_DIM,
                         hidden=HIDDEN, num_layers=NUM_LAYERS,
                         head_dims=HEAD_DIMS, out_dim=OUT_DIM)

    fwd = jax.jit(functools.partial(bigru_encoder_forward,
                                    hidden=HIDDEN, num_layers=NUM_LAYERS))
    out = jax.block_until_ready(fwd(x, params))

    assert out.shape == (B, T, 2 * OUT_DIM), out.shape
    assert bool(jnp.all(jnp.isfinite(out)))
    # tanh-head outputs must be in [-1, 1]
    assert bool(jnp.all(jnp.abs(out) <= 1.0 + 1e-6))
    print("KERNEL_OK")
</pallas_src>

<mosaic_0001>
module attributes {stable_mosaic.version = 11 : i64} {
  func.func @_linear_kernel(%arg0: i32, %arg1: memref<16x32xf32, #tpu.memory_space<vmem>>, %arg2: memref<32x32xbf16, #tpu.memory_space<vmem>>, %arg3: memref<1x32xf32, #tpu.memory_space<vmem>>, %arg4: memref<16x32xf32, #tpu.memory_space<vmem>>) attributes {dimension_semantics = [#tpu.dimension_semantics<parallel>], iteration_bounds = array<i64: 1>, scalar_prefetch = 0 : i64, scratch_operands = 0 : i64, tpu.core_type = #tpu.core_type<tc>, window_params = [{transform_indices = @transform_0, window_bounds = array<i64: 16, 32>}, {pipeline_mode = #tpu.pipeline_mode<synchronous>, transform_indices = @transform_1, window_bounds = array<i64: 32, 32>}, {pipeline_mode = #tpu.pipeline_mode<synchronous>, transform_indices = @transform_2, window_bounds = array<i64: 1, 32>}, {transform_indices = @transform_3, window_bounds = array<i64: 16, 32>}]} {
    %c0 = arith.constant 0 : index
    %c0_0 = arith.constant 0 : index
    %0 = vector.load %arg1[%c0, %c0_0] : memref<16x32xf32, #tpu.memory_space<vmem>>, vector<16x32xf32>
    %1 = arith.truncf %0 : vector<16x32xf32> to vector<16x32xbf16>
    %c0_1 = arith.constant 0 : index
    %c0_2 = arith.constant 0 : index
    %2 = vector.load %arg2[%c0_1, %c0_2] : memref<32x32xbf16, #tpu.memory_space<vmem>>, vector<32x32xbf16>
    %cst = arith.constant dense<0.000000e+00> : vector<16x32xf32>
    %3 = tpu.matmul %1, %2, %cst {dimension_numbers = #tpu.dot_dimension_numbers<[1], [0], [0], [1], [0, 0, 1, 1], [], []>} : vector<16x32xbf16>, vector<32x32xbf16>, vector<16x32xf32> -> vector<16x32xf32>
    %c0_3 = arith.constant 0 : index
    %c0_4 = arith.constant 0 : index
    %4 = vector.load %arg3[%c0_3, %c0_4] : memref<1x32xf32, #tpu.memory_space<vmem>>, vector<1x32xf32>
    %5 = vector.broadcast %4 : vector<1x32xf32> to vector<16x32xf32>
    %6 = arith.addf %3, %5 : vector<16x32xf32>
    %c0_5 = arith.constant 0 : index
    %c0_6 = arith.constant 0 : index
    %7 = vector.load %arg4[%c0_5, %c0_6] : memref<16x32xf32, #tpu.memory_space<vmem>>, vector<16x32xf32>
    tpu.vector_store %arg4[%c0_5, %c0_6], %6 {strides = array<i32>} : memref<16x32xf32, #tpu.memory_space<vmem>>, vector<16x32xf32>,
    return
  }
  func.func @transform_0(%arg0: i32) -> (i32, i32) {
    %c0_i32 = arith.constant 0 : i32
    %c0_i32_0 = arith.constant 0 : i32
    return %arg0, %c0_i32 : i32, i32
  }
  func.func @transform_1(%arg0: i32) -> (i32, i32) {
    %c0_i32 = arith.constant 0 : i32
    %c0_i32_0 = arith.constant 0 : i32
    %c0_i32_1 = arith.constant 0 : i32
    return %c0_i32, %c0_i32_0 : i32, i32
  }
  func.func @transform_2(%arg0: i32) -> (i32, i32) {
    %c0_i32 = arith.constant 0 : i32
    %c0_i32_0 = arith.constant 0 : i32
    %c0_i32_1 = arith.constant 0 : i32
    return %c0_i32, %c0_i32_0 : i32, i32
  }
  func.func @transform_3(%arg0: i32) -> (i32, i32) {
    %c0_i32 = arith.constant 0 : i32
    %c0_i32_0 = arith.constant 0 : i32
    return %arg0, %c0_i32 : i32, i32
  }
}

module attributes {stable_mosaic.version = 11 : i64} {
  func.func @_linear_kernel(%arg0: i32, %arg1: memref<16x32xf32, #tpu.memory_space<vmem>>, %arg2: memref<32x192xbf16, #tpu.memory_space<vmem>>, %arg3: memref<1x192xf32, #tpu.memory_space<vmem>>, %arg4: memref<16x192xf32, #tpu.memory_space<vmem>>) attributes {dimension_semantics = [#tpu.dimension_semantics<parallel>], iteration_bounds = array<i64: 1>, scalar_prefetch = 0 : i64, scratch_operands = 0 : i64, tpu.core_type = #tpu.core_type<tc>, window_params = [{transform_indices = @transform_0, window_bounds = array<i64: 16, 32>}, {pipeline_mode = #tpu.pipeline_mode<synchronous>, transform_indices = @transform_1, window_bounds = array<i64: 32, 192>}, {pipeline_mode = #tpu.pipeline_mode<synchronous>, transform_indices = @transform_2, window_bounds = array<i64: 1, 192>}, {transform_indices = @transform_3, window_bounds = array<i64: 16, 192>}]} {
    %c0 = arith.constant 0 : index
    %c0_0 = arith.constant 0 : index
    %0 = vector.load %arg1[%c0, %c0_0] : memref<16x32xf32, #tpu.memory_space<vmem>>, vector<16x32xf32>
    %1 = arith.truncf %0 : vector<16x32xf32> to vector<16x32xbf16>
    %c0_1 = arith.constant 0 : index
    %c0_2 = arith.constant 0 : index
    %2 = vector.load %arg2[%c0_1, %c0_2] : memref<32x192xbf16, #tpu.memory_space<vmem>>, vector<32x192xbf16>
    %cst = arith.constant dense<0.000000e+00> : vector<16x192xf32>
    %3 = tpu.matmul %1, %2, %cst {dimension_numbers = #tpu.dot_dimension_numbers<[1], [0], [0], [1], [0, 0, 1, 1], [], []>} : vector<16x32xbf16>, vector<32x192xbf16>, vector<16x192xf32> -> vector<16x192xf32>
    %c0_3 = arith.constant 0 : index
    %c0_4 = arith.constant 0 : index
    %4 = vector.load %arg3[%c0_3, %c0_4] : memref<1x192xf32, #tpu.memory_space<vmem>>, vector<1x192xf32>
    %5 = vector.broadcast %4 : vector<1x192xf32> to vector<16x192xf32>
    %6 = arith.addf %3, %5 : vector<16x192xf32>
    %c0_5 = arith.constant 0 : index
    %c0_6 = arith.constant 0 : index
    %7 = vector.load %arg4[%c0_5, %c0_6] : memref<16x192xf32, #tpu.memory_space<vmem>>, vector<16x192xf32>
    tpu.vector_store %arg4[%c0_5, %c0_6], %6 {strides = array<i32>} : memref<16x192xf32, #tpu.memory_space<vmem>>, vector<16x192xf32>,
    return
  }
  func.func @transform_0(%arg0: i32) -> (i32, i32) {
    %c0_i32 = arith.constant 0 : i32
    %c0_i32_0 = arith.constant 0 : i32
    return %arg0, %c0_i32 : i32, i32
  }
  func.func @transform_1(%arg0: i32) -> (i32, i32) {
    %c0_i32 = arith.constant 0 : i32
    %c0_i32_0 = arith.constant 0 : i32
    %c0_i32_1 = arith.constant 0 : i32
    return %c0_i32, %c0_i32_0 : i32, i32
  }
  func.func @transform_2(%arg0: i32) -> (i32, i32) {
    %c0_i32 = arith.constant 0 : i32
    %c0_i32_0 = arith.constant 0 : i32
    %c0_i32_1 = arith.constant 0 : i32
    return %c0_i32, %c0_i32_0 : i32, i32
  }
  func.func @transform_3(%arg0: i32) -> (i32, i32) {
    %c0_i32 = arith.constant 0 : i32
    %c0_i32_0 = arith.constant 0 : i32
    return %arg0, %c0_i32 : i32, i32
  }
}

module attributes {stable_mosaic.version = 11 : i64} {
  func.func @_linear_kernel(%arg0: i32, %arg1: memref<16x64xf32, #tpu.memory_space<vmem>>, %arg2: memref<64x192xbf16, #tpu.memory_space<vmem>>, %arg3: memref<1x192xf32, #tpu.memory_space<vmem>>, %arg4: memref<16x192xf32, #tpu.memory_space<vmem>>) attributes {dimension_semantics = [#tpu.dimension_semantics<parallel>], iteration_bounds = array<i64: 1>, scalar_prefetch = 0 : i64, scratch_operands = 0 : i64, tpu.core_type = #tpu.core_type<tc>, window_params = [{transform_indices = @transform_0, window_bounds = array<i64: 16, 64>}, {pipeline_mode = #tpu.pipeline_mode<synchronous>, transform_indices = @transform_1, window_bounds = array<i64: 64, 192>}, {pipeline_mode = #tpu.pipeline_mode<synchronous>, transform_indices = @transform_2, window_bounds = array<i64: 1, 192>}, {transform_indices = @transform_3, window_bounds = array<i64: 16, 192>}]} {
    %c0 = arith.constant 0 : index
    %c0_0 = arith.constant 0 : index
    %0 = vector.load %arg1[%c0, %c0_0] : memref<16x64xf32, #tpu.memory_space<vmem>>, vector<16x64xf32>
    %1 = arith.truncf %0 : vector<16x64xf32> to vector<16x64xbf16>
    %c0_1 = arith.constant 0 : index
    %c0_2 = arith.constant 0 : index
    %2 = vector.load %arg2[%c0_1, %c0_2] : memref<64x192xbf16, #tpu.memory_space<vmem>>, vector<64x192xbf16>
    %cst = arith.constant dense<0.000000e+00> : vector<16x192xf32>
    %3 = tpu.matmul %1, %2, %cst {dimension_numbers = #tpu.dot_dimension_numbers<[1], [0], [0], [1], [0, 0, 1, 1], [], []>} : vector<16x64xbf16>, vector<64x192xbf16>, vector<16x192xf32> -> vector<16x192xf32>
    %c0_3 = arith.constant 0 : index
    %c0_4 = arith.constant 0 : index
    %4 = vector.load %arg3[%c0_3, %c0_4] : memref<1x192xf32, #tpu.memory_space<vmem>>, vector<1x192xf32>
    %5 = vector.broadcast %4 : vector<1x192xf32> to vector<16x192xf32>
    %6 = arith.addf %3, %5 : vector<16x192xf32>
    %c0_5 = arith.constant 0 : index
    %c0_6 = arith.constant 0 : index
    %7 = vector.load %arg4[%c0_5, %c0_6] : memref<16x192xf32, #tpu.memory_space<vmem>>, vector<16x192xf32>
    tpu.vector_store %arg4[%c0_5, %c0_6], %6 {strides = array<i32>} : memref<16x192xf32, #tpu.memory_space<vmem>>, vector<16x192xf32>,
    return
  }
  func.func @transform_0(%arg0: i32) -> (i32, i32) {
    %c0_i32 = arith.constant 0 : i32
    %c0_i32_0 = arith.constant 0 : i32
    return %arg0, %c0_i32 : i32, i32
  }
  func.func @transform_1(%arg0: i32) -> (i32, i32) {
    %c0_i32 = arith.constant 0 : i32
    %c0_i32_0 = arith.constant 0 : i32
    %c0_i32_1 = arith.constant 0 : i32
    return %c0_i32, %c0_i32_0 : i32, i32
  }
  func.func @transform_2(%arg0: i32) -> (i32, i32) {
    %c0_i32 = arith.constant 0 : i32
    %c0_i32_0 = arith.constant 0 : i32
    %c0_i32_1 = arith.constant 0 : i32
    return %c0_i32, %c0_i32_0 : i32, i32
  }
  func.func @transform_3(%arg0: i32) -> (i32, i32) {
    %c0_i32 = arith.constant 0 : i32
    %c0_i32_0 = arith.constant 0 : i32
    return %arg0, %c0_i32 : i32, i32
  }
}

module attributes {stable_mosaic.version = 11 : i64} {
  func.func @_bigru_kernel(%arg0: memref<8x2x192xf32, #tpu.memory_space<vmem>>, %arg1: memref<2x32x96xbf16, #tpu.memory_space<vmem>>, %arg2: memref<2x1x32xf32, #tpu.memory_space<vmem>>, %arg3: memref<8x2x64xf32, #tpu.memory_space<vmem>>) attributes {dimension_semantics = [], scalar_prefetch = 0 : i64, scratch_operands = 0 : i64, tpu.core_type = #tpu.core_type<tc>} {
    %c0 = arith.constant 0 : index
    %c0_0 = arith.constant 0 : index
    %c0_1 = arith.constant 0 : index
    %0 = vector.load %arg1[%c0, %c0_0, %c0_1] : memref<2x32x96xbf16, #tpu.memory_space<vmem>>, vector<1x32x96xbf16>
    %1 = vector.shape_cast %0 : vector<1x32x96xbf16> to vector<32x96xbf16>
    %c1 = arith.constant 1 : index
    %c0_2 = arith.constant 0 : index
    %c0_3 = arith.constant 0 : index
    %2 = vector.load %arg1[%c1, %c0_2, %c0_3] : memref<2x32x96xbf16, #tpu.memory_space<vmem>>, vector<1x32x96xbf16>
    %3 = vector.shape_cast %2 : vector<1x32x96xbf16> to vector<32x96xbf16>
    %c0_4 = arith.constant 0 : index
    %c0_5 = arith.constant 0 : index
    %c0_6 = arith.constant 0 : index
    %4 = vector.load %arg2[%c0_4, %c0_5, %c0_6] : memref<2x1x32xf32, #tpu.memory_space<vmem>>, vector<1x1x32xf32>
    %5 = vector.shape_cast %4 : vector<1x1x32xf32> to vector<1x32xf32>
    %c1_7 = arith.constant 1 : index
    %c0_8 = arith.constant 0 : index
    %c0_9 = arith.constant 0 : index
    %6 = vector.load %arg2[%c1_7, %c0_8, %c0_9] : memref<2x1x32xf32, #tpu.memory_space<vmem>>, vector<1x1x32xf32>
    %7 = vector.shape_cast %6 : vector<1x1x32xf32> to vector<1x32xf32>
    %cst = arith.constant 0.000000e+00 : f32
    %8 = vector.broadcast %cst : f32 to vector<2x32xf32>
    %c0_i32 = arith.constant 0 : i32
    %c7_i32 = arith.constant 7 : i32
    %9 = arith.subi %c7_i32, %c0_i32 : i32
    %10 = arith.index_cast %c0_i32 : i32 to index
    %c0_10 = arith.constant 0 : index
    %c0_11 = arith.constant 0 : index
    %11 = vector.load %arg0[%10, %c0_10, %c0_11] : memref<8x2x192xf32, #tpu.memory_space<vmem>>, vector<1x2x192xf32>
    %12 = vector.shape_cast %11 : vector<1x2x192xf32> to vector<2x192xf32>
    %13 = arith.index_cast %9 : i32 to index
    %c0_12 = arith.constant 0 : index
    %c0_13 = arith.constant 0 : index
    %14 = vector.load %arg0[%13, %c0_12, %c0_13] : memref<8x2x192xf32, #tpu.memory_space<vmem>>, vector<1x2x192xf32>
    %15 = vector.shape_cast %14 : vector<1x2x192xf32> to vector<2x192xf32>
    %16 = vector.extract_strided_slice %12 {offsets = [0, 0], sizes = [2, 96], strides = [1, 1]} : vector<2x192xf32> to vector<2x96xf32>
    %17 = arith.truncf %8 : vector<2x32xf32> to vector<2x32xbf16>
    %cst_14 = arith.constant dense<0.000000e+00> : vector<2x96xf32>
    %18 = tpu.matmul %17, %1, %cst_14 {dimension_numbers = #tpu.dot_dimension_numbers<[1], [0], [0], [1], [0, 0, 1, 1], [], []>} : vector<2x32xbf16>, vector<32x96xbf16>, vector<2x96xf32> -> vector<2x96xf32>
    %19 = vector.extract_strided_slice %16 {offsets = [0, 0], sizes = [2, 32], strides = [1, 1]} : vector<2x96xf32> to vector<2x32xf32>
    %20 = vector.extract_strided_slice %18 {offsets = [0, 0], sizes = [2, 32], strides = [1, 1]} : vector<2x96xf32> to vector<2x32xf32>
    %21 = arith.addf %19, %20 : vector<2x32xf32>
    %22 = arith.negf %21 : vector<2x32xf32>
    %23 = math.exp %22 : vector<2x32xf32>
    %cst_15 = arith.constant 1.000000e+00 : f32
    %24 = vector.broadcast %cst_15 : f32 to vector<2x32xf32>
    %25 = arith.addf %24, %23 : vector<2x32xf32>
    %26 = arith.divf %24, %25 : vector<2x32xf32>
    %27 = vector.extract_strided_slice %16 {offsets = [0, 32], sizes = [2, 32], strides = [1, 1]} : vector<2x96xf32> to vector<2x32xf32>
    %28 = vector.extract_strided_slice %18 {offsets = [0, 32], sizes = [2, 32], strides = [1, 1]} : vector<2x96xf32> to vector<2x32xf32>
    %29 = arith.addf %27, %28 : vector<2x32xf32>
    %30 = arith.negf %29 : vector<2x32xf32>
    %31 = math.exp %30 : vector<2x32xf32>
    %cst_16 = arith.constant 1.000000e+00 : f32
    %32 = vector.broadcast %cst_16 : f32 to vector<2x32xf32>
    %33 = arith.addf %32, %31 : vector<2x32xf32>
    %34 = arith.divf %32, %33 : vector<2x32xf32>
    %35 = vector.extract_strided_slice %16 {offsets = [0, 64], sizes = [2, 32], strides = [1, 1]} : vector<2x96xf32> to vector<2x32xf32>
    %36 = vector.extract_strided_slice %18 {offsets = [0, 64], sizes = [2, 32], strides = [1, 1]} : vector<2x96xf32> to vector<2x32xf32>
    %37 = vector.broadcast %5 : vector<1x32xf32> to vector<2x32xf32>
    %38 = arith.addf %36, %37 : vector<2x32xf32>
    %39 = arith.mulf %26, %38 : vector<2x32xf32>
    %40 = arith.addf %35, %39 : vector<2x32xf32>
    %41 = math.tanh %40 : vector<2x32xf32>
    %cst_17 = arith.constant 1.000000e+00 : f32
    %42 = vector.broadcast %cst_17 : f32 to vector<2x32xf32>
    %43 = arith.subf %42, %34 : vector<2x32xf32>
    %44 = arith.mulf %43, %41 : vector<2x32xf32>
    %45 = arith.mulf %34, %8 : vector<2x32xf32>
    %46 = arith.addf %44, %45 : vector<2x32xf32>
    %47 = vector.extract_strided_slice %15 {offsets = [0, 96], sizes = [2, 96], strides = [1, 1]} : vector<2x192xf32> to vector<2x96xf32>
    %48 = arith.truncf %8 : vector<2x32xf32> to vector<2x32xbf16>
    %cst_18 = arith.constant dense<0.000000e+00> : vector<2x96xf32>
    %49 = tpu.matmul %48, %3, %cst_18 {dimension_numbers = #tpu.dot_dimension_numbers<[1], [0], [0], [1], [0, 0, 1, 1], [], []>} : vector<2x32xbf16>, vector<32x96xbf16>, vector<2x96xf32> -> vector<2x96xf32>
    %50 = vector.extract_strided_slice %47 {offsets = [0, 0], sizes = [2, 32], strides = [1, 1]} : vector<2x96xf32> to vector<2x32xf32>
    %51 = vector.extract_strided_slice %49 {offsets = [0, 0], sizes = [2, 32], strides = [1, 1]} : vector<2x96xf32> to vector<2x32xf32>
    %52 = arith.addf %50, %51 : vector<2x32xf32>
    %53 = arith.negf %52 : vector<2x32xf32>
    %54 = math.exp %53 : vector<2x32xf32>
    %cst_19 = arith.constant 1.000000e+00 : f32
    %55 = vector.broadcast %cst_19 : f32 to vector<2x32xf32>
    %56 = arith.addf %55, %54 : vector<2x32xf32>
    %57 = arith.divf %55, %56 : vector<2x32xf32>
    %58 = vector.extract_strided_slice %47 {offsets = [0, 32], sizes = [2, 32], strides = [1, 1]} : vector<2x96xf32> to vector<2x32xf32>
    %59 = vector.extract_strided_slice %49 {offsets = [0, 32], sizes = [2, 32], strides = [1, 1]} : vector<2x96xf32> to vector<2x32xf32>
    %60 = arith.addf %58, %59 : vector<2x32xf32>
    %61 = arith.negf %60 : vector<2x32xf32>
    %62 = math.exp %61 : vector<2x32xf32>
    %cst_20 = arith.constant 1.000000e+00 : f32
    %63 = vector.broadcast %cst_20 : f32 to vector<2x32xf32>
    %64 = arith.addf %63, %62 : vector<2x32xf32>
    %65 = arith.divf %63, %64 : vector<2x32xf32>
    %66 = vector.extract_strided_slice %47 {offsets = [0, 64], sizes = [2, 32], strides = [1, 1]} : vector<2x96xf32> to vector<2x32xf32>
    %67 = vector.extract_strided_slice %49 {offsets = [0, 64], sizes = [2, 32], strides = [1, 1]} : vector<2x96xf32> to vector<2x32xf32>
    %68 = vector.broadcast %7 : vector<1x32xf32> to vector<2x32xf32>
    %69 = arith.addf %67, %68 : vector<2x32xf32>
    %70 = arith.mulf %57, %69 : vector<2x32xf32>
    %71 = arith.addf %66, %70 : vector<2x32xf32>
    %72 = math.tanh %71 : vector<2x32xf32>
    %cst_21 = arith.constant 1.000000e+00 : f32
    %73 = vector.broadcast %cst_21 : f32 to vector<2x32xf32>
    %74 = arith.subf %73, %65 : vector<2x32xf32>
    %75 = arith.mulf %74, %72 : vector<2x32xf32>
    %76 = arith.mulf %65, %8 : vector<2x32xf32>
    %77 = arith.addf %75, %76 : vector<2x32xf32>
    %78 = arith.index_cast %c0_i32 : i32 to index
    %c0_22 = arith.constant 0 : index
    %c0_23 = arith.constant 0 : index
    %79 = vector.load %arg3[%78, %c0_22, %c0_23] : memref<8x2x64xf32, #tpu.memory_space<vmem>>, vector<1x2x32xf32>
    %80 = vector.shape_cast %79 : vector<1x2x32xf32> to vector<2x32xf32>
    %81 = vector.shape_cast %46 : vector<2x32xf32> to vector<1x2x32xf32>
    tpu.vector_store %arg3[%78, %c0_22, %c0_23], %81 {strides = array<i32>} : memref<8x2x64xf32, #tpu.memory_space<vmem>>, vector<1x2x32xf32>,
    %82 = arith.index_cast %9 : i32 to index
    %c0_24 = arith.constant 0 : index
    %c32 = arith.constant 32 : index
    %83 = vector.load %arg3[%82, %c0_24, %c32] : memref<8x2x64xf32, #tpu.memory_space<vmem>>, vector<1x2x32xf32>
    %84 = vector.shape_cast %83 : vector<1x2x32xf32> to vector<2x32xf32>
    %85 = vector.shape_cast %77 : vector<2x32xf32> to vector<1x2x32xf32>
    tpu.vector_store %arg3[%82, %c0_24, %c32], %85 {strides = array<i32>} : memref<8x2x64xf32, #tpu.memory_space<vmem>>, vector<1x2x32xf32>,
    %c1_i32 = arith.constant 1 : i32
    %c7_i32_25 = arith.constant 7 : i32
    %86 = arith.subi %c7_i32_25, %c1_i32 : i32
    %87 = arith.index_cast %c1_i32 : i32 to index
    %c0_26 = arith.constant 0 : index
    %c0_27 = arith.constant 0 : index
    %88 = vector.load %arg0[%87, %c0_26, %c0_27] : memref<8x2x192xf32, #tpu.memory_space<vmem>>, vector<1x2x192xf32>
    %89 = vector.shape_cast %88 : vector<1x2x192xf32> to vector<2x192xf32>
    %90 = arith.index_cast %86 : i32 to index
    %c0_28 = arith.constant 0 : index
    %c0_29 = arith.constant 0 : index
    %91 = vector.load %arg0[%90, %c0_28, %c0_29] : memref<8x2x192xf32, #tpu.memory_space<vmem>>, vector<1x2x192xf32>
    %92 = vector.shape_cast %91 : vector<1x2x192xf32> to vector<2x192xf32>
    %93 = vector.extract_strided_slice %89 {offsets = [0, 0], sizes = [2, 96], strides = [1, 1]} : vector<2x192xf32> to vector<2x96xf32>
    %94 = arith.truncf %46 : vector<2x32xf32> to vector<2x32xbf16>
    %cst_30 = arith.constant dense<0.000000e+00> : vector<2x96xf32>
    %95 = tpu.matmul %94, %1, %cst_30 {dimension_numbers = #tpu.dot_dimension_numbers<[1], [0], [0], [1], [0, 0, 1, 1], [], []>} : vector<2x32xbf16>, vector<32x96xbf16>, vector<2x96xf32> -> vector<2x96xf32>
    %96 = vector.extract_strided_slice %93 {offsets = [0, 0], sizes = [2, 32], strides = [1, 1]} : vector<2x96xf32> to vector<2x32xf32>
    %97 = vector.extract_strided_slice %95 {offsets = [0, 0], sizes = [2, 32], strides = [1, 1]} : vector<2x96xf32> to vector<2x32xf32>
    %98 = arith.addf %96, %97 : vector<2x32xf32>
    %99 = arith.negf %98 : vector<2x32xf32>
    %100 = math.exp %99 : vector<2x32xf32>
    %cst_31 = arith.constant 1.000000e+00 : f32
    %101 = vector.broadcast %cst_31 : f32 to vector<2x32xf32>
    %102 = arith.addf %101, %100 : vector<2x32xf32>
    %103 = arith.divf %101, %102 : vector<2x32xf32>
    %104 = vector.extract_strided_slice %93 {offsets = [0, 32], sizes = [2, 32], strides = [1, 1]} : vector<2x96xf32> to vector<2x32xf32>
    %105 = vector.extract_strided_slice %95 {offsets = [0, 32], sizes = [2, 32], strides = [1, 1]} : vector<2x96xf32> to vector<2x32xf32>
    %106 = arith.addf %104, %105 : vector<2x32xf32>
    %107 = arith.negf %106 : vector<2x32xf32>
    %108 = math.exp %107 : vector<2x32xf32>
    %cst_32 = arith.constant 1.000000e+00 : f32
    %109 = vector.broadcast %cst_32 : f32 to vector<2x32xf32>
    %110 = arith.addf %109, %108 : vector<2x32xf32>
    %111 = arith.divf %109, %110 : vector<2x32xf32>
    %112 = vector.extract_strided_slice %93 {offsets = [0, 64], sizes = [2, 32], strides = [1, 1]} : vector<2x96xf32> to vector<2x32xf32>
    %113 = vector.extract_strided_slice %95 {offsets = [0, 64], sizes = [2, 32], strides = [1, 1]} : vector<2x96xf32> to vector<2x32xf32>
    %114 = vector.broadcast %5 : vector<1x32xf32> to vector<2x32xf32>
    %115 = arith.addf %113, %114 : vector<2x32xf32>
    %116 = arith.mulf %103, %115 : vector<2x32xf32>
    %117 = arith.addf %112, %116 : vector<2x32xf32>
    %118 = math.tanh %117 : vector<2x32xf32>
    %cst_33 = arith.constant 1.000000e+00 : f32
    %119 = vector.broadcast %cst_33 : f32 to vector<2x32xf32>
    %120 = arith.subf %119, %111 : vector<2x32xf32>
    %121 = arith.mulf %120, %118 : vector<2x32xf32>
    %122 = arith.mulf %111, %46 : vector<2x32xf32>
    %123 = arith.addf %121, %122 : vector<2x32xf32>
    %124 = vector.extract_strided_slice %92 {offsets = [0, 96], sizes = [2, 96], strides = [1, 1]} : vector<2x192xf32> to vector<2x96xf32>
    %125 = arith.truncf %77 : vector<2x32xf32> to vector<2x32xbf16>
    %cst_34 = arith.constant dense<0.000000e+00> : vector<2x96xf32>
    %126 = tpu.matmul %125, %3, %cst_34 {dimension_numbers = #tpu.dot_dimension_numbers<[1], [0], [0], [1], [0, 0, 1, 1], [], []>} : vector<2x32xbf16>, vector<32x96xbf16>, vector<2x96xf32> -> vector<2x96xf32>
    %127 = vector.extract_strided_slice %124 {offsets = [0, 0], sizes = [2, 32], strides = [1, 1]} : vector<2x96xf32> to vector<2x32xf32>
    %128 = vector.extract_strided_slice %126 {offsets = [0, 0], sizes = [2, 32], strides = [1, 1]} : vector<2x96xf32> to vector<2x32xf32>
    %129 = arith.addf %127, %128 : vector<2x32xf32>
    %130 = arith.negf %129 : vector<2x32xf32>
    %131 = math.exp %130 : vector<2x32xf32>
    %cst_35 = arith.constant 1.000000e+00 : f32
    %132 = vector.broadcast %cst_35 : f32 to vector<2x32xf32>
    %133 = arith.addf %132, %131 : vector<2x32xf32>
    %134 = arith.divf %132, %133 : vector<2x32xf32>
    %135 = vector.extract_strided_slice %124 {offsets = [0, 32], sizes = [2, 32], strides = [1, 1]} : vector<2x96xf32> to vector<2x32xf32>
    %136 = vector.extract_strided_slice %126 {offsets = [0, 32], sizes = [2, 32], strides = [1, 1]} : vector<2x96xf32> to vector<2x32xf32>
    %137 = arith.addf %135, %136 : vector<2x32xf32>
    %138 = arith.negf %137 : vector<2x32xf32>
    %139 = math.exp %138 : vector<2x32xf32>
    %cst_36 = arith.constant 1.000000e+00 : f32
    %140 = vector.broadcast %cst_36 : f32 to vector<2x32xf32>
    %141 = arith.addf %140, %139 : vector<2x32xf32>
    %142 = arith.divf %140, %141 : vector<2x32xf32>
    %143 = vector.extract_strided_slice %124 {offsets = [0, 64], sizes = [2, 32], strides = [1, 1]} : vector<2x96xf32> to vector<2x32xf32>
    %144 = vector.extract_strided_slice %126 {offsets = [0, 64], sizes = [2, 32], strides = [1, 1]} : vector<2x96xf32> to vector<2x32xf32>
    %145 = vector.broadcast %7 : vector<1x32xf32> to vector<2x32xf32>
    %146 = arith.addf %144, %145 : vector<2x32xf32>
    %147 = arith.mulf %134, %146 : vector<2x32xf32>
    %148 = arith.addf %143, %147 : vector<2x32xf32>
    %149 = math.tanh %148 : vector<2x32xf32>
    %cst_37 = arith.constant 1.000000e+00 : f32
    %150 = vector.broadcast %cst_37 : f32 to vector<2x32xf32>
    %151 = arith.subf %150, %142 : vector<2x32xf32>
    %152 = arith.mulf %151, %149 : vector<2x32xf32>
    %153 = arith.mulf %142, %77 : vector<2x32xf32>
    %154 = arith.addf %152, %153 : vector<2x32xf32>
    %155 = arith.index_cast %c1_i32 : i32 to index
    %c0_38 = arith.constant 0 : index
    %c0_39 = arith.constant 0 : index
    %156 = vector.load %arg3[%155, %c0_38, %c0_39] : memref<8x2x64xf32, #tpu.memory_space<vmem>>, vector<1x2x32xf32>
    %157 = vector.shape_cast %156 : vector<1x2x32xf32> to vector<2x32xf32>
    %158 = vector.shape_cast %123 : vector<2x32xf32> to vector<1x2x32xf32>
    tpu.vector_store %arg3[%155, %c0_38, %c0_39], %158 {strides = array<i32>} : memref<8x2x64xf32, #tpu.memory_space<vmem>>, vector<1x2x32xf32>,
    %159 = arith.index_cast %86 : i32 to index
    %c0_40 = arith.constant 0 : index
    %c32_41 = arith.constant 32 : index
    %160 = vector.load %arg3[%159, %c0_40, %c32_41] : memref<8x2x64xf32, #tpu.memory_space<vmem>>, vector<1x2x32xf32>
    %161 = vector.shape_cast %160 : vector<1x2x32xf32> to vector<2x32xf32>
    %162 = vector.shape_cast %154 : vector<2x32xf32> to vector<1x2x32xf32>
    tpu.vector_store %arg3[%159, %c0_40, %c32_41], %162 {strides = array<i32>} : memref<8x2x64xf32, #tpu.memory_space<vmem>>, vector<1x2x32xf32>,
    %c2_i32 = arith.constant 2 : i32
    %c7_i32_42 = arith.constant 7 : i32
    %163 = arith.subi %c7_i32_42, %c2_i32 : i32
    %164 = arith.index_cast %c2_i32 : i32 to index
    %c0_43 = arith.constant 0 : index
    %c0_44 = arith.constant 0 : index
    %165 = vector.load %arg0[%164, %c0_43, %c0_44] : memref<8x2x192xf32, #tpu.memory_space<vmem>>, vector<1x2x192xf32>
    %166 = vector.shape_cast %165 : vector<1x2x192xf32> to vector<2x192xf32>
    %167 = arith.index_cast %163 : i32 to index
    %c0_45 = arith.constant 0 : index
    %c0_46 = arith.constant 0 : index
    %168 = vector.load %arg0[%167, %c0_45, %c0_46] : memref<8x2x192xf32, #tpu.memory_space<vmem>>, vector<1x2x192xf32>
    %169 = vector.shape_cast %168 : vector<1x2x192xf32> to vector<2x192xf32>
    %170 = vector.extract_strided_slice %166 {offsets = [0, 0], sizes = [2, 96], strides = [1, 1]} : vector<2x192xf32> to vector<2x96xf32>
    %171 = arith.truncf %123 : vector<2x32xf32> to vector<2x32xbf16>
    %cst_47 = arith.constant dense<0.000000e+00> : vector<2x96xf32>
    %172 = tpu.matmul %171, %1, %cst_47 {dimension_numbers = #tpu.dot_dimension_numbers<[1], [0], [0], [1], [0, 0, 1, 1], [], []>} : vector<2x32xbf16>, vector<32x96xbf16>, vector<2x96xf32> -> vector<2x96xf32>
    %173 = vector.extract_strided_slice %170 {offsets = [0, 0], sizes = [2, 32], strides = [1, 1]} : vector<2x96xf32> to vector<2x32xf32>
    %174 = vector.extract_strided_slice %172 {offsets = [0, 0], sizes = [2, 32], strides = [1, 1]} : vector<2x96xf32> to vector<2x32xf32>
    %175 = arith.addf %173, %174 : vector<2x32xf32>
    %176 = arith.negf %175 : vector<2x32xf32>
    %177 = math.exp %176 : vector<2x32xf32>
    %cst_48 = arith.constant 1.000000e+00 : f32
    %178 = vector.broadcast %cst_48 : f32 to vector<2x32xf32>
    %179 = arith.addf %178, %177 : vector<2x32xf32>
    %180 = arith.divf %178, %179 : vector<2x32xf32>
    %181 = vector.extract_strided_slice %170 {offsets = [0, 32], sizes = [2, 32], strides = [1, 1]} : vector<2x96xf32> to vector<2x32xf32>
    %182 = vector.extract_strided_slice %172 {offsets = [0, 32], sizes = [2, 32], strides = [1, 1]} : vector<2x96xf32> to vector<2x32xf32>
    %183 = arith.addf %181, %182 : vector<2x32xf32>
    %184 = arith.negf %183 : vector<2x32xf32>
    %185 = math.exp %184 : vector<2x32xf32>
    %cst_49 = arith.constant 1.000000e+00 : f32
    %186 = vector.broadcast %cst_49 : f32 to vector<2x32xf32>
    %187 = arith.addf %186, %185 : vector<2x32xf32>
    %188 = arith.divf %186, %187 : vector<2x32xf32>
    %189 = vector.extract_strided_slice %170 {offsets = [0, 64], sizes = [2, 32], strides = [1, 1]} : vector<2x96xf32> to vector<2x32xf32>
    %190 = vector.extract_strided_slice %172 {offsets = [0, 64], sizes = [2, 32], strides = [1, 1]} : vector<2x96xf32> to vector<2x32xf32>
    %191 = vector.broadcast %5 : vector<1x32xf32> to vector<2x32xf32>
    %192 = arith.addf %190, %191 : vector<2x32xf32>
    %193 = arith.mulf %180, %192 : vector<2x32xf32>
    %194 = arith.addf %189, %193 : vector<2x32xf32>
    %195 = math.tanh %194 : vector<2x32xf32>
    %cst_50 = arith.constant 1.000000e+00 : f32
    %196 = vector.broadcast %cst_50 : f32 to vector<2x32xf32>
    %197 = arith.subf %196, %188 : vector<2x32xf32>
    %198 = arith.mulf %197, %195 : vector<2x32xf32>
    %199 = arith.mulf %188, %123 : vector<2x32xf32>
    %200 = arith.addf %198, %199 : vector<2x32xf32>
    %201 = vector.extract_strided_slice %169 {offsets = [0, 96], sizes = [2, 96], strides = [1, 1]} : vector<2x192xf32> to vector<2x96xf32>
    %202 = arith.truncf %154 : vector<2x32xf32> to vector<2x32xbf16>
    %cst_51 = arith.constant dense<0.000000e+00> : vector<2x96xf32>
    %203 = tpu.matmul %202, %3, %cst_51 {dimension_numbers = #tpu.dot_dimension_numbers<[1], [0], [0], [1], [0, 0, 1, 1], [], []>} : vector<2x32xbf16>, vector<32x96xbf16>, vector<2x96xf32> -> vector<2x96xf32>
    %204 = vector.extract_strided_slice %201 {offsets = [0, 0], sizes = [2, 32], strides = [1, 1]} : vector<2x96xf32> to vector<2x32xf32>
    %205 = vector.extract_strided_slice %203 {offsets = [0, 0], sizes = [2, 32], strides = [1, 1]} : vector<2x96xf32> to vector<2x32xf32>
    %206 = arith.addf %204, %205 : vector<2x32xf32>
    %207 = arith.negf %206 : vector<2x32xf32>
    %208 = math.exp %207 : vector<2x32xf32>
    %cst_52 = arith.constant 1.000000e+00 : f32
    %209 = vector.broadcast %cst_52 : f32 to vector<2x32xf32>
    %210 = arith.addf %209, %208 : vector<2x32xf32>
    %211 = arith.divf %209, %210 : vector<2x32xf32>
    %212 = vector.extract_strided_slice %201 {offsets = [0, 32], sizes = [2, 32], strides = [1, 1]} : vector<2x96xf32> to vector<2x32xf32>
    %213 = vector.extract_strided_slice %203 {offsets = [0, 32], sizes = [2, 32], strides = [1, 1]} : vector<2x96xf32> to vector<2x32xf32>
    %214 = arith.addf %212, %213 : vector<2x32xf32>
    %215 = arith.negf %214 : vector<2x32xf32>
    %216 = math.exp %215 : vector<2x32xf32>
    %cst_53 = arith.constant 1.000000e+00 : f32
    %217 = vector.broadcast %cst_53 : f32 to vector<2x32xf32>
    %218 = arith.addf %217, %216 : vector<2x32xf32>
    %219 = arith.divf %217, %218 : vector<2x32xf32>
    %220 = vector.extract_strided_slice %201 {offsets = [0, 64], sizes = [2, 32], strides = [1, 1]} : vector<2x96xf32> to vector<2x32xf32>
    %221 = vector.extract_strided_slice %203 {offsets = [0, 64], sizes = [2, 32], strides = [1, 1]} : vector<2x96xf32> to vector<2x32xf32>
    %222 = vector.broadcast %7 : vector<1x32xf32> to vector<2x32xf32>
    %223 = arith.addf %221, %222 : vector<2x32xf32>
    %224 = arith.mulf %211, %223 : vector<2x32xf32>
    %225 = arith.addf %220, %224 : vector<2x32xf32>
    %226 = math.tanh %225 : vector<2x32xf32>
    %cst_54 = arith.constant 1.000000e+00 : f32
    %227 = vector.broadcast %cst_54 : f32 to vector<2x32xf32>
    %228 = arith.subf %227, %219 : vector<2x32xf32>
    %229 = arith.mulf %228, %226 : vector<2x32xf32>
    %230 = arith.mulf %219, %154 : vector<2x32xf32>
    %231 = arith.addf %229, %230 : vector<2x32xf32>
    %232 = arith.index_cast %c2_i32 : i32 to index
    %c0_55 = arith.constant 0 : index
    %c0_56 = arith.constant 0 : index
    %233 = vector.load %arg3[%232, %c0_55, %c0_56] : memref<8x2x64xf32, #tpu.memory_space<vmem>>, vector<1x2x32xf32>
    %234 = vector.shape_cast %233 : vector<1x2x32xf32> to vector<2x32xf32>
    %235 = vector.shape_cast %200 : vector<2x32xf32> to vector<1x2x32xf32>
    tpu.vector_store %arg3[%232, %c0_55, %c0_56], %235 {strides = array<i32>} : memref<8x2x64xf32, #tpu.memory_space<vmem>>, vector<1x2x32xf32>,
    %236 = arith.index_cast %163 : i32 to index
    %c0_57 = arith.constant 0 : index
    %c32_58 = arith.constant 32 : index
    %237 = vector.load %arg3[%236, %c0_57, %c32_58] : memref<8x2x64xf32, #tpu.memory_space<vmem>>, vector<1x2x32xf32>
    %238 = vector.shape_cast %237 : vector<1x2x32xf32> to vector<2x32xf32>
    %239 = vector.shape_cast %231 : vector<2x32xf32> to vector<1x2x32xf32>
    tpu.vector_store %arg3[%236, %c0_57, %c32_58], %239 {strides = array<i32>} : memref<8x2x64xf32, #tpu.memory_space<vmem>>, vector<1x2x32xf32>,
    %c3_i32 = arith.constant 3 : i32
    %c7_i32_59 = arith.constant 7 : i32
    %240 = arith.subi %c7_i32_59, %c3_i32 : i32
    %241 = arith.index_cast %c3_i32 : i32 to index
    %c0_60 = arith.constant 0 : index
    %c0_61 = arith.constant 0 : index
    %242 = vector.load %arg0[%241, %c0_60, %c0_61] : memref<8x2x192xf32, #tpu.memory_space<vmem>>, vector<1x2x192xf32>
    %243 = vector.shape_cast %242 : vector<1x2x192xf32> to vector<2x192xf32>
    %244 = arith.index_cast %240 : i32 to index
    %c0_62 = arith.constant 0 : index
    %c0_63 = arith.constant 0 : index
    %245 = vector.load %arg0[%244, %c0_62, %c0_63] : memref<8x2x192xf32, #tpu.memory_space<vmem>>, vector<1x2x192xf32>
    %246 = vector.shape_cast %245 : vector<1x2x192xf32> to vector<2x192xf32>
    %247 = vector.extract_strided_slice %243 {offsets = [0, 0], sizes = [2, 96], strides = [1, 1]} : vector<2x192xf32> to vector<2x96xf32>
    %248 = arith.truncf %200 : vector<2x32xf32> to vector<2x32xbf16>
    %cst_64 = arith.constant dense<0.000000e+00> : vector<2x96xf32>
    %249 = tpu.matmul %248, %1, %cst_64 {dimension_numbers = #tpu.dot_dimension_numbers<[1], [0], [0], [1], [0, 0, 1, 1], [], []>} : vector<2x32xbf16>, vector<32x96xbf16>, vector<2x96xf32> -> vector<2x96xf32>
    %250 = vector.extract_strided_slice %247 {offsets = [0, 0], sizes = [2, 32], strides = [1, 1]} : vector<2x96xf32> to vector<2x32xf32>
    %251 = vector.extract_strided_slice %249 {offsets = [0, 0], sizes = [2, 32], strides = [1, 1]} : vector<2x96xf32> to vector<2x32xf32>
    %252 = arith.addf %250, %251 : vector<2x32xf32>
    %253 = arith.negf %252 : vector<2x32xf32>
    %254 = math.exp %253 : vector<2x32xf32>
    %cst_65 = arith.constant 1.000000e+00 : f32
    %255 = vector.broadcast %cst_65 : f32 to vector<2x32xf32>
    %256 = arith.addf %255, %254 : vector<2x32xf32>
    %257 = arith.divf %255, %256 : vector<2x32xf32>
    %258 = vector.extract_strided_slice %247 {offsets = [0, 32], sizes = [2, 32], strides = [1, 1]} : vector<2x96xf32> to vector<2x32xf32>
    %259 = vector.extract_strided_slice %249 {offsets = [0, 32], sizes = [2, 32], strides = [1, 1]} : vector<2x96xf32> to vector<2x32xf32>
    %260 = arith.addf %258, %259 : vector<2x32xf32>
    %261 = arith.negf %260 : vector<2x32xf32>
    %262 = math.exp %261 : vector<2x32xf32>
    %cst_66 = arith.constant 1.000000e+00 : f32
    %263 = vector.broadcast %cst_66 : f32 to vector<2x32xf32>
    %264 = arith.addf %263, %262 : vector<2x32xf32>
    %265 = arith.divf %263, %264 : vector<2x32xf32>
    %266 = vector.extract_strided_slice %247 {offsets = [0, 64], sizes = [2, 32], strides = [1, 1]} : vector<2x96xf32> to vector<2x32xf32>
    %267 = vector.extract_strided_slice %249 {offsets = [0, 64], sizes = [2, 32], strides = [1, 1]} : vector<2x96xf32> to vector<2x32xf32>
    %268 = vector.broadcast %5 : vector<1x32xf32> to vector<2x32xf32>
    %269 = arith.addf %267, %268 : vector<2x32xf32>
    %270 = arith.mulf %257, %269 : vector<2x32xf32>
    %271 = arith.addf %266, %270 : vector<2x32xf32>
    %272 = math.tanh %271 : vector<2x32xf32>
    %cst_67 = arith.constant 1.000000e+00 : f32
    %273 = vector.broadcast %cst_67 : f32 to vector<2x32xf32>
    %274 = arith.subf %273, %265 : vector<2x32xf32>
    %275 = arith.mulf %274, %272 : vector<2x32xf32>
    %276 = arith.mulf %265, %200 : vector<2x32xf32>
    %277 = arith.addf %275, %276 : vector<2x32xf32>
    %278 = vector.extract_strided_slice %246 {offsets = [0, 96], sizes = [2, 96], strides = [1, 1]} : vector<2x192xf32> to vector<2x96xf32>
    %279 = arith.truncf %231 : vector<2x32xf32> to vector<2x32xbf16>
    %cst_68 = arith.constant dense<0.000000e+00> : vector<2x96xf32>
    %280 = tpu.matmul %279, %3, %cst_68 {dimension_numbers = #tpu.dot_dimension_numbers<[1], [0], [0], [1], [0, 0, 1, 1], [], []>} : vector<2x32xbf16>, vector<32x96xbf16>, vector<2x96xf32> -> vector<2x96xf32>
    %281 = vector.extract_strided_slice %278 {offsets = [0, 0], sizes = [2, 32], strides = [1, 1]} : vector<2x96xf32> to vector<2x32xf32>
    %282 = vector.extract_strided_slice %280 {offsets = [0, 0], sizes = [2, 32], strides = [1, 1]} : vector<2x96xf32> to vector<2x32xf32>
    %283 = arith.addf %281, %282 : vector<2x32xf32>
    %284 = arith.negf %283 : vector<2x32xf32>
    %285 = math.exp %284 : vector<2x32xf32>
    %cst_69 = arith.constant 1.000000e+00 : f32
    %286 = vector.broadcast %cst_69 : f32 to vector<2x32xf32>
    %287 = arith.addf %286, %285 : vector<2x32xf32>
    %288 = arith.divf %286, %287 : vector<2x32xf32>
    %289 = vector.extract_strided_slice %278 {offsets = [0, 32], sizes = [2, 32], strides = [1, 1]} : vector<2x96xf32> to vector<2x32xf32>
    %290 = vector.extract_strided_slice %280 {offsets = [0, 32], sizes = [2, 32], strides = [1, 1]} : vector<2x96xf32> to vector<2x32xf32>
    %291 = arith.addf %289, %290 : vector<2x32xf32>
    %292 = arith.negf %291 : vector<2x32xf32>
    %293 = math.exp %292 : vector<2x32xf32>
    %cst_70 = arith.constant 1.000000e+00 : f32
    %294 = vector.broadcast %cst_70 : f32 to vector<2x32xf32>
    %295 = arith.addf %294, %293 : vector<2x32xf32>
    %296 = arith.divf %294, %295 : vector<2x32xf32>
    %297 = vector.extract_strided_slice %278 {offsets = [0, 64], sizes = [2, 32], strides = [1, 1]} : vector<2x96xf32> to vector<2x32xf32>
    %298 = vector.extract_strided_slice %280 {offsets = [0, 64], sizes = [2, 32], strides = [1, 1]} : vector<2x96xf32> to vector<2x32xf32>
    %299 = vector.broadcast %7 : vector<1x32xf32> to vector<2x32xf32>
    %300 = arith.addf %298, %299 : vector<2x32xf32>
    %301 = arith.mulf %288, %300 : vector<2x32xf32>
    %302 = arith.addf %297, %301 : vector<2x32xf32>
    %303 = math.tanh %302 : vector<2x32xf32>
    %cst_71 = arith.constant 1.000000e+00 : f32
    %304 = vector.broadcast %cst_71 : f32 to vector<2x32xf32>
    %305 = arith.subf %304, %296 : vector<2x32xf32>
    %306 = arith.mulf %305, %303 : vector<2x32xf32>
    %307 = arith.mulf %296, %231 : vector<2x32xf32>
    %308 = arith.addf %306, %307 : vector<2x32xf32>
    %309 = arith.index_cast %c3_i32 : i32 to index
    %c0_72 = arith.constant 0 : index
    %c0_73 = arith.constant 0 : index
    %310 = vector.load %arg3[%309, %c0_72, %c0_73] : memref<8x2x64xf32, #tpu.memory_space<vmem>>, vector<1x2x32xf32>
    %311 = vector.shape_cast %310 : vector<1x2x32xf32> to vector<2x32xf32>
    %312 = vector.shape_cast %277 : vector<2x32xf32> to vector<1x2x32xf32>
    tpu.vector_store %arg3[%309, %c0_72, %c0_73], %312 {strides = array<i32>} : memref<8x2x64xf32, #tpu.memory_space<vmem>>, vector<1x2x32xf32>,
    %313 = arith.index_cast %240 : i32 to index
    %c0_74 = arith.constant 0 : index
    %c32_75 = arith.constant 32 : index
    %314 = vector.load %arg3[%313, %c0_74, %c32_75] : memref<8x2x64xf32, #tpu.memory_space<vmem>>, vector<1x2x32xf32>
    %315 = vector.shape_cast %314 : vector<1x2x32xf32> to vector<2x32xf32>
    %316 = vector.shape_cast %308 : vector<2x32xf32> to vector<1x2x32xf32>
    tpu.vector_store %arg3[%313, %c0_74, %c32_75], %316 {strides = array<i32>} : memref<8x2x64xf32, #tpu.memory_space<vmem>>, vector<1x2x32xf32>,
    %c4_i32 = arith.constant 4 : i32
    %c7_i32_76 = arith.constant 7 : i32
    %317 = arith.subi %c7_i32_76, %c4_i32 : i32
    %318 = arith.index_cast %c4_i32 : i32 to index
    %c0_77 = arith.constant 0 : index
    %c0_78 = arith.constant 0 : index
    %319 = vector.load %arg0[%318, %c0_77, %c0_78] : memref<8x2x192xf32, #tpu.memory_space<vmem>>, vector<1x2x192xf32>
    %320 = vector.shape_cast %319 : vector<1x2x192xf32> to vector<2x192xf32>
    %321 = arith.index_cast %317 : i32 to index
    %c0_79 = arith.constant 0 : index
    %c0_80 = arith.constant 0 : index
    %322 = vector.load %arg0[%321, %c0_79, %c0_80] : memref<8x2x192xf32, #tpu.memory_space<vmem>>, vector<1x2x192xf32>
    %323 = vector.shape_cast %322 : vector<1x2x192xf32> to vector<2x192xf32>
    %324 = vector.extract_strided_slice %320 {offsets = [0, 0], sizes = [2, 96], strides = [1, 1]} : vector<2x192xf32> to vector<2x96xf32>
    %325 = arith.truncf %277 : vector<2x32xf32> to vector<2x32xbf16>
    %cst_81 = arith.constant dense<0.000000e+00> : vector<2x96xf32>
    %326 = tpu.matmul %325, %1, %cst_81 {dimension_numbers = #tpu.dot_dimension_numbers<[1], [0], [0], [1], [0, 0, 1, 1], [], []>} : vector<2x32xbf16>, vector<32x96xbf16>, vector<2x96xf32> -> vector<2x96xf32>
    %327 = vector.extract_strided_slice %324 {offsets = [0, 0], sizes = [2, 32], strides = [1, 1]} : vector<2x96xf32> to vector<2x32xf32>
    %328 = vector.extract_strided_slice %326 {offsets = [0, 0], sizes = [2, 32], strides = [1, 1]} : vector<2x96xf32> to vector<2x32xf32>
    %329 = arith.addf %327, %328 : vector<2x32xf32>
    %330 = arith.negf %329 : vector<2x32xf32>
    %331 = math.exp %330 : vector<2x32xf32>
    %cst_82 = arith.constant 1.000000e+00 : f32
    %332 = vector.broadcast %cst_82 : f32 to vector<2x32xf32>
    %333 = arith.addf %332, %331 : vector<2x32xf32>
    %334 = arith.divf %332, %333 : vector<2x32xf32>
    %335 = vector.extract_strided_slice %324 {offsets = [0, 32], sizes = [2, 32], strides = [1, 1]} : vector<2x96xf32> to vector<2x32xf32>
    %336 = vector.extract_strided_slice %326 {offsets = [0, 32], sizes = [2, 32], strides = [1, 1]} : vector<2x96xf32> to vector<2x32xf32>
    %337 = arith.addf %335, %336 : vector<2x32xf32>
    %338 = arith.negf %337 : vector<2x32xf32>
    %339 = math.exp %338 : vector<2x32xf32>
    %cst_83 = arith.constant 1.000000e+00 : f32
    %340 = vector.broadcast %cst_83 : f32 to vector<2x32xf32>
    %341 = arith.addf %340, %339 : vector<2x32xf32>
    %342 = arith.divf %340, %341 : vector<2x32xf32>
    %343 = vector.extract_strided_slice %324 {offsets = [0, 64], sizes = [2, 32], strides = [1, 1]} : vector<2x96xf32> to vector<2x32xf32>
    %344 = vector.extract_strided_slice %326 {offsets = [0, 64], sizes = [2, 32], strides = [1, 1]} : vector<2x96xf32> to vector<2x32xf32>
    %345 = vector.broadcast %5 : vector<1x32xf32> to vector<2x32xf32>
    %346 = arith.addf %344, %345 : vector<2x32xf32>
    %347 = arith.mulf %334, %346 : vector<2x32xf32>
    %348 = arith.addf %343, %347 : vector<2x32xf32>
    %349 = math.tanh %348 : vector<2x32xf32>
    %cst_84 = arith.constant 1.000000e+00 : f32
    %350 = vector.broadcast %cst_84 : f32 to vector<2x32xf32>
    %351 = arith.subf %350, %342 : vector<2x32xf32>
    %352 = arith.mulf %351, %349 : vector<2x32xf32>
    %353 = arith.mulf %342, %277 : vector<2x32xf32>
    %354 = arith.addf %352, %353 : vector<2x32xf32>
    %355 = vector.extract_strided_slice %323 {offsets = [0, 96], sizes = [2, 96], strides = [1, 1]} : vector<2x192xf32> to vector<2x96xf32>
    %356 = arith.truncf %308 : vector<2x32xf32> to vector<2x32xbf16>
    %cst_85 = arith.constant dense<0.000000e+00> : vector<2x96xf32>
    %357 = tpu.matmul %356, %3, %cst_85 {dimension_numbers = #tpu.dot_dimension_numbers<[1], [0], [0], [1], [0, 0, 1, 1], [], []>} : vector<2x32xbf16>, vector<32x96xbf16>, vector<2x96xf32> -> vector<2x96xf32>
    %358 = vector.extract_strided_slice %355 {offsets = [0, 0], sizes = [2, 32], strides = [1, 1]} : vector<2x96xf32> to vector<2x32xf32>
    %359 = vector.extract_strided_slice %357 {offsets = [0, 0], sizes = [2, 32], strides = [1, 1]} : vector<2x96xf32> to vector<2x32xf32>
    %360 = arith.addf %358, %359 : vector<2x32xf32>
    %361 = arith.negf %360 : vector<2x32xf32>
    %362 = math.exp %361 : vector<2x32xf32>
    %cst_86 = arith.constant 1.000000e+00 : f32
    %363 = vector.broadcast %cst_86 : f32 to vector<2x32xf32>
    %364 = arith.addf %363, %362 : vector<2x32xf32>
    %365 = arith.divf %363, %364 : vector<2x32xf32>
    %366 = vector.extract_strided_slice %355 {offsets = [0, 32], sizes = [2, 32], strides = [1, 1]} : vector<2x96xf32> to vector<2x32xf32>
    %367 = vector.extract_strided_slice %357 {offsets = [0, 32], sizes = [2, 32], strides = [1, 1]} : vector<2x96xf32> to vector<2x32xf32>
    %368 = arith.addf %366, %367 : vector<2x32xf32>
    %369 = arith.negf %368 : vector<2x32xf32>
    %370 = math.exp %369 : vector<2x32xf32>
    %cst_87 = arith.constant 1.000000e+00 : f32
    %371 = vector.broadcast %cst_87 : f32 to vector<2x32xf32>
    %372 = arith.addf %371, %370 : vector<2x32xf32>
    %373 = arith.divf %371, %372 : vector<2x32xf32>
    %374 = vector.extract_strided_slice %355 {offsets = [0, 64], sizes = [2, 32], strides = [1, 1]} : vector<2x96xf32> to vector<2x32xf32>
    %375 = vector.extract_strided_slice %357 {offsets = [0, 64], sizes = [2, 32], strides = [1, 1]} : vector<2x96xf32> to vector<2x32xf32>
    %376 = vector.broadcast %7 : vector<1x32xf32> to vector<2x32xf32>
    %377 = arith.addf %375, %376 : vector<2x32xf32>
    %378 = arith.mulf %365, %377 : vector<2x32xf32>
    %379 = arith.addf %374, %378 : vector<2x32xf32>
    %380 = math.tanh %379 : vector<2x32xf32>
    %cst_88 = arith.constant 1.000000e+00 : f32
    %381 = vector.broadcast %cst_88 : f32 to vector<2x32xf32>
    %382 = arith.subf %381, %373 : vector<2x32xf32>
    %383 = arith.mulf %382, %380 : vector<2x32xf32>
    %384 = arith.mulf %373, %308 : vector<2x32xf32>
    %385 = arith.addf %383, %384 : vector<2x32xf32>
    %386 = arith.index_cast %c4_i32 : i32 to index
    %c0_89 = arith.constant 0 : index
    %c0_90 = arith.constant 0 : index
    %387 = vector.load %arg3[%386, %c0_89, %c0_90] : memref<8x2x64xf32, #tpu.memory_space<vmem>>, vector<1x2x32xf32>
    %388 = vector.shape_cast %387 : vector<1x2x32xf32> to vector<2x32xf32>
    %389 = vector.shape_cast %354 : vector<2x32xf32> to vector<1x2x32xf32>
    tpu.vector_store %arg3[%386, %c0_89, %c0_90], %389 {strides = array<i32>} : memref<8x2x64xf32, #tpu.memory_space<vmem>>, vector<1x2x32xf32>,
    %390 = arith.index_cast %317 : i32 to index
    %c0_91 = arith.constant 0 : index
    %c32_92 = arith.constant 32 : index
    %391 = vector.load %arg3[%390, %c0_91, %c32_92] : memref<8x2x64xf32, #tpu.memory_space<vmem>>, vector<1x2x32xf32>
    %392 = vector.shape_cast %391 : vector<1x2x32xf32> to vector<2x32xf32>
    %393 = vector.shape_cast %385 : vector<2x32xf32> to vector<1x2x32xf32>
    tpu.vector_store %arg3[%390, %c0_91, %c32_92], %393 {strides = array<i32>} : memref<8x2x64xf32, #tpu.memory_space<vmem>>, vector<1x2x32xf32>,
    %c5_i32 = arith.constant 5 : i32
    %c7_i32_93 = arith.constant 7 : i32
    %394 = arith.subi %c7_i32_93, %c5_i32 : i32
    %395 = arith.index_cast %c5_i32 : i32 to index
    %c0_94 = arith.constant 0 : index
    %c0_95 = arith.constant 0 : index
    %396 = vector.load %arg0[%395, %c0_94, %c0_95] : memref<8x2x192xf32, #tpu.memory_space<vmem>>, vector<1x2x192xf32>
    %397 = vector.shape_cast %396 : vector<1x2x192xf32> to vector<2x192xf32>
    %398 = arith.index_cast %394 : i32 to index
    %c0_96 = arith.constant 0 : index
    %c0_97 = arith.constant 0 : index
    %399 = vector.load %arg0[%398, %c0_96, %c0_97] : memref<8x2x192xf32, #tpu.memory_space<vmem>>, vector<1x2x192xf32>
    %400 = vector.shape_cast %399 : vector<1x2x192xf32> to vector<2x192xf32>
    %401 = vector.extract_strided_slice %397 {offsets = [0, 0], sizes = [2, 96], strides = [1, 1]} : vector<2x192xf32> to vector<2x96xf32>
    %402 = arith.truncf %354 : vector<2x32xf32> to vector<2x32xbf16>
    %cst_98 = arith.constant dense<0.000000e+00> : vector<2x96xf32>
    %403 = tpu.matmul %402, %1, %cst_98 {dimension_numbers = #tpu.dot_dimension_numbers<[1], [0], [0], [1], [0, 0, 1, 1], [], []>} : vector<2x32xbf16>, vector<32x96xbf16>, vector<2x96xf32> -> vector<2x96xf32>
    %404 = vector.extract_strided_slice %401 {offsets = [0, 0], sizes = [2, 32], strides = [1, 1]} : vector<2x96xf32> to vector<2x32xf32>
    %405 = vector.extract_strided_slice %403 {offsets = [0, 0], sizes = [2, 32], strides = [1, 1]} : vector<2x96xf32> to vector<2x32xf32>
    %406 = arith.addf %404, %405 : vector<2x32xf32>
    %407 = arith.negf %406 : vector<2x32xf32>
    %408 = math.exp %407 : vector<2x32xf32>
    %cst_99 = arith.constant 1.000000e+00 : f32
    %409 = vector.broadcast %cst_99 : f32 to vector<2x32xf32>
    %410 = arith.addf %409, %408 : vector<2x32xf32>
    %411 = arith.divf %409, %410 : vector<2x32xf32>
    %412 = vector.extract_strided_slice %401 {offsets = [0, 32], sizes = [2, 32], strides = [1, 1]} : vector<2x96xf32> to vector<2x32xf32>
    %413 = vector.extract_strided_slice %403 {offsets = [0, 32], sizes = [2, 32], strides = [1, 1]} : vector<2x96xf32> to vector<2x32xf32>
    %414 = arith.addf %412, %413 : vector<2x32xf32>
    %415 = arith.negf %414 : vector<2x32xf32>
    %416 = math.exp %415 : vector<2x32xf32>
    %cst_100 = arith.constant 1.000000e+00 : f32
    %417 = vector.broadcast %cst_100 : f32 to vector<2x32xf32>
    %418 = arith.addf %417, %416 : vector<2x32xf32>
    %419 = arith.divf %417, %418 : vector<2x32xf32>
    %420 = vector.extract_strided_slice %401 {offsets = [0, 64], sizes = [2, 32], strides = [1, 1]} : vector<2x96xf32> to vector<2x32xf32>
    %421 = vector.extract_strided_slice %403 {offsets = [0, 64], sizes = [2, 32], strides = [1, 1]} : vector<2x96xf32> to vector<2x32xf32>
    %422 = vector.broadcast %5 : vector<1x32xf32> to vector<2x32xf32>
    %423 = arith.addf %421, %422 : vector<2x32xf32>
    %424 = arith.mulf %411, %423 : vector<2x32xf32>
    %425 = arith.addf %420, %424 : vector<2x32xf32>
    %426 = math.tanh %425 : vector<2x32xf32>
    %cst_101 = arith.constant 1.000000e+00 : f32
    %427 = vector.broadcast %cst_101 : f32 to vector<2x32xf32>
    %428 = arith.subf %427, %419 : vector<2x32xf32>
    %429 = arith.mulf %428, %426 : vector<2x32xf32>
    %430 = arith.mulf %419, %354 : vector<2x32xf32>
    %431 = arith.addf %429, %430 : vector<2x32xf32>
    %432 = vector.extract_strided_slice %400 {offsets = [0, 96], sizes = [2, 96], strides = [1, 1]} : vector<2x192xf32> to vector<2x96xf32>
    %433 = arith.truncf %385 : vector<2x32xf32> to vector<2x32xbf16>
    %cst_102 = arith.constant dense<0.000000e+00> : vector<2x96xf32>
    %434 = tpu.matmul %433, %3, %cst_102 {dimension_numbers = #tpu.dot_dimension_numbers<[1], [0], [0], [1], [0, 0, 1, 1], [], []>} : vector<2x32xbf16>, vector<32x96xbf16>, vector<2x96xf32> -> vector<2x96xf32>
    %435 = vector.extract_strided_slice %432 {offsets = [0, 0], sizes = [2, 32], strides = [1, 1]} : vector<2x96xf32> to vector<2x32xf32>
    %436 = vector.extract_strided_slice %434 {offsets = [0, 0], sizes = [2, 32], strides = [1, 1]} : vector<2x96xf32> to vector<2x32xf32>
    %437 = arith.addf %435, %436 : vector<2x32xf32>
    %438 = arith.negf %437 : vector<2x32xf32>
    %439 = math.exp %438 : vector<2x32xf32>
    %cst_103 = arith.constant 1.000000e+00 : f32
    %440 = vector.broadcast %cst_103 : f32 to vector<2x32xf32>
    %441 = arith.addf %440, %439 : vector<2x32xf32>
    %442 = arith.divf %440, %441 : vector<2x32xf32>
    %443 = vector.extract_strided_slice %432 {offsets = [0, 32], sizes = [2, 32], strides = [1, 1]} : vector<2x96xf32> to vector<2x32xf32>
    %444 = vector.extract_strided_slice %434 {offsets = [0, 32], sizes = [2, 32], strides = [1, 1]} : vector<2x96xf32> to vector<2x32xf32>
    %445 = arith.addf %443, %444 : vector<2x32xf32>
    %446 = arith.negf %445 : vector<2x32xf32>
    %447 = math.exp %446 : vector<2x32xf32>
    %cst_104 = arith.constant 1.000000e+00 : f32
    %448 = vector.broadcast %cst_104 : f32 to vector<2x32xf32>
    %449 = arith.addf %448, %447 : vector<2x32xf32>
    %450 = arith.divf %448, %449 : vector<2x32xf32>
    %451 = vector.extract_strided_slice %432 {offsets = [0, 64], sizes = [2, 32], strides = [1, 1]} : vector<2x96xf32> to vector<2x32xf32>
    %452 = vector.extract_strided_slice %434 {offsets = [0, 64], sizes = [2, 32], strides = [1, 1]} : vector<2x96xf32> to vector<2x32xf32>
    %453 = vector.broadcast %7 : vector<1x32xf32> to vector<2x32xf32>
    %454 = arith.addf %452, %453 : vector<2x32xf32>
    %455 = arith.mulf %442, %454 : vector<2x32xf32>
    %456 = arith.addf %451, %455 : vector<2x32xf32>
    %457 = math.tanh %456 : vector<2x32xf32>
    %cst_105 = arith.constant 1.000000e+00 : f32
    %458 = vector.broadcast %cst_105 : f32 to vector<2x32xf32>
    %459 = arith.subf %458, %450 : vector<2x32xf32>
    %460 = arith.mulf %459, %457 : vector<2x32xf32>
    %461 = arith.mulf %450, %385 : vector<2x32xf32>
    %462 = arith.addf %460, %461 : vector<2x32xf32>
    %463 = arith.index_cast %c5_i32 : i32 to index
    %c0_106 = arith.constant 0 : index
    %c0_107 = arith.constant 0 : index
    %464 = vector.load %arg3[%463, %c0_106, %c0_107] : memref<8x2x64xf32, #tpu.memory_space<vmem>>, vector<1x2x32xf32>
    %465 = vector.shape_cast %464 : vector<1x2x32xf32> to vector<2x32xf32>
    %466 = vector.shape_cast %431 : vector<2x32xf32> to vector<1x2x32xf32>
    tpu.vector_store %arg3[%463, %c0_106, %c0_107], %466 {strides = array<i32>} : memref<8x2x64xf32, #tpu.memory_space<vmem>>, vector<1x2x32xf32>,
    %467 = arith.index_cast %394 : i32 to index
    %c0_108 = arith.constant 0 : index
    %c32_109 = arith.constant 32 : index
    %468 = vector.load %arg3[%467, %c0_108, %c32_109] : memref<8x2x64xf32, #tpu.memory_space<vmem>>, vector<1x2x32xf32>
    %469 = vector.shape_cast %468 : vector<1x2x32xf32> to vector<2x32xf32>
    %470 = vector.shape_cast %462 : vector<2x32xf32> to vector<1x2x32xf32>
    tpu.vector_store %arg3[%467, %c0_108, %c32_109], %470 {strides = array<i32>} : memref<8x2x64xf32, #tpu.memory_space<vmem>>, vector<1x2x32xf32>,
    %c6_i32 = arith.constant 6 : i32
    %c7_i32_110 = arith.constant 7 : i32
    %471 = arith.subi %c7_i32_110, %c6_i32 : i32
    %472 = arith.index_cast %c6_i32 : i32 to index
    %c0_111 = arith.constant 0 : index
    %c0_112 = arith.constant 0 : index
    %473 = vector.load %arg0[%472, %c0_111, %c0_112] : memref<8x2x192xf32, #tpu.memory_space<vmem>>, vector<1x2x192xf32>
    %474 = vector.shape_cast %473 : vector<1x2x192xf32> to vector<2x192xf32>
    %475 = arith.index_cast %471 : i32 to index
    %c0_113 = arith.constant 0 : index
    %c0_114 = arith.constant 0 : index
    %476 = vector.load %arg0[%475, %c0_113, %c0_114] : memref<8x2x192xf32, #tpu.memory_space<vmem>>, vector<1x2x192xf32>
    %477 = vector.shape_cast %476 : vector<1x2x192xf32> to vector<2x192xf32>
    %478 = vector.extract_strided_slice %474 {offsets = [0, 0], sizes = [2, 96], strides = [1, 1]} : vector<2x192xf32> to vector<2x96xf32>
    %479 = arith.truncf %431 : vector<2x32xf32> to vector<2x32xbf16>
    %cst_115 = arith.constant dense<0.000000e+00> : vector<2x96xf32>
    %480 = tpu.matmul %479, %1, %cst_115 {dimension_numbers = #tpu.dot_dimension_numbers<[1], [0], [0], [1], [0, 0, 1, 1], [], []>} : vector<2x32xbf16>, vector<32x96xbf16>, vector<2x96xf32> -> vector<2x96xf32>
    %481 = vector.extract_strided_slice %478 {offsets = [0, 0], sizes = [2, 32], strides = [1, 1]} : vector<2x96xf32> to vector<2x32xf32>
    %482 = vector.extract_strided_slice %480 {offsets = [0, 0], sizes = [2, 32], strides = [1, 1]} : vector<2x96xf32> to vector<2x32xf32>
    %483 = arith.addf %481, %482 : vector<2x32xf32>
    %484 = arith.negf %483 : vector<2x32xf32>
    %485 = math.exp %484 : vector<2x32xf32>
    %cst_116 = arith.constant 1.000000e+00 : f32
    %486 = vector.broadcast %cst_116 : f32 to vector<2x32xf32>
    %487 = arith.addf %486, %485 : vector<2x32xf32>
    %488 = arith.divf %486, %487 : vector<2x32xf32>
    %489 = vector.extract_strided_slice %478 {offsets = [0, 32], sizes = [2, 32], strides = [1, 1]} : vector<2x96xf32> to vector<2x32xf32>
    %490 = vector.extract_strided_slice %480 {offsets = [0, 32], sizes = [2, 32], strides = [1, 1]} : vector<2x96xf32> to vector<2x32xf32>
    %491 = arith.addf %489, %490 : vector<2x32xf32>
    %492 = arith.negf %491 : vector<2x32xf32>
    %493 = math.exp %492 : vector<2x32xf32>
    %cst_117 = arith.constant 1.000000e+00 : f32
    %494 = vector.broadcast %cst_117 : f32 to vector<2x32xf32>
    %495 = arith.addf %494, %493 : vector<2x32xf32>
    %496 = arith.divf %494, %495 : vector<2x32xf32>
    %497 = vector.extract_strided_slice %478 {offsets = [0, 64], sizes = [2, 32], strides = [1, 1]} : vector<2x96xf32> to vector<2x32xf32>
    %498 = vector.extract_strided_slice %480 {offsets = [0, 64], sizes = [2, 32], strides = [1, 1]} : vector<2x96xf32> to vector<2x32xf32>
    %499 = vector.broadcast %5 : vector<1x32xf32> to vector<2x32xf32>
    %500 = arith.addf %498, %499 : vector<2x32xf32>
    %501 = arith.mulf %488, %500 : vector<2x32xf32>
    %502 = arith.addf %497, %501 : vector<2x32xf32>
    %503 = math.tanh %502 : vector<2x32xf32>
    %cst_118 = arith.constant 1.000000e+00 : f32
    %504 = vector.broadcast %cst_118 : f32 to vector<2x32xf32>
    %505 = arith.subf %504, %496 : vector<2x32xf32>
    %506 = arith.mulf %505, %503 : vector<2x32xf32>
    %507 = arith.mulf %496, %431 : vector<2x32xf32>
    %508 = arith.addf %506, %507 : vector<2x32xf32>
    %509 = vector.extract_strided_slice %477 {offsets = [0, 96], sizes = [2, 96], strides = [1, 1]} : vector<2x192xf32> to vector<2x96xf32>
    %510 = arith.truncf %462 : vector<2x32xf32> to vector<2x32xbf16>
    %cst_119 = arith.constant dense<0.000000e+00> : vector<2x96xf32>
    %511 = tpu.matmul %510, %3, %cst_119 {dimension_numbers = #tpu.dot_dimension_numbers<[1], [0], [0], [1], [0, 0, 1, 1], [], []>} : vector<2x32xbf16>, vector<32x96xbf16>, vector<2x96xf32> -> vector<2x96xf32>
    %512 = vector.extract_strided_slice %509 {offsets = [0, 0], sizes = [2, 32], strides = [1, 1]} : vector<2x96xf32> to vector<2x32xf32>
    %513 = vector.extract_strided_slice %511 {offsets = [0, 0], sizes = [2, 32], strides = [1, 1]} : vector<2x96xf32> to vector<2x32xf32>
    %514 = arith.addf %512, %513 : vector<2x32xf32>
    %515 = arith.negf %514 : vector<2x32xf32>
    %516 = math.exp %515 : vector<2x32xf32>
    %cst_120 = arith.constant 1.000000e+00 : f32
    %517 = vector.broadcast %cst_120 : f32 to vector<2x32xf32>
    %518 = arith.addf %517, %516 : vector<2x32xf32>
    %519 = arith.divf %517, %518 : vector<2x32xf32>
    %520 = vector.extract_strided_slice %509 {offsets = [0, 32], sizes = [2, 32], strides = [1, 1]} : vector<2x96xf32> to vector<2x32xf32>
    %521 = vector.extract_strided_slice %511 {offsets = [0, 32], sizes = [2, 32], strides = [1, 1]} : vector<2x96xf32> to vector<2x32xf32>
    %522 = arith.addf %520, %521 : vector<2x32xf32>
    %523 = arith.negf %522 : vector<2x32xf32>
    %524 = math.exp %523 : vector<2x32xf32>
    %cst_121 = arith.constant 1.000000e+00 : f32
    %525 = vector.broadcast %cst_121 : f32 to vector<2x32xf32>
    %526 = arith.addf %525, %524 : vector<2x32xf32>
    %527 = arith.divf %525, %526 : vector<2x32xf32>
    %528 = vector.extract_strided_slice %509 {offsets = [0, 64], sizes = [2, 32], strides = [1, 1]} : vector<2x96xf32> to vector<2x32xf32>
    %529 = vector.extract_strided_slice %511 {offsets = [0, 64], sizes = [2, 32], strides = [1, 1]} : vector<2x96xf32> to vector<2x32xf32>
    %530 = vector.broadcast %7 : vector<1x32xf32> to vector<2x32xf32>
    %531 = arith.addf %529, %530 : vector<2x32xf32>
    %532 = arith.mulf %519, %531 : vector<2x32xf32>
    %533 = arith.addf %528, %532 : vector<2x32xf32>
    %534 = math.tanh %533 : vector<2x32xf32>
    %cst_122 = arith.constant 1.000000e+00 : f32
    %535 = vector.broadcast %cst_122 : f32 to vector<2x32xf32>
    %536 = arith.subf %535, %527 : vector<2x32xf32>
    %537 = arith.mulf %536, %534 : vector<2x32xf32>
    %538 = arith.mulf %527, %462 : vector<2x32xf32>
    %539 = arith.addf %537, %538 : vector<2x32xf32>
    %540 = arith.index_cast %c6_i32 : i32 to index
    %c0_123 = arith.constant 0 : index
    %c0_124 = arith.constant 0 : index
    %541 = vector.load %arg3[%540, %c0_123, %c0_124] : memref<8x2x64xf32, #tpu.memory_space<vmem>>, vector<1x2x32xf32>
    %542 = vector.shape_cast %541 : vector<1x2x32xf32> to vector<2x32xf32>
    %543 = vector.shape_cast %508 : vector<2x32xf32> to vector<1x2x32xf32>
    tpu.vector_store %arg3[%540, %c0_123, %c0_124], %543 {strides = array<i32>} : memref<8x2x64xf32, #tpu.memory_space<vmem>>, vector<1x2x32xf32>,
    %544 = arith.index_cast %471 : i32 to index
    %c0_125 = arith.constant 0 : index
    %c32_126 = arith.constant 32 : index
    %545 = vector.load %arg3[%544, %c0_125, %c32_126] : memref<8x2x64xf32, #tpu.memory_space<vmem>>, vector<1x2x32xf32>
    %546 = vector.shape_cast %545 : vector<1x2x32xf32> to vector<2x32xf32>
    %547 = vector.shape_cast %539 : vector<2x32xf32> to vector<1x2x32xf32>
    tpu.vector_store %arg3[%544, %c0_125, %c32_126], %547 {strides = array<i32>} : memref<8x2x64xf32, #tpu.memory_space<vmem>>, vector<1x2x32xf32>,
    %c7_i32_127 = arith.constant 7 : i32
    %c7_i32_128 = arith.constant 7 : i32
    %548 = arith.subi %c7_i32_128, %c7_i32_127 : i32
    %549 = arith.index_cast %c7_i32_127 : i32 to index
    %c0_129 = arith.constant 0 : index
    %c0_130 = arith.constant 0 : index
    %550 = vector.load %arg0[%549, %c0_129, %c0_130] : memref<8x2x192xf32, #tpu.memory_space<vmem>>, vector<1x2x192xf32>
    %551 = vector.shape_cast %550 : vector<1x2x192xf32> to vector<2x192xf32>
    %552 = arith.index_cast %548 : i32 to index
    %c0_131 = arith.constant 0 : index
    %c0_132 = arith.constant 0 : index
    %553 = vector.load %arg0[%552, %c0_131, %c0_132] : memref<8x2x192xf32, #tpu.memory_space<vmem>>, vector<1x2x192xf32>
    %554 = vector.shape_cast %553 : vector<1x2x192xf32> to vector<2x192xf32>
    %555 = vector.extract_strided_slice %551 {offsets = [0, 0], sizes = [2, 96], strides = [1, 1]} : vector<2x192xf32> to vector<2x96xf32>
    %556 = arith.truncf %508 : vector<2x32xf32> to vector<2x32xbf16>
    %cst_133 = arith.constant dense<0.000000e+00> : vector<2x96xf32>
    %557 = tpu.matmul %556, %1, %cst_133 {dimension_numbers = #tpu.dot_dimension_numbers<[1], [0], [0], [1], [0, 0, 1, 1], [], []>} : vector<2x32xbf16>, vector<32x96xbf16>, vector<2x96xf32> -> vector<2x96xf32>
    %558 = vector.extract_strided_slice %555 {offsets = [0, 0], sizes = [2, 32], strides = [1, 1]} : vector<2x96xf32> to vector<2x32xf32>
    %559 = vector.extract_strided_slice %557 {offsets = [0, 0], sizes = [2, 32], strides = [1, 1]} : vector<2x96xf32> to vector<2x32xf32>
    %560 = arith.addf %558, %559 : vector<2x32xf32>
    %561 = arith.negf %560 : vector<2x32xf32>
    %562 = math.exp %561 : vector<2x32xf32>
    %cst_134 = arith.constant 1.000000e+00 : f32
    %563 = vector.broadcast %cst_134 : f32 to vector<2x32xf32>
    %564 = arith.addf %563, %562 : vector<2x32xf32>
    %565 = arith.divf %563, %564 : vector<2x32xf32>
    %566 = vector.extract_strided_slice %555 {offsets = [0, 32], sizes = [2, 32], strides = [1, 1]} : vector<2x96xf32> to vector<2x32xf32>
    %567 = vector.extract_strided_slice %557 {offsets = [0, 32], sizes = [2, 32], strides = [1, 1]} : vector<2x96xf32> to vector<2x32xf32>
    %568 = arith.addf %566, %567 : vector<2x32xf32>
    %569 = arith.negf %568 : vector<2x32xf32>
    %570 = math.exp %569 : vector<2x32xf32>
    %cst_135 = arith.constant 1.000000e+00 : f32
    %571 = vector.broadcast %cst_135 : f32 to vector<2x32xf32>
    %572 = arith.addf %571, %570 : vector<2x32xf32>
    %573 = arith.divf %571, %572 : vector<2x32xf32>
    %574 = vector.extract_strided_slice %555 {offsets = [0, 64], sizes = [2, 32], strides = [1, 1]} : vector<2x96xf32> to vector<2x32xf32>
    %575 = vector.extract_strided_slice %557 {offsets = [0, 64], sizes = [2, 32], strides = [1, 1]} : vector<2x96xf32> to vector<2x32xf32>
    %576 = vector.broadcast %5 : vector<1x32xf32> to vector<2x32xf32>
    %577 = arith.addf %575, %576 : vector<2x32xf32>
    %578 = arith.mulf %565, %577 : vector<2x32xf32>
    %579 = arith.addf %574, %578 : vector<2x32xf32>
    %580 = math.tanh %579 : vector<2x32xf32>
    %cst_136 = arith.constant 1.000000e+00 : f32
    %581 = vector.broadcast %cst_136 : f32 to vector<2x32xf32>
    %582 = arith.subf %581, %573 : vector<2x32xf32>
    %583 = arith.mulf %582, %580 : vector<2x32xf32>
    %584 = arith.mulf %573, %508 : vector<2x32xf32>
    %585 = arith.addf %583, %584 : vector<2x32xf32>
    %586 = vector.extract_strided_slice %554 {offsets = [0, 96], sizes = [2, 96], strides = [1, 1]} : vector<2x192xf32> to vector<2x96xf32>
    %587 = arith.truncf %539 : vector<2x32xf32> to vector<2x32xbf16>
    %cst_137 = arith.constant dense<0.000000e+00> : vector<2x96xf32>
    %588 = tpu.matmul %587, %3, %cst_137 {dimension_numbers = #tpu.dot_dimension_numbers<[1], [0], [0], [1], [0, 0, 1, 1], [], []>} : vector<2x32xbf16>, vector<32x96xbf16>, vector<2x96xf32> -> vector<2x96xf32>
    %589 = vector.extract_strided_slice %586 {offsets = [0, 0], sizes = [2, 32], strides = [1, 1]} : vector<2x96xf32> to vector<2x32xf32>
    %590 = vector.extract_strided_slice %588 {offsets = [0, 0], sizes = [2, 32], strides = [1, 1]} : vector<2x96xf32> to vector<2x32xf32>
    %591 = arith.addf %589, %590 : vector<2x32xf32>
    %592 = arith.negf %591 : vector<2x32xf32>
    %593 = math.exp %592 : vector<2x32xf32>
    %cst_138 = arith.constant 1.000000e+00 : f32
    %594 = vector.broadcast %cst_138 : f32 to vector<2x32xf32>
    %595 = arith.addf %594, %593 : vector<2x32xf32>
    %596 = arith.divf %594, %595 : vector<2x32xf32>
    %597 = vector.extract_strided_slice %586 {offsets = [0, 32], sizes = [2, 32], strides = [1, 1]} : vector<2x96xf32> to vector<2x32xf32>
    %598 = vector.extract_strided_slice %588 {offsets = [0, 32], sizes = [2, 32], strides = [1, 1]} : vector<2x96xf32> to vector<2x32xf32>
    %599 = arith.addf %597, %598 : vector<2x32xf32>
    %600 = arith.negf %599 : vector<2x32xf32>
    %601 = math.exp %600 : vector<2x32xf32>
    %cst_139 = arith.constant 1.000000e+00 : f32
    %602 = vector.broadcast %cst_139 : f32 to vector<2x32xf32>
    %603 = arith.addf %602, %601 : vector<2x32xf32>
    %604 = arith.divf %602, %603 : vector<2x32xf32>
    %605 = vector.extract_strided_slice %586 {offsets = [0, 64], sizes = [2, 32], strides = [1, 1]} : vector<2x96xf32> to vector<2x32xf32>
    %606 = vector.extract_strided_slice %588 {offsets = [0, 64], sizes = [2, 32], strides = [1, 1]} : vector<2x96xf32> to vector<2x32xf32>
    %607 = vector.broadcast %7 : vector<1x32xf32> to vector<2x32xf32>
    %608 = arith.addf %606, %607 : vector<2x32xf32>
    %609 = arith.mulf %596, %608 : vector<2x32xf32>
    %610 = arith.addf %605, %609 : vector<2x32xf32>
    %611 = math.tanh %610 : vector<2x32xf32>
    %cst_140 = arith.constant 1.000000e+00 : f32
    %612 = vector.broadcast %cst_140 : f32 to vector<2x32xf32>
    %613 = arith.subf %612, %604 : vector<2x32xf32>
    %614 = arith.mulf %613, %611 : vector<2x32xf32>
    %615 = arith.mulf %604, %539 : vector<2x32xf32>
    %616 = arith.addf %614, %615 : vector<2x32xf32>
    %617 = arith.index_cast %c7_i32_127 : i32 to index
    %c0_141 = arith.constant 0 : index
    %c0_142 = arith.constant 0 : index
    %618 = vector.load %arg3[%617, %c0_141, %c0_142] : memref<8x2x64xf32, #tpu.memory_space<vmem>>, vector<1x2x32xf32>
    %619 = vector.shape_cast %618 : vector<1x2x32xf32> to vector<2x32xf32>
    %620 = vector.shape_cast %585 : vector<2x32xf32> to vector<1x2x32xf32>
    tpu.vector_store %arg3[%617, %c0_141, %c0_142], %620 {strides = array<i32>} : memref<8x2x64xf32, #tpu.memory_space<vmem>>, vector<1x2x32xf32>,
    %621 = arith.index_cast %548 : i32 to index
    %c0_143 = arith.constant 0 : index
    %c32_144 = arith.constant 32 : index
    %622 = vector.load %arg3[%621, %c0_143, %c32_144] : memref<8x2x64xf32, #tpu.memory_space<vmem>>, vector<1x2x32xf32>
    %623 = vector.shape_cast %622 : vector<1x2x32xf32> to vector<2x32xf32>
    %624 = vector.shape_cast %616 : vector<2x32xf32> to vector<1x2x32xf32>
    tpu.vector_store %arg3[%621, %c0_143, %c32_144], %624 {strides = array<i32>} : memref<8x2x64xf32, #tpu.memory_space<vmem>>, vector<1x2x32xf32>,
    %c8_i32 = arith.constant 8 : i32
    return
  }
}

module attributes {stable_mosaic.version = 11 : i64} {
  func.func @_dual_head_kernel(%arg0: i32, %arg1: memref<16x64xf32, #tpu.memory_space<vmem>>, %arg2: memref<64x16xbf16, #tpu.memory_space<vmem>>, %arg3: memref<1x16xf32, #tpu.memory_space<vmem>>, %arg4: memref<16x8xbf16, #tpu.memory_space<vmem>>, %arg5: memref<1x8xf32, #tpu.memory_space<vmem>>, %arg6: memref<8x1xbf16, #tpu.memory_space<vmem>>, %arg7: memref<1x1xf32, #tpu.memory_space<vmem>>, %arg8: memref<64x16xbf16, #tpu.memory_space<vmem>>, %arg9: memref<1x16xf32, #tpu.memory_space<vmem>>, %arg10: memref<16x8xbf16, #tpu.memory_space<vmem>>, %arg11: memref<1x8xf32, #tpu.memory_space<vmem>>, %arg12: memref<8x1xbf16, #tpu.memory_space<vmem>>, %arg13: memref<1x1xf32, #tpu.memory_space<vmem>>, %arg14: memref<16x2xf32, #tpu.memory_space<vmem>>) attributes {dimension_semantics = [#tpu.dimension_semantics<parallel>], iteration_bounds = array<i64: 1>, scalar_prefetch = 0 : i64, scratch_operands = 0 : i64, tpu.core_type = #tpu.core_type<tc>, window_params = [{transform_indices = @transform_0, window_bounds = array<i64: 16, 64>}, {pipeline_mode = #tpu.pipeline_mode<synchronous>, transform_indices = @transform_1, window_bounds = array<i64: 64, 16>}, {pipeline_mode = #tpu.pipeline_mode<synchronous>, transform_indices = @transform_2, window_bounds = array<i64: 1, 16>}, {pipeline_mode = #tpu.pipeline_mode<synchronous>, transform_indices = @transform_3, window_bounds = array<i64: 16, 8>}, {pipeline_mode = #tpu.pipeline_mode<synchronous>, transform_indices = @transform_4, window_bounds = array<i64: 1, 8>}, {pipeline_mode = #tpu.pipeline_mode<synchronous>, transform_indices = @transform_5, window_bounds = array<i64: 8, 1>}, {pipeline_mode = #tpu.pipeline_mode<synchronous>, transform_indices = @transform_6, window_bounds = array<i64: 1, 1>}, {pipeline_mode = #tpu.pipeline_mode<synchronous>, transform_indices = @transform_7, window_bounds = array<i64: 64, 16>}, {pipeline_mode = #tpu.pipeline_mode<synchronous>, transform_indices = @transform_8, window_bounds = array<i64: 1, 16>}, {pipeline_mode = #tpu.pipeline_mode<synchronous>, transform_indices = @transform_9, window_bounds = array<i64: 16, 8>}, {pipeline_mode = #tpu.pipeline_mode<synchronous>, transform_indices = @transform_10, window_bounds = array<i64: 1, 8>}, {pipeline_mode = #tpu.pipeline_mode<synchronous>, transform_indices = @transform_11, window_bounds = array<i64: 8, 1>}, {pipeline_mode = #tpu.pipeline_mode<synchronous>, transform_indices = @transform_12, window_bounds = array<i64: 1, 1>}, {transform_indices = @transform_13, window_bounds = array<i64: 16, 2>}]} {
    %c0 = arith.constant 0 : index
    %c0_0 = arith.constant 0 : index
    %0 = vector.load %arg1[%c0, %c0_0] : memref<16x64xf32, #tpu.memory_space<vmem>>, vector<16x64xf32>
    %1 = arith.truncf %0 : vector<16x64xf32> to vector<16x64xbf16>
    %c0_1 = arith.constant 0 : index
    %c0_2 = arith.constant 0 : index
    %2 = vector.load %arg2[%c0_1, %c0_2] : memref<64x16xbf16, #tpu.memory_space<vmem>>, vector<64x16xbf16>
    %cst = arith.constant dense<0.000000e+00> : vector<16x16xf32>
    %3 = tpu.matmul %1, %2, %cst {dimension_numbers = #tpu.dot_dimension_numbers<[1], [0], [0], [1], [0, 0, 1, 1], [], []>} : vector<16x64xbf16>, vector<64x16xbf16>, vector<16x16xf32> -> vector<16x16xf32>
    %c0_3 = arith.constant 0 : index
    %c0_4 = arith.constant 0 : index
    %4 = vector.load %arg3[%c0_3, %c0_4] : memref<1x16xf32, #tpu.memory_space<vmem>>, vector<1x16xf32>
    %5 = vector.broadcast %4 : vector<1x16xf32> to vector<16x16xf32>
    %6 = arith.addf %3, %5 : vector<16x16xf32>
    %cst_5 = arith.constant 0.000000e+00 : f32
    %7 = vector.broadcast %cst_5 : f32 to vector<16x16xf32>
    %8 = arith.maximumf %6, %7 : vector<16x16xf32>
    %9 = arith.truncf %8 : vector<16x16xf32> to vector<16x16xbf16>
    %c0_6 = arith.constant 0 : index
    %c0_7 = arith.constant 0 : index
    %10 = vector.load %arg4[%c0_6, %c0_7] : memref<16x8xbf16, #tpu.memory_space<vmem>>, vector<16x8xbf16>
    %cst_8 = arith.constant dense<0.000000e+00> : vector<16x8xf32>
    %11 = tpu.matmul %9, %10, %cst_8 {dimension_numbers = #tpu.dot_dimension_numbers<[1], [0], [0], [1], [0, 0, 1, 1], [], []>} : vector<16x16xbf16>, vector<16x8xbf16>, vector<16x8xf32> -> vector<16x8xf32>
    %c0_9 = arith.constant 0 : index
    %c0_10 = arith.constant 0 : index
    %12 = vector.load %arg5[%c0_9, %c0_10] : memref<1x8xf32, #tpu.memory_space<vmem>>, vector<1x8xf32>
    %13 = vector.broadcast %12 : vector<1x8xf32> to vector<16x8xf32>
    %14 = arith.addf %11, %13 : vector<16x8xf32>
    %cst_11 = arith.constant 0.000000e+00 : f32
    %15 = vector.broadcast %cst_11 : f32 to vector<16x8xf32>
    %16 = arith.maximumf %14, %15 : vector<16x8xf32>
    %17 = arith.truncf %16 : vector<16x8xf32> to vector<16x8xbf16>
    %c0_12 = arith.constant 0 : index
    %c0_13 = arith.constant 0 : index
    %18 = vector.load %arg6[%c0_12, %c0_13] : memref<8x1xbf16, #tpu.memory_space<vmem>>, vector<8x1xbf16>
    %cst_14 = arith.constant dense<0.000000e+00> : vector<16x1xf32>
    %19 = tpu.matmul %17, %18, %cst_14 {dimension_numbers = #tpu.dot_dimension_numbers<[1], [0], [0], [1], [0, 0, 1, 1], [], []>} : vector<16x8xbf16>, vector<8x1xbf16>, vector<16x1xf32> -> vector<16x1xf32>
    %c0_15 = arith.constant 0 : index
    %c0_16 = arith.constant 0 : index
    %20 = vector.load %arg7[%c0_15, %c0_16] : memref<1x1xf32, #tpu.memory_space<vmem>>, vector<1x1xf32>
    %21 = vector.broadcast %20 : vector<1x1xf32> to vector<16x1xf32>
    %22 = arith.addf %19, %21 : vector<16x1xf32>
    %23 = math.tanh %22 : vector<16x1xf32>
    %c0_17 = arith.constant 0 : index
    %c0_18 = arith.constant 0 : index
    %24 = vector.load %arg8[%c0_17, %c0_18] : memref<64x16xbf16, #tpu.memory_space<vmem>>, vector<64x16xbf16>
    %cst_19 = arith.constant dense<0.000000e+00> : vector<16x16xf32>
    %25 = tpu.matmul %1, %24, %cst_19 {dimension_numbers = #tpu.dot_dimension_numbers<[1], [0], [0], [1], [0, 0, 1, 1], [], []>} : vector<16x64xbf16>, vector<64x16xbf16>, vector<16x16xf32> -> vector<16x16xf32>
    %c0_20 = arith.constant 0 : index
    %c0_21 = arith.constant 0 : index
    %26 = vector.load %arg9[%c0_20, %c0_21] : memref<1x16xf32, #tpu.memory_space<vmem>>, vector<1x16xf32>
    %27 = vector.broadcast %26 : vector<1x16xf32> to vector<16x16xf32>
    %28 = arith.addf %25, %27 : vector<16x16xf32>
    %cst_22 = arith.constant 0.000000e+00 : f32
    %29 = vector.broadcast %cst_22 : f32 to vector<16x16xf32>
    %30 = arith.maximumf %28, %29 : vector<16x16xf32>
    %31 = arith.truncf %30 : vector<16x16xf32> to vector<16x16xbf16>
    %c0_23 = arith.constant 0 : index
    %c0_24 = arith.constant 0 : index
    %32 = vector.load %arg10[%c0_23, %c0_24] : memref<16x8xbf16, #tpu.memory_space<vmem>>, vector<16x8xbf16>
    %cst_25 = arith.constant dense<0.000000e+00> : vector<16x8xf32>
    %33 = tpu.matmul %31, %32, %cst_25 {dimension_numbers = #tpu.dot_dimension_numbers<[1], [0], [0], [1], [0, 0, 1, 1], [], []>} : vector<16x16xbf16>, vector<16x8xbf16>, vector<16x8xf32> -> vector<16x8xf32>
    %c0_26 = arith.constant 0 : index
    %c0_27 = arith.constant 0 : index
    %34 = vector.load %arg11[%c0_26, %c0_27] : memref<1x8xf32, #tpu.memory_space<vmem>>, vector<1x8xf32>
    %35 = vector.broadcast %34 : vector<1x8xf32> to vector<16x8xf32>
    %36 = arith.addf %33, %35 : vector<16x8xf32>
    %cst_28 = arith.constant 0.000000e+00 : f32
    %37 = vector.broadcast %cst_28 : f32 to vector<16x8xf32>
    %38 = arith.maximumf %36, %37 : vector<16x8xf32>
    %39 = arith.truncf %38 : vector<16x8xf32> to vector<16x8xbf16>
    %c0_29 = arith.constant 0 : index
    %c0_30 = arith.constant 0 : index
    %40 = vector.load %arg12[%c0_29, %c0_30] : memref<8x1xbf16, #tpu.memory_space<vmem>>, vector<8x1xbf16>
    %cst_31 = arith.constant dense<0.000000e+00> : vector<16x1xf32>
    %41 = tpu.matmul %39, %40, %cst_31 {dimension_numbers = #tpu.dot_dimension_numbers<[1], [0], [0], [1], [0, 0, 1, 1], [], []>} : vector<16x8xbf16>, vector<8x1xbf16>, vector<16x1xf32> -> vector<16x1xf32>
    %c0_32 = arith.constant 0 : index
    %c0_33 = arith.constant 0 : index
    %42 = vector.load %arg13[%c0_32, %c0_33] : memref<1x1xf32, #tpu.memory_space<vmem>>, vector<1x1xf32>
    %43 = vector.broadcast %42 : vector<1x1xf32> to vector<16x1xf32>
    %44 = arith.addf %41, %43 : vector<16x1xf32>
    %45 = math.tanh %44 : vector<16x1xf32>
    %c0_34 = arith.constant 0 : index
    %c0_35 = arith.constant 0 : index
    %46 = vector.load %arg14[%c0_34, %c0_35] : memref<16x2xf32, #tpu.memory_space<vmem>>, vector<16x1xf32>
    tpu.vector_store %arg14[%c0_34, %c0_35], %23 {strides = array<i32>} : memref<16x2xf32, #tpu.memory_space<vmem>>, vector<16x1xf32>,
    %c0_36 = arith.constant 0 : index
    %c1 = arith.constant 1 : index
    %47 = vector.load %arg14[%c0_36, %c1] : memref<16x2xf32, #tpu.memory_space<vmem>>, vector<16x1xf32>
    tpu.vector_store %arg14[%c0_36, %c1], %45 {strides = array<i32>} : memref<16x2xf32, #tpu.memory_space<vmem>>, vector<16x1xf32>,
    return
  }
  func.func @transform_0(%arg0: i32) -> (i32, i32) {
    %c0_i32 = arith.constant 0 : i32
    %c0_i32_0 = arith.constant 0 : i32
    return %arg0, %c0_i32 : i32, i32
  }
  func.func @transform_1(%arg0: i32) -> (i32, i32) {
    %c0_i32 = arith.constant 0 : i32
    %c0_i32_0 = arith.constant 0 : i32
    %c0_i32_1 = arith.constant 0 : i32
    return %c0_i32, %c0_i32_0 : i32, i32
  }
  func.func @transform_2(%arg0: i32) -> (i32, i32) {
    %c0_i32 = arith.constant 0 : i32
    %c0_i32_0 = arith.constant 0 : i32
    %c0_i32_1 = arith.constant 0 : i32
    return %c0_i32, %c0_i32_0 : i32, i32
  }
  func.func @transform_3(%arg0: i32) -> (i32, i32) {
    %c0_i32 = arith.constant 0 : i32
    %c0_i32_0 = arith.constant 0 : i32
    %c0_i32_1 = arith.constant 0 : i32
    return %c0_i32, %c0_i32_0 : i32, i32
  }
  func.func @transform_4(%arg0: i32) -> (i32, i32) {
    %c0_i32 = arith.constant 0 : i32
    %c0_i32_0 = arith.constant 0 : i32
    %c0_i32_1 = arith.constant 0 : i32
    return %c0_i32, %c0_i32_0 : i32, i32
  }
  func.func @transform_5(%arg0: i32) -> (i32, i32) {
    %c0_i32 = arith.constant 0 : i32
    %c0_i32_0 = arith.constant 0 : i32
    %c0_i32_1 = arith.constant 0 : i32
    return %c0_i32, %c0_i32_0 : i32, i32
  }
  func.func @transform_6(%arg0: i32) -> (i32, i32) {
    %c0_i32 = arith.constant 0 : i32
    %c0_i32_0 = arith.constant 0 : i32
    %c0_i32_1 = arith.constant 0 : i32
    return %c0_i32, %c0_i32_0 : i32, i32
  }
  func.func @transform_7(%arg0: i32) -> (i32, i32) {
    %c0_i32 = arith.constant 0 : i32
    %c0_i32_0 = arith.constant 0 : i32
    %c0_i32_1 = arith.constant 0 : i32
    return %c0_i32, %c0_i32_0 : i32, i32
  }
  func.func @transform_8(%arg0: i32) -> (i32, i32) {
    %c0_i32 = arith.constant 0 : i32
    %c0_i32_0 = arith.constant 0 : i32
    %c0_i32_1 = arith.constant 0 : i32
    return %c0_i32, %c0_i32_0 : i32, i32
  }
  func.func @transform_9(%arg0: i32) -> (i32, i32) {
    %c0_i32 = arith.constant 0 : i32
    %c0_i32_0 = arith.constant 0 : i32
    %c0_i32_1 = arith.constant 0 : i32
    return %c0_i32, %c0_i32_0 : i32, i32
  }
  func.func @transform_10(%arg0: i32) -> (i32, i32) {
    %c0_i32 = arith.constant 0 : i32
    %c0_i32_0 = arith.constant 0 : i32
    %c0_i32_1 = arith.constant 0 : i32
    return %c0_i32, %c0_i32_0 : i32, i32
  }
  func.func @transform_11(%arg0: i32) -> (i32, i32) {
    %c0_i32 = arith.constant 0 : i32
    %c0_i32_0 = arith.constant 0 : i32
    %c0_i32_1 = arith.constant 0 : i32
    return %c0_i32, %c0_i32_0 : i32, i32
  }
  func.func @transform_12(%arg0: i32) -> (i32, i32) {
    %c0_i32 = arith.constant 0 : i32
    %c0_i32_0 = arith.constant 0 : i32
    %c0_i32_1 = arith.constant 0 : i32
    return %c0_i32, %c0_i32_0 : i32, i32
  }
  func.func @transform_13(%arg0: i32) -> (i32, i32) {
    %c0_i32 = arith.constant 0 : i32
    %c0_i32_0 = arith.constant 0 : i32
    return %arg0, %c0_i32 : i32, i32
  }
}

</mosaic_0001>

<bundles_post_ra>
// kernel: bigru_encoder_forward.6
= control target key start
LH: loop header
LB: loop body
LE: loop exit
PB: predicated region body
PF: predicated region fallthrough
CT: control target
= control target key end

     0   :  { %v111_v0 = vmov 0.0   ;;  %vm112_vm0 = vmmov 0   ;;  %vm41_vm1 = vcmask 261120   ;;  %s154_s1 = inlined_call_operand.vmem [shape: bf16[32,32], index: 1, kind: input, shape index: {}]   ;;  %s155_s0 = inlined_call_operand.vmem [shape: f32[16,32], index: 0, kind: input, shape index: {}]   ;;  %s156_s2 = inlined_call_operand.vmem [shape: f32[1,32], index: 2, kind: input, shape index: {}]   ;;  %s157_s3 = inlined_call_operand.vmem [shape: f32[16,32], index: 3, kind: output, shape index: {}]  }
   0x1   :  { %99 = vmatprep.subr.bf16.mxu0 %v111_v0  ;;  %v109_v1 = vld [vmem:[%s154_s1] sm:$0xff]   ;;  %103 = vmatprep.mubr.msk.bf16.mxu0 %vm112_vm0, %v111_v0  ;;  %v110_v2 = vld [vmem:[%s154_s1 + $0x8] sm:$0xff]  }
   0x2   :  { %100 = vmatpush3.bf16.msra.mxu0 %v109_v1  ;;  %v15_v3 = vld [vmem:[%s155_s0] sm:$0xff]  ;;  %v16_v4 = vld [vmem:[%s155_s0 + $0x8] sm:$0xff] }
   0x3   :  { %101 = vmatprep.subr.bf16.mxu0 %v111_v0  ;;  %v17_v5 = vpack.c.bf16 %v16_v4, %v15_v3  ;;  %v92_v6 = vld [vmem:[%s156_s2] ss:$0 sm:$0xff] }
   0x6   :  { %102 = vmatpush3.bf16.msra.mxu0 %v110_v2 }
   0x9   :  { %104 = vmatmul.mubr.msk.bf16.vlgmr.msra.gmra.mrb[0].mxu0 %vm41_vm1, %v17_v5 }
  0xdc   :  { %v79_v7 = vpop.f32.mrb[0].mxu0 }
  0xdd   :  { %v80_v8 = vadd.f32 %v92_v6, %v79_v7  ;;  %v105_v9 = vpop.f32.mrb[1].mxu0 }
  0xde   :  { %v82_v10 = vpop.f32.mrb[2].mxu0 }
  0xdf   :  { %86 = vst.msk [vmem:[%s157_s3] sm:$0xff] %vm41_vm1, %v80_v8  ;;  %v83_v11 = vadd.f32 %v92_v6, %v82_v10  ;;  %v106_v12 = vpop.f32.mrb[3].mxu0 }
  0xe1   :  { %87 = vst.msk [vmem:[%s157_s3 + $0x8] sm:$0xff] %vm41_vm1, %v83_v11 }

// kernel: bigru_encoder_forward.7
= control target key start
LH: loop header
LB: loop body
LE: loop exit
PB: predicated region body
PF: predicated region fallthrough
CT: control target
= control target key end

     0   :  { %v122_v1 = vmov 0   ;;  %vm54_vm0 = vcmask 261120   ;;  %v24_v8 = vlaneseq  ;;  %vm102_vm1 = vcmask 523264   ;;  %s176_s1 = inlined_call_operand.vmem [shape: bf16[32,192], index: 1, kind: input, shape index: {}]   ;;  %s177_s0 = inlined_call_operand.vmem [shape: f32[16,32], index: 0, kind: input, shape index: {}]   ;;  %s178_s2 = inlined_call_operand.vmem [shape: f32[1,192], index: 2, kind: input, shape index: {}]   ;;  %s179_s3 = inlined_call_operand.vmem [shape: f32[16,192], index: 3, kind: output, shape index: {}]  }
   0x1   :  { %v116_v0 = vld [vmem:[%s176_s1 + $0x4] ss:$8 sps:$4 sm:$0xff]   ;;  %90 = vmatprep.mubr.bf16.mxu0 %v122_v1  ;;  %v118_v2 = vld [vmem:[%s176_s1] ss:$8 sps:$4 sm:$0xff]   ;;  %v119_v3 = vld [vmem:[%s176_s1 + $0x14] ss:$8 sps:$4 sm:$0xff]  }
   0x2   :  { %58 = vmatprep.subr.bf16.mxu0 %v116_v0  ;;  %v121_v4 = vld [vmem:[%s176_s1 + $0x10] ss:$8 sps:$4 sm:$0xff]   ;;  %v15_v5 = vld [vmem:[%s177_s0] sm:$0xff]  ;;  %v16_v6 = vld [vmem:[%s177_s0 + $0x8] sm:$0xff]  ;;  %v25_v9 = vshrl.u32 %v24_v8, 7 }
   0x3   :  { %59 = vmatpush1.bf16.msra.mxu0 %v118_v2  ;;  %v17_v7 = vpack.c.bf16 %v16_v6, %v15_v5  ;;  %v22_v11 = vld [vmem:[%s178_s2] sm:$0x3] }
   0x4   :  { %60 = vmatprep.subr.bf16.mxu0 %v119_v3  ;;  %v26_v10 = vsub.s32 0, %v25_v9  ;;  %v30_v12 = vsub.s32 1, %v25_v9 }
   0x6   :  { %v27_v13 = vrot.slane %v22_v11, %v26_v10  ;;  %v31_v14 = vrot.slane %v22_v11, %v30_v12 }
   0x7   :  { %61 = vmatpush1.bf16.msra.mxu0 %v121_v4 }
   0xa   :  { %114 = vmatmul.mubr.msk.bf16.vlgmr.msra.gmra.mrb[0].mxu0 %vm54_vm0, %v17_v7 }
  0xdd   :  { %v92_v15 = vpop.f32.mrb[0].mxu0 }
  0xde   :  { %v93_v16 = vadd.f32 %v92_v15, %v27_v13  ;;  %v94_v17 = vpop.f32.mrb[1].mxu0 }
  0xdf   :  { %v95_v18 = vadd.f32 %v94_v17, %v31_v14  ;;  %v96_v19 = vpop.f32.mrb[2].mxu0 }
  0xe0   :  { %101 = vst [vmem:[%s179_s3] sm:$0xff] %v93_v16  ;;  %v97_v20 = vadd.f32 %v96_v19, %v27_v13  ;;  %v98_v21 = vpop.f32.mrb[3].mxu0 }
  0xe1   :  { %103 = vst.msk [vmem:[%s179_s3 + $0x8] sm:$0xff] %vm102_vm1, %v95_v18  ;;  %v99_v22 = vadd.f32 %v98_v21, %v31_v14 }
  0xe2   :  { %104 = vst [vmem:[%s179_s3 + $0x10] sm:$0xff] %v97_v20 }
  0xe3   :  { %105 = vst.msk [vmem:[%s179_s3 + $0x18] sm:$0xff] %vm102_vm1, %v99_v22 }

// kernel: bigru_encoder_forward.9
= control target key start
LH: loop header
LB: loop body
LE: loop exit
PB: predicated region body
PF: predicated region fallthrough
CT: control target
= control target key end

     0   :  { %v155_v1 = vmov 0   ;;  %vm78_vm0 = vcmask 523264   ;;  %v28_v12 = vlaneseq  ;;  %s224_s1 = inlined_call_operand.vmem [shape: bf16[64,192], index: 1, kind: input, shape index: {}]   ;;  %s225_s0 = inlined_call_operand.vmem [shape: f32[16,64], index: 0, kind: input, shape index: {}]   ;;  %s226_s2 = inlined_call_operand.vmem [shape: f32[1,192], index: 2, kind: input, shape index: {}]   ;;  %s227_s3 = inlined_call_operand.vmem [shape: f32[16,192], index: 3, kind: output, shape index: {}]  }
   0x1   :  { %v143_v0 = vld [vmem:[%s224_s1 + $0x4] ss:$8 sps:$4 sm:$0xff]   ;;  %114 = vmatprep.mubr.bf16.mxu0 %v155_v1  ;;  %v145_v2 = vld [vmem:[%s224_s1] ss:$8 sps:$4 sm:$0xff]   ;;  %v146_v3 = vld [vmem:[%s224_s1 + $0x14] ss:$8 sps:$4 sm:$0xff]  }
   0x2   :  { %82 = vmatprep.subr.bf16.mxu0 %v143_v0  ;;  %v148_v4 = vld [vmem:[%s224_s1 + $0x10] ss:$8 sps:$4 sm:$0xff]   ;;  %v149_v5 = vld [vmem:[%s224_s1 + $0x24] ss:$8 sps:$4 sm:$0xff]   ;;  %v151_v6 = vld [vmem:[%s224_s1 + $0x20] ss:$8 sps:$4 sm:$0xff]  }
   0x3   :  { %83 = vmatpush1.bf16.msra.mxu0 %v145_v2  ;;  %v152_v7 = vld [vmem:[%s224_s1 + $0x34] ss:$8 sps:$4 sm:$0xff]   ;;  %v154_v8 = vld [vmem:[%s224_s1 + $0x30] ss:$8 sps:$4 sm:$0xff]   ;;  %v15_v9 = vld [vmem:[%s225_s0] sm:$0xff]  ;;  %v29_v13 = vshrl.u32 %v28_v12, 7 }
   0x4   :  { %84 = vmatprep.subr.bf16.mxu0 %v146_v3  ;;  %v16_v10 = vld [vmem:[%s225_s0 + $0x8] sm:$0xff]  ;;  %v26_v15 = vld [vmem:[%s226_s2] sm:$0x3] }
   0x5   :  { %v17_v11 = vpack.c.bf16 %v16_v10, %v15_v9  ;;  %v30_v14 = vsub.s32 0, %v29_v13  ;;  %v34_v16 = vsub.s32 1, %v29_v13 }
   0x7   :  { %85 = vmatpush1.bf16.msra.mxu0 %v148_v4  ;;  %v31_v17 = vrot.slane %v26_v15, %v30_v14  ;;  %v35_v18 = vrot.slane %v26_v15, %v34_v16 }
   0x8   :  { %86 = vmatprep.subr.bf16.mxu0 %v149_v5 }
   0xb   :  { %87 = vmatpush1.bf16.msra.mxu0 %v151_v6 }
   0xc   :  { %88 = vmatprep.subr.bf16.mxu0 %v152_v7 }
   0xf   :  { %89 = vmatpush1.bf16.msra.mxu0 %v154_v8 }
  0x12   :  { %141 = vmatmul.mubr.msk.bf16.vlgmr.msra.gmra.mrb[0].mxu0 %vm78_vm0, %v17_v11 }
  0xe5   :  { %v116_v19 = vpop.f32.mrb[0].mxu0 }
  0xe6   :  { %v117_v20 = vadd.f32 %v116_v19, %v31_v17  ;;  %v118_v21 = vpop.f32.mrb[1].mxu0 }
  0xe7   :  { %v119_v22 = vadd.f32 %v118_v21, %v35_v18  ;;  %v120_v23 = vpop.f32.mrb[2].mxu0 }
  0xe8   :  { %125 = vst [vmem:[%s227_s3] sm:$0xff] %v117_v20  ;;  %v121_v24 = vadd.f32 %v120_v23, %v31_v17  ;;  %v122_v25 = vpop.f32.mrb[3].mxu0 }
  0xe9   :  { %126 = vst.msk [vmem:[%s227_s3 + $0x8] sm:$0xff] %vm78_vm0, %v119_v22  ;;  %v123_v26 = vadd.f32 %v122_v25, %v35_v18 }
  0xea   :  { %127 = vst [vmem:[%s227_s3 + $0x10] sm:$0xff] %v121_v24 }
  0xeb   :  { %128 = vst.msk [vmem:[%s227_s3 + $0x18] sm:$0xff] %vm78_vm0, %v123_v26 }

// kernel: bigru_encoder_forward.11
= control target key start
LH: loop header
LB: loop body
LE: loop exit
PB: predicated region body
PF: predicated region fallthrough
CT: control target
= control target key end

     0   :  { %v590_v0 = vmov 0.0   ;;  %vm591_vm0 = vmmov 0   ;;  %vm91_vm1 = vcmask 523264   ;;  %vm154_vm2 = vcmask 130048   ;;  %s767_s1 = inlined_call_operand.vmem [shape: bf16[64,16], index: 1, kind: input, shape index: {}]   ;;  %s768_s0 = inlined_call_operand.vmem [shape: f32[16,64], index: 0, kind: input, shape index: {}]   ;;  %s769_s3 = inlined_call_operand.vmem [shape: bf16[16,8], index: 3, kind: input, shape index: {}]   ;;  %s770_s2 = inlined_call_operand.vmem [shape: f32[1,16], index: 2, kind: input, shape index: {}]   ;;  %s771_s5 = inlined_call_operand.vmem [shape: bf16[8,1], index: 5, kind: input, shape index: {}]   ;;  %s772_s7 = inlined_call_operand.vmem [shape: bf16[64,16], index: 7, kind: input, shape index: {}]   ;;  %s773_s6 = inlined_call_operand.<no memory space> [shape: f32[1,1], index: 6, kind: input, shape index: {}]   ;;  %s774_s4 = inlined_call_operand.vmem [shape: f32[1,8], index: 4, kind: input, shape index: {}]   ;;  %s775_s9 = inlined_call_operand.vmem [shape: bf16[16,8], index: 9, kind: input, shape index: {}]   ;;  %s776_s8 = inlined_call_operand.vmem [shape: f32[1,16], index: 8, kind: input, shape index: {}]   ;;  %s777_s13 = inlined_call_operand.vmem [shape: f32[16,2], index: 13, kind: output, shape index: {}]   ;;  %s778_s11 = inlined_call_operand.vmem [shape: bf16[8,1], index: 11, kind: input, shape index: {}]   ;;  %s779_s12 = inlined_call_operand.<no memory space> [shape: f32[1,1], index: 12, kind: input, shape index: {}]   ;;  %s780_s10 = inlined_call_operand.vmem [shape: f32[1,8], index: 10, kind: input, shape index: {}]  }
   0x1   :  { %521 = vmatprep.subr.bf16.mxu0 %v590_v0  ;;  %v572_v1 = vld [vmem:[%s767_s1] sm:$0xff]   ;;  %529 = vmatprep.mubr.msk.bf16.mxu0 %vm591_vm0, %v590_v0  ;;  %v573_v2 = vld [vmem:[%s767_s1 + $0x8] sm:$0xff]   ;;  %v574_v3 = vld [vmem:[%s767_s1 + $0x10] sm:$0xff]   ;;  %vm214_vm3 = vcmask 1043456   ;;  %v18_v21 = vstv %s773_s6  ;;  %vm210_vm4 = vcmask 64512   ;;  %vm463_vm5 = vcmask 7168  }
   0x2   :  { %533 = vmatprep.subr.bf16.mxu1 %v590_v0  ;;  %535 = vmatprep.mubr.msk.bf16.mxu1 %vm591_vm0, %v590_v0  ;;  %v575_v4 = vld [vmem:[%s767_s1 + $0x18] sm:$0xff]   ;;  %v49_v5 = vld [vmem:[%s768_s0] sm:$0xff]  ;;  %v50_v6 = vld [vmem:[%s768_s0 + $0x8] sm:$0xff]  ;;  %19 = vst [vmem:[#allocation2] sm:$0x1] %v18_v21  ;;  %v20_v58 = vstv %s779_s12  ;;  %vm474_vm6 = vcmask 15368  }
   0x3   :  { %522 = vmatpush3.bf16.msra.mxu0 %v572_v1  ;;  %v51_v7 = vpack.c.bf16 %v50_v6, %v49_v5  ;;  %v576_v8 = vld [vmem:[%s769_s3] sm:$0xff]   ;;  %v578_v33 = vld [vmem:[%s772_s7 + $0x8] sm:$0xff]   ;;  %v579_v34 = vld [vmem:[%s772_s7 + $0x10] sm:$0xff]   ;;  %21 = vst [vmem:[#allocation3] sm:$0x1] %v20_v58 }
   0x4   :  { %523 = vmatprep.subr.bf16.mxu0 %v590_v0  ;;  %534 = vmatpush3.bf16.msra.mxu1 %v576_v8  ;;  %v481_v9 = vld [vmem:[%s770_s2] ss:$0 sm:$0xff]  ;;  %v580_v35 = vld [vmem:[%s772_s7 + $0x18] sm:$0xff]  }
   0x5   :  { %539 = vmatprep.subr.bf16.mxu1 %v590_v0  ;;  %v202_v19 = vld [vmem:[%s771_s5] sm:$0xf] }
   0x6   :  { %v216_v20 = vsel %vm214_vm3, %v202_v19, 0  ;;  %v487_v22 = vld [vmem:[%s774_s4] ss:$0 sm:$0xff] }
   0x7   :  { %524 = vmatpush3.bf16.msra.mxu0 %v573_v2  ;;  %v577_v31 = vld [vmem:[%s772_s7] sm:$0xff]  }
   0x8   :  { %525 = vmatprep.subr.bf16.mxu0 %v590_v0  ;;  %v581_v36 = vld [vmem:[%s775_s9] sm:$0xff]  }
   0x9   :  { %v490_v37 = vld [vmem:[#allocation2] ss:$0 sm:$0xff] }
   0xa   :  { %v492_v45 = vld [vmem:[%s776_s8] ss:$0 sm:$0xff]  ;;  %v501_v5 = vld [vmem:[#allocation3] ss:$0 sm:$0xff] }
   0xb   :  { %526 = vmatpush3.bf16.msra.mxu0 %v574_v3  ;;  %v406_v56 = vld [vmem:[%s778_s11] sm:$0xf] }
   0xc   :  { %527 = vmatprep.subr.bf16.mxu0 %v590_v0  ;;  %v418_v57 = vsel %vm214_vm3, %v406_v56, 0  ;;  %v498_v59 = vld [vmem:[%s780_s10] ss:$0 sm:$0xff]  ;;  %s592_s10 = smov 1  }
   0xf   :  { %528 = vmatpush3.bf16.msra.mxu0 %v575_v4 }
  0x10   :  { %557 = vmatprep.subr.bf16.mxu0 %v590_v0 }
  0x12   :  { %530 = vmatmul.mubr.msk.bf16.vlgmr.msra.gmra.mrb[0].mxu0 %vm91_vm1, %v51_v7 }
  0x13   :  { %559 = vmatprep.mubr.msk.bf16.mxu0 %vm591_vm0, %v590_v0  ;;  %558 = vmatpush3.bf16.msra.mxu0 %v581_v36 }
  0x14   :  { %563 = vmatprep.subr.bf16.mxu0 %v590_v0 }
  0xe5   :  { %v129_v10 = vpop.f32.mrb[0].mxu0 }
  0xe6   :  { %v130_v11 = vadd.f32 %v481_v9, %v129_v10  ;;  %v531_v12 = vpop.f32.mrb[1].mxu0 }
  0xe7   :  { %v132_v13 = vpop.f32.mrb[2].mxu0 }
  0xe8   :  { %v133_v14 = vadd.f32 %v481_v9, %v132_v13  ;;  %v532_v15 = vpop.f32.mrb[3].mxu0  ;;  %v136_v16 = vmax.f32 %v130_v11, 0.0 }
  0xea   :  { %v137_v17 = vmax.f32 %v133_v14, 0.0 }
  0xec   :  { %v138_v18 = vpack.c.bf16 %v137_v17, %v136_v16 }
  0xee   :  { %536 = vmatmul.mubr.msk.bf16.vlgmr.msra.gmra.mrb[0].mxu1 %vm154_vm2, %v138_v18 }
  0xef   :  { %541 = vmatprep.mubr.msk.bf16.mxu1 %vm591_vm0, %v590_v0  ;;  %540 = vmatpush3.bf16.msra.mxu1 %v216_v20 }
  0xf0   :  { %545 = vmatprep.subr.bf16.mxu1 %v590_v0 }
 0x1c1   :  { %v192_v23 = vpop.f32.mrb[0].mxu1 }
 0x1c2   :  { %v193_v24 = vadd.f32 %v487_v22, %v192_v23  ;;  %v537_v25 = vpop.f32.mrb[1].mxu1 }
 0x1c3   :  { %v195_v26 = vpop.f32.mrb[2].mxu1 }
 0x1c4   :  { %v196_v27 = vadd.f32 %v487_v22, %v195_v26  ;;  %v538_v28 = vpop.f32.mrb[3].mxu1  ;;  %v199_v29 = vmax.f32 %v193_v24, 0.0 }
 0x1c6   :  { %v200_v30 = vmax.f32 %v196_v27, 0.0 }
 0x1c8   :  { %v201_v32 = vpack.c.bf16 %v200_v30, %v199_v29 }
 0x1ca   :  { %542 = vmatmul.mubr.msk.bf16.vlgmr.msra.gmra.mrb[4].mxu1 %vm210_vm4, %v201_v32 }
 0x1cb   :  { %546 = vmatpush3.bf16.msra.mxu1 %v577_v31  ;;  %553 = vmatprep.mubr.msk.bf16.mxu1 %vm591_vm0, %v590_v0 }
 0x1cc   :  { %547 = vmatprep.subr.bf16.mxu1 %v590_v0 }
 0x1cf   :  { %548 = vmatpush3.bf16.msra.mxu1 %v578_v33 }
 0x1d0   :  { %549 = vmatprep.subr.bf16.mxu1 %v590_v0 }
 0x1d3   :  { %550 = vmatpush3.bf16.msra.mxu1 %v579_v34 }
 0x1d4   :  { %551 = vmatprep.subr.bf16.mxu1 %v590_v0 }
 0x1d7   :  { %552 = vmatpush3.bf16.msra.mxu1 %v580_v35 }
 0x1da   :  { %554 = vmatmul.mubr.msk.bf16.vlgmr.msra.gmra.mrb[8].mxu1 %vm91_vm1, %v51_v7 }
 0x29d   :  { %v252_v38 = vpop.f32.mrb[4].mxu1 }
 0x29e   :  { %v253_v39 = vadd.f32 %v490_v37, %v252_v38  ;;  %v543_v40 = vpop.f32.mrb[5].mxu1 }
 0x29f   :  { %v255_v41 = vpop.f32.mrb[6].mxu1 }
 0x2a0   :  { %582 = vtanh.f32 %v253_v39  ;;  %v256_v42 = vadd.f32 %v490_v37, %v255_v41  ;;  %v544_v43 = vpop.f32.mrb[7].mxu1 }
 0x2a2   :  { %584 = vtanh.f32 %v256_v42 }
 0x2aa   :  { %v583_v44 = vpop.eup %582 }
 0x2ab   :  { %464 = vst.msk [vmem:[%s777_s13] sm:$0xff] %vm463_vm5, %v583_v44 }
 0x2ac   :  { %v585_v46 = vpop.eup %584 }
 0x2ad   :  { %v334_v47 = vpop.f32.mrb[8].mxu1  ;;  %465 = vst.msk [vmem:[%s777_s13 + $0x8] sm:$0xff] %vm463_vm5, %v585_v46 }
 0x2ae   :  { %v335_v48 = vadd.f32 %v492_v45, %v334_v47  ;;  %v555_v49 = vpop.f32.mrb[9].mxu1 }
 0x2af   :  { %v337_v50 = vpop.f32.mrb[10].mxu1 }
 0x2b0   :  { %v338_v51 = vadd.f32 %v492_v45, %v337_v50  ;;  %v556_v52 = vpop.f32.mrb[11].mxu1  ;;  %v341_v53 = vmax.f32 %v335_v48, 0.0 }
 0x2b2   :  { %v342_v54 = vmax.f32 %v338_v51, 0.0 }
 0x2b4   :  { %v343_v55 = vpack.c.bf16 %v342_v54, %v341_v53 }
 0x2b6   :  { %560 = vmatmul.mubr.msk.bf16.vlgmr.msra.gmra.mrb[4].mxu0 %vm154_vm2, %v343_v55 }
 0x2b7   :  { %565 = vmatprep.mubr.msk.bf16.mxu0 %vm591_vm0, %v590_v0  ;;  %564 = vmatpush3.bf16.msra.mxu0 %v418_v57 }
 0x389   :  { %v396_v60 = vpop.f32.mrb[4].mxu0 }
 0x38a   :  { %v397_v61 = vadd.f32 %v498_v59, %v396_v60  ;;  %v561_v62 = vpop.f32.mrb[5].mxu0 }
 0x38b   :  { %v399_v63 = vpop.f32.mrb[6].mxu0 }
 0x38c   :  { %v400_v0 = vadd.f32 %v498_v59, %v399_v63  ;;  %v562_v1 = vpop.f32.mrb[7].mxu0  ;;  %v403_v2 = vmax.f32 %v397_v61, 0.0 }
 0x38e   :  { %v404_v3 = vmax.f32 %v400_v0, 0.0 }
 0x390   :  { %v405_v4 = vpack.c.bf16 %v404_v3, %v403_v2 }
 0x392   :  { %566 = vmatmul.mubr.msk.bf16.vlgmr.msra.gmra.mrb[8].mxu0 %vm210_vm4, %v405_v4 }
 0x465   :  { %v454_v6 = vpop.f32.mrb[8].mxu0 }
 0x466   :  { %v455_v7 = vadd.f32 %v501_v5, %v454_v6  ;;  %v567_v8 = vpop.f32.mrb[9].mxu0 }
 0x467   :  { %v457_v9 = vpop.f32.mrb[10].mxu0 }
 0x468   :  { %586 = vtanh.f32 %v455_v7  ;;  %v458_v10 = vadd.f32 %v501_v5, %v457_v9  ;;  %v568_v11 = vpop.f32.mrb[11].mxu0 }
 0x46a   :  { %588 = vtanh.f32 %v458_v10 }
 0x472   :  { %v587_v12 = vpop.eup %586 }
 0x473   :  { %468 = vrot.lane.b32.xlu0 %v587_v12, %s592_s10 }
 0x474   :  { %v589_v13 = vpop.eup %588 }
 0x477   :  { %470 = vrot.lane.b32.xlu0 %v589_v13, %s592_s10 }
 0x4e5   :  { %v469_v14 = vpop.permute.xlu0 %468 }
 0x4e6   :  { %475 = vst.msk [vmem:[%s777_s13] sm:$0xff] %vm474_vm6, %v469_v14 }
 0x4e9   :  { %v471_v15 = vpop.permute.xlu0 %470 }
 0x4ea   :  { %476 = vst.msk [vmem:[%s777_s13 + $0x8] sm:$0xff] %vm474_vm6, %v471_v15 }

// kernel: bigru_encoder_forward.8
= control target key start
LH: loop header
LB: loop body
LE: loop exit
PB: predicated region body
PF: predicated region fallthrough
CT: control target
= control target key end

     0   :  { %v2122_v0 = vmov 0.0   ;;  %vm2123_vm0 = vmmov 0   ;;  %s2124_s18 = smov 64   ;;  %v2125_v4 = vmov 0   ;;  %v2126_v5 = vmov 1983009808   ;;  %s2633_s1 = inlined_call_operand.vmem [shape: bf16[2,32,96], index: 1, kind: input, shape index: {}]   ;;  %s2634_s2 = inlined_call_operand.vmem [shape: f32[2,1,32], index: 2, kind: input, shape index: {}]   ;;  %s2635_s0 = inlined_call_operand.vmem [shape: f32[8,2,192], index: 0, kind: input, shape index: {}]   ;;  %s2636_s3 = inlined_call_operand.vmem [shape: f32[8,2,64], index: 3, kind: output, shape index: {}]  }
   0x1   :  { %1853 = vmatprep.subr.bf16.mxu0 %v2122_v0  ;;  %v2153_v1 = vld [vmem:[%s2633_s1] sm:$0xff]   ;;  %1857 = vmatprep.mubr.msk.bf16.mxu0 %vm2123_vm0, %v2122_v0  ;;  %v2164_v2 = vld [vmem:[%s2633_s1 + $0x8] sm:$0xff]   ;;  %v104_v6 = vunpack.c.l.s4 %v2126_v5  ;;  %v106_v7 = vlaneseq  ;;  %s2127_s21 = smov 96   ;;  %vm42_vm1 = vcmask 261120   ;;  %v2206_v36 = vld [vmem:[%s2633_s1 + $0x10] sm:$0xff]   ;;  %vm254_vm2 = vcmask 254976  }
   0x2   :  { %1861 = vmatprep.subr.bf16.mxu1 %v2122_v0  ;;  %1865 = vmatprep.mubr.msk.bf16.mxu1 %vm2123_vm0, %v2122_v0  ;;  %v1737_v3 = vld [vmem:[%s2634_s2] ss:$0 sm:$0xff]  ;;  %v2212_v37 = vld [vmem:[%s2633_s1 + $0x18] sm:$0xff]   ;;  %v1744_v44 = vld [vmem:[%s2635_s0 + $0x4] sm:$0xf]  ;;  %vm268_vm3 = vcmask 517376  }
   0x3   :  { %1854 = vmatpush3.bf16.msra.mxu0 %v2153_v1  ;;  %98 = vrot.lane.b32.xlu0 %v1737_v3, %s2124_s18  ;;  %v105_v8 = vunpack.c.0.s8 %v104_v6  ;;  %v107_v9 = vshrl.u32 %v106_v7, 7  ;;  %v27_v18 = vld [vmem:[%s2635_s0] sm:$0xf]  ;;  %v1733_v7 = vld [vmem:[%s2635_s0 + $0x1c] sm:$0xf] }
   0x4   :  { %1855 = vmatprep.subr.bf16.mxu0 %v2122_v0  ;;  %1862 = vmatpush3.bf16.msra.mxu1 %v2206_v36  ;;  %v1742_v53 = vld [vmem:[%s2634_s2 + $0x1] ss:$0 sm:$0xff]  ;;  %s2128_s2 = smov 32  }
   0x5   :  { %v2181_v11 = vsub.s32 %v105_v8, %v107_v9  ;;  %1863 = vmatprep.subr.bf16.mxu1 %v2122_v0 }
   0x7   :  { %1856 = vmatpush3.bf16.msra.mxu0 %v2164_v2 }
   0x8   :  { %1869 = vmatprep.subr.bf16.mxu0 %v2122_v0  ;;  %1864 = vmatpush3.bf16.msra.mxu1 %v2212_v37 }
   0x9   :  { %1877 = vmatprep.subr.bf16.mxu1 %v2122_v0 }
   0xa   :  { %1858 = vmatmul.mubr.bf16.vlgmr.msra.gmra.mrb[0].mxu0 %v2125_v4 }
   0xb   :  { %1870 = vmatpush3.bf16.msra.mxu0 %v2153_v1  ;;  %1873 = vmatprep.mubr.msk.bf16.mxu0 %vm2123_vm0, %v2122_v0 }
   0xc   :  { %1871 = vmatprep.subr.bf16.mxu0 %v2122_v0  ;;  %1866 = vmatmul.mubr.bf16.vlgmr.msra.gmra.mrb[0].mxu1 %v2125_v4 }
   0xd   :  { %1878 = vmatpush3.bf16.msra.mxu1 %v2206_v36  ;;  %1881 = vmatprep.mubr.msk.bf16.mxu1 %vm2123_vm0, %v2122_v0 }
   0xe   :  { %1879 = vmatprep.subr.bf16.mxu1 %v2122_v0 }
   0xf   :  { %1872 = vmatpush3.bf16.msra.mxu0 %v2164_v2 }
  0x10   :  { %1885 = vmatprep.subr.bf16.mxu0 %v2122_v0 }
  0x11   :  { %1880 = vmatpush3.bf16.msra.mxu1 %v2212_v37 }
  0x12   :  { %1893 = vmatprep.subr.bf16.mxu1 %v2122_v0 }
  0x75   :  { %v2179_v10 = vpop.permute.xlu0 %98 }
  0xdd   :  { %v80_v12 = vpop.f32.mrb[0].mxu0 }
  0xde   :  { %v101_v13 = vadd.f32 %v2179_v10, %v80_v12  ;;  %v1859_v14 = vpop.f32.mrb[1].mxu0  ;;  %v86_v19 = vadd.f32 %v80_v12, %v27_v18 }
  0xdf   :  { %v83_v15 = vpop.f32.mrb[2].mxu0  ;;  %v174_v52 = vpop.f32.mrb[0].mxu1 }
  0xe0   :  { %v109_v16 = vrot.slane %v101_v13, %v2181_v11  ;;  %v1860_v17 = vpop.f32.mrb[3].mxu0  ;;  %v1736_v20 = vmul.f32 -1.442695, %v86_v19  ;;  %v1867_v54 = vpop.f32.mrb[1].mxu1  ;;  %v187_v61 = vrot.slane %v174_v52, %v2181_v11 }
  0xe1   :  { %v177_v55 = vpop.f32.mrb[2].mxu1 }
  0xe2   :  { %110 = vrot.lane.b32.xlu0 %v109_v16, %s2124_s18  ;;  %1992 = vpow2.f32 %v1736_v20  ;;  %v1868_v56 = vpop.f32.mrb[3].mxu1  ;;  %v199_v20 = vrot.slane %v1733_v7, 2 }
  0xec   :  { %v1993_v21 = vpop.eup %1992 }
  0xed   :  { %v90_v22 = vadd.f32 1.0, %v1993_v21 }
  0xef   :  { %1994 = vrcp.f32 %v90_v22 }
  0xf9   :  { %v1995_v23 = vpop.eup %1994 }
  0xfa   :  { %v120_v29 = vsub.f32 1.0, %v1995_v23  ;;  %v126_v31 = vmul.f32 0.0, %v1995_v23 }
 0x154   :  { %v111_v24 = vpop.permute.xlu0 %110 }
 0x155   :  { %v113_v25 = vmul.f32 %v1995_v23, %v111_v24 }
 0x157   :  { %115 = vrot.lane.b32.xlu1 %v113_v25, %s2124_s18 }
 0x1c9   :  { %v116_v26 = vpop.permute.xlu1 %115 }
 0x1ca   :  { %v118_v27 = vadd.f32 %v116_v26, %v27_v18 }
 0x1cc   :  { %1996 = vtanh.f32 %v118_v27 }
 0x1d6   :  { %v1997_v28 = vpop.eup %1996 }
 0x1d7   :  { %122 = vrot.lane.b32.xlu1 %v1997_v28, %s2127_s21 }
 0x249   :  { %v123_v30 = vpop.permute.xlu1 %122 }
 0x24a   :  { %v125_v32 = vmul.f32 %v123_v30, %v120_v29 }
 0x24c   :  { %v2191_v33 = vadd.f32 %v126_v31, %v125_v32 }
 0x24e   :  { %v274_v34 = vpack.c.bf16 %v2191_v33, %v2191_v33 }
 0x250   :  { %276 = vrot.lane.b32.xlu0 %v274_v34, %s2127_s21 }
 0x2c2   :  { %v277_v35 = vpop.permute.xlu0 %276 }
 0x2c3   :  { %1874 = vmatmul.mubr.msk.bf16.vlgmr.msra.gmra.mrb[4].mxu0 %vm42_vm1, %v277_v35 }
 0x2c4   :  { %1886 = vmatpush3.bf16.msra.mxu0 %v2153_v1  ;;  %1889 = vmatprep.mubr.msk.bf16.mxu0 %vm2123_vm0, %v2122_v0 }
 0x2c5   :  { %1887 = vmatprep.subr.bf16.mxu0 %v2122_v0 }
 0x2c8   :  { %1888 = vmatpush3.bf16.msra.mxu0 %v2164_v2 }
 0x2c9   :  { %1901 = vmatprep.subr.bf16.mxu0 %v2122_v0 }
 0x396   :  { %v315_v38 = vpop.f32.mrb[4].mxu0 }
 0x397   :  { %v328_v39 = vadd.f32 %v315_v38, %v2179_v10  ;;  %v1875_v40 = vpop.f32.mrb[5].mxu0  ;;  %v321_v45 = vadd.f32 %v1744_v44, %v315_v38 }
 0x398   :  { %v318_v41 = vpop.f32.mrb[6].mxu0 }
 0x399   :  { %v336_v42 = vrot.slane %v328_v39, %v2181_v11  ;;  %v1876_v43 = vpop.f32.mrb[7].mxu0  ;;  %v1747_v46 = vmul.f32 -1.442695, %v321_v45 }
 0x39b   :  { %337 = vrot.lane.b32.xlu1 %v336_v42, %s2124_s18  ;;  %1998 = vpow2.f32 %v1747_v46 }
 0x3a5   :  { %v1999_v47 = vpop.eup %1998 }
 0x3a6   :  { %v325_v48 = vadd.f32 1.0, %v1999_v47 }
 0x3a8   :  { %2000 = vrcp.f32 %v325_v48 }
 0x3b2   :  { %v2001_v49 = vpop.eup %2000 }
 0x3b3   :  { %v347_v3 = vsub.f32 1.0, %v2001_v49  ;;  %v353_v5 = vmul.f32 %v2001_v49, %v2191_v33 }
 0x40d   :  { %v338_v50 = vpop.permute.xlu1 %337 }
 0x40e   :  { %v340_v51 = vmul.f32 %v2001_v49, %v338_v50 }
 0x410   :  { %342 = vrot.lane.b32.xlu0 %v340_v51, %s2124_s18  ;;  %v1753_v51 = vld [vmem:[%s2635_s0 + $0x8] sm:$0xf] }
 0x414   :  { %213 = vrot.lane.b32.xlu0 %v1742_v53, %s2124_s18 }
 0x482   :  { %v343_v57 = vpop.permute.xlu0 %342 }
 0x483   :  { %v345_v58 = vadd.f32 %v1744_v44, %v343_v57 }
 0x485   :  { %2002 = vtanh.f32 %v345_v58 }
 0x486   :  { %v2234_v59 = vpop.permute.xlu0 %213 }
 0x487   :  { %v216_v62 = vadd.f32 %v2234_v59, %v174_v52 }
 0x489   :  { %v224_v63 = vrot.slane %v216_v62, %v2181_v11  ;;  %v1745_v62 = vld [vmem:[%s2635_s0 + $0x18] sm:$0xf] }
 0x48f   :  { %v2003_v60 = vpop.eup %2002 }
 0x490   :  { %349 = vrot.lane.b32.xlu1 %v2003_v60, %s2127_s21 }
 0x494   :  { %188 = vrot.lane.b32.xlu1 %v187_v61, %s2127_s21 }
 0x498   :  { %225 = vrot.lane.b32.xlu1 %v224_v63, %s2128_s2 }
 0x502   :  { %v350_v4 = vpop.permute.xlu1 %349 }
 0x503   :  { %v352_v6 = vmul.f32 %v350_v4, %v347_v3 }
 0x505   :  { %v2246_v8 = vadd.f32 %v353_v5, %v352_v6 }
 0x506   :  { %v189_v9 = vpop.permute.xlu1 %188 }
 0x507   :  { %v191_v12 = vadd.f32 %v1733_v7, %v189_v9  ;;  %v484_v13 = vpack.c.bf16 %v2246_v8, %v2246_v8  ;;  %v201_v21 = vadd.f32 %v199_v20, %v189_v9 }
 0x509   :  { %v1740_v14 = vmul.f32 -1.442695, %v191_v12  ;;  %486 = vrot.lane.b32.xlu0 %v484_v13, %s2127_s21  ;;  %v1741_v23 = vmul.f32 -1.442695, %v201_v21 }
 0x50a   :  { %v226_v17 = vpop.permute.xlu1 %225 }
 0x50b   :  { %2004 = vpow2.f32 %v1740_v14 }
 0x50d   :  { %229 = vrot.lane.b32.xlu0 %v1733_v7, %s2127_s21 }
 0x515   :  { %v2005_v15 = vpop.eup %2004 }
 0x516   :  { %v195_v16 = vadd.f32 1.0, %v2005_v15 }
 0x518   :  { %2006 = vrcp.f32 %v195_v16  ;;  %v418_v16 = vrot.slane %v1745_v62, 2 }
 0x519   :  { %2008 = vpow2.f32 %v1741_v23 }
 0x522   :  { %v2007_v18 = vpop.eup %2006 }
 0x523   :  { %v228_v19 = vmul.f32 %v2007_v18, %v226_v17  ;;  %v2009_v24 = vpop.eup %2008 }
 0x524   :  { %v205_v25 = vadd.f32 1.0, %v2009_v24 }
 0x525   :  { %234 = vrot.lane.b32.xlu1 %v228_v19, %s2128_s2 }
 0x526   :  { %2010 = vrcp.f32 %v205_v25 }
 0x530   :  { %v2011_v30 = vpop.eup %2010 }
 0x531   :  { %v239_v31 = vsub.f32 1.0, %v2011_v30  ;;  %v241_v32 = vmul.f32 0.0, %v2011_v30 }
 0x57b   :  { %v487_v22 = vpop.permute.xlu0 %486 }
 0x57c   :  { %1890 = vmatmul.mubr.msk.bf16.vlgmr.msra.gmra.mrb[8].mxu0 %vm42_vm1, %v487_v22 }
 0x57d   :  { %1902 = vmatpush3.bf16.msra.mxu0 %v2153_v1  ;;  %1905 = vmatprep.mubr.msk.bf16.mxu0 %vm2123_vm0, %v2122_v0 }
 0x57e   :  { %1903 = vmatprep.subr.bf16.mxu0 %v2122_v0 }
 0x57f   :  { %v230_v26 = vpop.permute.xlu0 %229 }
 0x580   :  { %v231_v27 = vrot.slane %v230_v26, 2 }
 0x581   :  { %1904 = vmatpush3.bf16.msra.mxu0 %v2164_v2 }
 0x582   :  { %1917 = vmatprep.subr.bf16.mxu0 %v2122_v0 }
 0x597   :  { %v235_v28 = vpop.permute.xlu1 %234 }
 0x598   :  { %v237_v29 = vadd.f32 %v235_v28, %v231_v27 }
 0x59a   :  { %2012 = vtanh.f32 %v237_v29 }
 0x5a4   :  { %v2013_v34 = vpop.eup %2012 }
 0x5a5   :  { %v240_v35 = vmul.f32 %v2013_v34, %v239_v31 }
 0x5a7   :  { %v2260_v38 = vadd.f32 %v241_v32, %v240_v35 }
 0x5a9   :  { %v355_v39 = vpack.c.bf16 %v2260_v38, %v2260_v38 }
 0x5ab   :  { %1882 = vmatmul.mubr.msk.bf16.vlgmr.msra.gmra.mrb[4].mxu1 %vm42_vm1, %v355_v39 }
 0x5ac   :  { %1894 = vmatpush3.bf16.msra.mxu1 %v2206_v36  ;;  %1897 = vmatprep.mubr.msk.bf16.mxu1 %vm2123_vm0, %v2122_v0 }
 0x5ad   :  { %1895 = vmatprep.subr.bf16.mxu1 %v2122_v0 }
 0x5b0   :  { %1896 = vmatpush3.bf16.msra.mxu1 %v2212_v37 }
 0x5b1   :  { %1909 = vmatprep.subr.bf16.mxu1 %v2122_v0 }
 0x64f   :  { %v525_v40 = vpop.f32.mrb[8].mxu0 }
 0x650   :  { %v538_v41 = vadd.f32 %v525_v40, %v2179_v10  ;;  %v1891_v42 = vpop.f32.mrb[9].mxu0  ;;  %v531_v52 = vadd.f32 %v1753_v51, %v525_v40 }
 0x651   :  { %v528_v43 = vpop.f32.mrb[10].mxu0 }
 0x652   :  { %v546_v44 = vrot.slane %v538_v41, %v2181_v11  ;;  %v1892_v45 = vpop.f32.mrb[11].mxu0  ;;  %v1756_v53 = vmul.f32 -1.442695, %v531_v52 }
 0x654   :  { %547 = vrot.lane.b32.xlu0 %v546_v44, %s2124_s18  ;;  %2014 = vpow2.f32 %v1756_v53 }
 0x65e   :  { %v2015_v54 = vpop.eup %2014 }
 0x65f   :  { %v535_v55 = vadd.f32 1.0, %v2015_v54 }
 0x661   :  { %2016 = vrcp.f32 %v535_v55 }
 0x66b   :  { %v2017_v56 = vpop.eup %2016 }
 0x66c   :  { %v557_v21 = vsub.f32 1.0, %v2017_v56  ;;  %v563_v24 = vmul.f32 %v2017_v56, %v2246_v8 }
 0x67e   :  { %v393_v46 = vpop.f32.mrb[4].mxu1 }
 0x67f   :  { %v406_v47 = vrot.slane %v393_v46, %v2181_v11  ;;  %v1883_v48 = vpop.f32.mrb[5].mxu1  ;;  %v427_v58 = vadd.f32 %v393_v46, %v2234_v59 }
 0x680   :  { %v396_v49 = vpop.f32.mrb[6].mxu1 }
 0x681   :  { %407 = vrot.lane.b32.xlu0 %v406_v47, %s2127_s21  ;;  %v1884_v50 = vpop.f32.mrb[7].mxu1  ;;  %v435_v61 = vrot.slane %v427_v58, %v2181_v11 }
 0x6c6   :  { %v548_v57 = vpop.permute.xlu0 %547 }
 0x6c7   :  { %v550_v60 = vmul.f32 %v2017_v56, %v548_v57  ;;  %v1754_v56 = vld [vmem:[%s2635_s0 + $0x14] sm:$0xf]  ;;  %v1762_v57 = vld [vmem:[%s2635_s0 + $0xc] sm:$0xf] }
 0x6c9   :  { %552 = vrot.lane.b32.xlu1 %v550_v60, %s2124_s18 }
 0x6cd   :  { %436 = vrot.lane.b32.xlu1 %v435_v61, %s2128_s2 }
 0x6d1   :  { %440 = vrot.lane.b32.xlu1 %v1745_v62, %s2127_s21 }
 0x6f3   :  { %v408_v63 = vpop.permute.xlu0 %407 }
 0x6f4   :  { %v410_v3 = vadd.f32 %v1745_v62, %v408_v63  ;;  %v420_v17 = vadd.f32 %v418_v16, %v408_v63  ;;  %v628_v16 = vrot.slane %v1754_v56, 2 }
 0x6f6   :  { %v1749_v4 = vmul.f32 -1.442695, %v410_v3  ;;  %v1750_v18 = vmul.f32 -1.442695, %v420_v17 }
 0x6f8   :  { %2018 = vpow2.f32 %v1749_v4 }
 0x702   :  { %v2019_v5 = vpop.eup %2018 }
 0x703   :  { %v414_v6 = vadd.f32 1.0, %v2019_v5 }
 0x705   :  { %2020 = vrcp.f32 %v414_v6 }
 0x70f   :  { %v2021_v12 = vpop.eup %2020 }
 0x73b   :  { %v553_v7 = vpop.permute.xlu1 %552 }
 0x73c   :  { %v555_v9 = vadd.f32 %v1753_v51, %v553_v7 }
 0x73e   :  { %2022 = vtanh.f32 %v555_v9 }
 0x73f   :  { %v437_v14 = vpop.permute.xlu1 %436  ;;  %2024 = vpow2.f32 %v1750_v18 }
 0x740   :  { %v439_v15 = vmul.f32 %v2021_v12, %v437_v14 }
 0x743   :  { %v441_v20 = vpop.permute.xlu1 %440 }
 0x744   :  { %v442_v26 = vrot.slane %v441_v20, 2 }
 0x748   :  { %v2023_v13 = vpop.eup %2022 }
 0x749   :  { %559 = vrot.lane.b32.xlu0 %v2023_v13, %s2127_s21  ;;  %v2025_v19 = vpop.eup %2024 }
 0x74a   :  { %v424_v23 = vadd.f32 1.0, %v2025_v19 }
 0x74c   :  { %2026 = vrcp.f32 %v424_v23 }
 0x74d   :  { %445 = vrot.lane.b32.xlu0 %v439_v15, %s2128_s2 }
 0x756   :  { %v2027_v31 = vpop.eup %2026 }
 0x757   :  { %v450_v32 = vsub.f32 1.0, %v2027_v31  ;;  %v452_v35 = vmul.f32 %v2027_v31, %v2260_v38 }
 0x7bb   :  { %v560_v22 = vpop.permute.xlu0 %559 }
 0x7bc   :  { %v562_v25 = vmul.f32 %v560_v22, %v557_v21 }
 0x7be   :  { %v2290_v27 = vadd.f32 %v563_v24, %v562_v25 }
 0x7bf   :  { %v446_v28 = vpop.permute.xlu0 %445 }
 0x7c0   :  { %v448_v29 = vadd.f32 %v446_v28, %v442_v26  ;;  %v694_v30 = vpack.c.bf16 %v2290_v27, %v2290_v27 }
 0x7c2   :  { %2028 = vtanh.f32 %v448_v29  ;;  %696 = vrot.lane.b32.xlu1 %v694_v30, %s2127_s21 }
 0x7cc   :  { %v2029_v34 = vpop.eup %2028 }
 0x7cd   :  { %v451_v39 = vmul.f32 %v2029_v34, %v450_v32 }
 0x7cf   :  { %v2296_v40 = vadd.f32 %v452_v35, %v451_v39 }
 0x7d1   :  { %v565_v41 = vpack.c.bf16 %v2296_v40, %v2296_v40 }
 0x7d3   :  { %1898 = vmatmul.mubr.msk.bf16.vlgmr.msra.gmra.mrb[8].mxu1 %vm42_vm1, %v565_v41 }
 0x7d4   :  { %1910 = vmatpush3.bf16.msra.mxu1 %v2206_v36  ;;  %1913 = vmatprep.mubr.msk.bf16.mxu1 %vm2123_vm0, %v2122_v0 }
 0x7d5   :  { %1911 = vmatprep.subr.bf16.mxu1 %v2122_v0 }
 0x7d8   :  { %1912 = vmatpush3.bf16.msra.mxu1 %v2212_v37 }
 0x7d9   :  { %1925 = vmatprep.subr.bf16.mxu1 %v2122_v0 }
 0x834   :  { %v697_v42 = vpop.permute.xlu1 %696 }
 0x835   :  { %1906 = vmatmul.mubr.msk.bf16.vlgmr.msra.gmra.mrb[12].mxu0 %vm42_vm1, %v697_v42 }
 0x836   :  { %1918 = vmatpush3.bf16.msra.mxu0 %v2153_v1  ;;  %1921 = vmatprep.mubr.msk.bf16.mxu0 %vm2123_vm0, %v2122_v0 }
 0x837   :  { %1919 = vmatprep.subr.bf16.mxu0 %v2122_v0 }
 0x83a   :  { %1920 = vmatpush3.bf16.msra.mxu0 %v2164_v2 }
 0x83b   :  { %1933 = vmatprep.subr.bf16.mxu0 %v2122_v0 }
 0x8a6   :  { %v603_v43 = vpop.f32.mrb[8].mxu1 }
 0x8a7   :  { %v616_v44 = vrot.slane %v603_v43, %v2181_v11  ;;  %v1899_v45 = vpop.f32.mrb[9].mxu1  ;;  %v637_v52 = vadd.f32 %v603_v43, %v2234_v59 }
 0x8a8   :  { %v606_v46 = vpop.f32.mrb[10].mxu1 }
 0x8a9   :  { %617 = vrot.lane.b32.xlu1 %v616_v44, %s2127_s21  ;;  %v1900_v47 = vpop.f32.mrb[11].mxu1  ;;  %v645_v55 = vrot.slane %v637_v52, %v2181_v11 }
 0x908   :  { %v735_v48 = vpop.f32.mrb[12].mxu0 }
 0x909   :  { %v748_v49 = vadd.f32 %v735_v48, %v2179_v10  ;;  %v1907_v50 = vpop.f32.mrb[13].mxu0  ;;  %v741_v58 = vadd.f32 %v1762_v57, %v735_v48 }
 0x90a   :  { %v738_v51 = vpop.f32.mrb[14].mxu0 }
 0x90b   :  { %v756_v53 = vrot.slane %v748_v49, %v2181_v11  ;;  %v1908_v54 = vpop.f32.mrb[15].mxu0  ;;  %v1765_v61 = vmul.f32 -1.442695, %v741_v58 }
 0x90c   :  { %v1763_v54 = vld [vmem:[%s2635_s0 + $0x10] sm:$0xf] }
 0x90d   :  { %757 = vrot.lane.b32.xlu0 %v756_v53, %s2124_s18  ;;  %2030 = vpow2.f32 %v1765_v61 }
 0x911   :  { %646 = vrot.lane.b32.xlu0 %v645_v55, %s2128_s2 }
 0x915   :  { %650 = vrot.lane.b32.xlu0 %v1754_v56, %s2127_s21 }
 0x917   :  { %v2031_v3 = vpop.eup %2030 }
 0x918   :  { %v745_v4 = vadd.f32 1.0, %v2031_v3 }
 0x91b   :  { %v618_v60 = vpop.permute.xlu1 %617 }
 0x91c   :  { %v620_v62 = vadd.f32 %v1754_v56, %v618_v60  ;;  %v630_v17 = vadd.f32 %v628_v16, %v618_v60  ;;  %v838_v16 = vrot.slane %v1763_v54, 2 }
 0x91e   :  { %v1758_v63 = vmul.f32 -1.442695, %v620_v62  ;;  %v1759_v18 = vmul.f32 -1.442695, %v630_v17 }
 0x920   :  { %2032 = vpow2.f32 %v1758_v63 }
 0x921   :  { %2034 = vrcp.f32 %v745_v4 }
 0x92a   :  { %v2033_v5 = vpop.eup %2032 }
 0x92b   :  { %v624_v6 = vadd.f32 1.0, %v2033_v5  ;;  %v2035_v7 = vpop.eup %2034 }
 0x92c   :  { %v767_v41 = vsub.f32 1.0, %v2035_v7  ;;  %v773_v43 = vmul.f32 %v2035_v7, %v2290_v27 }
 0x92d   :  { %2036 = vrcp.f32 %v624_v6 }
 0x92e   :  { %2038 = vpow2.f32 %v1759_v18 }
 0x937   :  { %v2037_v13 = vpop.eup %2036 }
 0x938   :  { %v2039_v19 = vpop.eup %2038 }
 0x939   :  { %v634_v20 = vadd.f32 1.0, %v2039_v19 }
 0x93b   :  { %2040 = vrcp.f32 %v634_v20 }
 0x945   :  { %v2041_v28 = vpop.eup %2040 }
 0x946   :  { %v660_v30 = vsub.f32 1.0, %v2041_v28  ;;  %v662_v32 = vmul.f32 %v2041_v28, %v2296_v40 }
 0x97f   :  { %v758_v9 = vpop.permute.xlu0 %757 }
 0x980   :  { %v760_v12 = vmul.f32 %v2035_v7, %v758_v9 }
 0x982   :  { %762 = vrot.lane.b32.xlu1 %v760_v12, %s2124_s18 }
 0x983   :  { %v647_v14 = vpop.permute.xlu0 %646 }
 0x984   :  { %v649_v15 = vmul.f32 %v2037_v13, %v647_v14  ;;  %v1771_v13 = vld [vmem:[%s2635_s0 + $0x10] sm:$0xf] }
 0x986   :  { %655 = vrot.lane.b32.xlu1 %v649_v15, %s2128_s2 }
 0x987   :  { %v651_v21 = vpop.permute.xlu0 %650 }
 0x988   :  { %v652_v24 = vrot.slane %v651_v21, 2 }
 0x9f4   :  { %v763_v22 = vpop.permute.xlu1 %762 }
 0x9f5   :  { %v765_v23 = vadd.f32 %v1762_v57, %v763_v22 }
 0x9f7   :  { %2042 = vtanh.f32 %v765_v23 }
 0x9f8   :  { %v656_v25 = vpop.permute.xlu1 %655 }
 0x9f9   :  { %v658_v26 = vadd.f32 %v656_v25, %v652_v24 }
 0x9fb   :  { %2044 = vtanh.f32 %v658_v26 }
 0xa01   :  { %v2043_v29 = vpop.eup %2042 }
 0xa02   :  { %769 = vrot.lane.b32.xlu0 %v2043_v29, %s2127_s21 }
 0xa05   :  { %v2045_v31 = vpop.eup %2044 }
 0xa06   :  { %v661_v34 = vmul.f32 %v2045_v31, %v660_v30 }
 0xa08   :  { %v2333_v35 = vadd.f32 %v662_v32, %v661_v34 }
 0xa0a   :  { %v775_v39 = vpack.c.bf16 %v2333_v35, %v2333_v35 }
 0xa0c   :  { %1914 = vmatmul.mubr.msk.bf16.vlgmr.msra.gmra.mrb[12].mxu1 %vm42_vm1, %v775_v39 }
 0xa0d   :  { %1926 = vmatpush3.bf16.msra.mxu1 %v2206_v36  ;;  %1929 = vmatprep.mubr.msk.bf16.mxu1 %vm2123_vm0, %v2122_v0 }
 0xa0e   :  { %1927 = vmatprep.subr.bf16.mxu1 %v2122_v0 }
 0xa11   :  { %1928 = vmatpush3.bf16.msra.mxu1 %v2212_v37 }
 0xa12   :  { %1941 = vmatprep.subr.bf16.mxu1 %v2122_v0 }
 0xa74   :  { %v770_v42 = vpop.permute.xlu0 %769 }
 0xa75   :  { %v772_v44 = vmul.f32 %v770_v42, %v767_v41 }
 0xa77   :  { %v2345_v45 = vadd.f32 %v773_v43, %v772_v44 }
 0xa79   :  { %v902_v46 = vpack.c.bf16 %v2345_v45, %v2345_v45 }
 0xa7b   :  { %904 = vrot.lane.b32.xlu1 %v902_v46, %s2127_s21 }
 0xadf   :  { %v813_v47 = vpop.f32.mrb[12].mxu1 }
 0xae0   :  { %v826_v48 = vrot.slane %v813_v47, %v2181_v11  ;;  %v847_v49 = vadd.f32 %v813_v47, %v2234_v59  ;;  %v1915_v50 = vpop.f32.mrb[13].mxu1 }
 0xae1   :  { %v816_v51 = vpop.f32.mrb[14].mxu1 }
 0xae2   :  { %v855_v52 = vrot.slane %v847_v49, %v2181_v11  ;;  %827 = vrot.lane.b32.xlu0 %v826_v48, %s2127_s21  ;;  %v1916_v53 = vpop.f32.mrb[15].mxu1 }
 0xae3   :  { %v1772_v53 = vld [vmem:[%s2635_s0 + $0xc] sm:$0xf] }
 0xae4   :  { %856 = vrot.lane.b32.xlu1 %v855_v52, %s2128_s2 }
 0xae8   :  { %860 = vrot.lane.b32.xlu1 %v1763_v54, %s2127_s21 }
 0xaed   :  { %v905_v55 = vpop.permute.xlu1 %904 }
 0xaee   :  { %1922 = vmatmul.mubr.msk.bf16.vlgmr.msra.gmra.mrb[16].mxu0 %vm42_vm1, %v905_v55 }
 0xaef   :  { %1934 = vmatpush3.bf16.msra.mxu0 %v2153_v1  ;;  %1937 = vmatprep.mubr.msk.bf16.mxu0 %vm2123_vm0, %v2122_v0 }
 0xaf0   :  { %1935 = vmatprep.subr.bf16.mxu0 %v2122_v0 }
 0xaf3   :  { %1936 = vmatpush3.bf16.msra.mxu0 %v2164_v2 }
 0xaf4   :  { %1949 = vmatprep.subr.bf16.mxu0 %v2122_v0 }
 0xb54   :  { %v828_v56 = vpop.permute.xlu0 %827 }
 0xb55   :  { %v830_v57 = vadd.f32 %v1763_v54, %v828_v56  ;;  %v840_v17 = vadd.f32 %v838_v16, %v828_v56 }
 0xb56   :  { %v857_v9 = vpop.permute.xlu1 %856 }
 0xb57   :  { %v1767_v58 = vmul.f32 -1.442695, %v830_v57  ;;  %v1768_v18 = vmul.f32 -1.442695, %v840_v17 }
 0xb59   :  { %2046 = vpow2.f32 %v1767_v58 }
 0xb5a   :  { %v861_v22 = vpop.permute.xlu1 %860 }
 0xb5b   :  { %v862_v28 = vrot.slane %v861_v22, 2 }
 0xb63   :  { %v2047_v60 = vpop.eup %2046 }
 0xb64   :  { %v834_v61 = vadd.f32 1.0, %v2047_v60 }
 0xb66   :  { %2048 = vrcp.f32 %v834_v61 }
 0xb70   :  { %v2049_v7 = vpop.eup %2048 }
 0xb71   :  { %v859_v12 = vmul.f32 %v2049_v7, %v857_v9 }
 0xbc1   :  { %v943_v62 = vpop.f32.mrb[16].mxu0 }
 0xbc2   :  { %v956_v63 = vadd.f32 %v943_v62, %v2179_v10  ;;  %v1923_v3 = vpop.f32.mrb[17].mxu0  ;;  %v949_v14 = vadd.f32 %v1771_v13, %v943_v62 }
 0xbc3   :  { %v946_v4 = vpop.f32.mrb[18].mxu0 }
 0xbc4   :  { %v964_v5 = vrot.slane %v956_v63, %v2181_v11  ;;  %v1924_v6 = vpop.f32.mrb[19].mxu0  ;;  %v1774_v15 = vmul.f32 -1.442695, %v949_v14  ;;  %v1046_v14 = vrot.slane %v1772_v53, 2 }
 0xbc6   :  { %965 = vrot.lane.b32.xlu0 %v964_v5, %s2124_s18  ;;  %2050 = vpow2.f32 %v1774_v15 }
 0xbc7   :  { %2052 = vpow2.f32 %v1768_v18 }
 0xbca   :  { %865 = vrot.lane.b32.xlu0 %v859_v12, %s2128_s2 }
 0xbd0   :  { %v2051_v19 = vpop.eup %2050 }
 0xbd1   :  { %v953_v20 = vadd.f32 1.0, %v2051_v19  ;;  %v2053_v21 = vpop.eup %2052 }
 0xbd2   :  { %v844_v23 = vadd.f32 1.0, %v2053_v21 }
 0xbd3   :  { %2054 = vrcp.f32 %v953_v20 }
 0xbd4   :  { %2056 = vrcp.f32 %v844_v23 }
 0xbdd   :  { %v2055_v24 = vpop.eup %2054 }
 0xbde   :  { %v2057_v31 = vpop.eup %2056  ;;  %v975_v54 = vsub.f32 1.0, %v2055_v24  ;;  %v981_v56 = vmul.f32 %v2055_v24, %v2345_v45 }
 0xbdf   :  { %v870_v32 = vsub.f32 1.0, %v2057_v31  ;;  %v872_v39 = vmul.f32 %v2057_v31, %v2333_v35 }
 0xc38   :  { %v966_v25 = vpop.permute.xlu0 %965 }
 0xc39   :  { %v968_v26 = vmul.f32 %v2055_v24, %v966_v25 }
 0xc3b   :  { %970 = vrot.lane.b32.xlu1 %v968_v26, %s2124_s18 }
 0xc3c   :  { %v866_v29 = vpop.permute.xlu0 %865 }
 0xc3d   :  { %v868_v30 = vadd.f32 %v866_v29, %v862_v28 }
 0xc3f   :  { %2058 = vtanh.f32 %v868_v30 }
 0xc49   :  { %v2059_v34 = vpop.eup %2058 }
 0xc4a   :  { %v871_v41 = vmul.f32 %v2059_v34, %v870_v32 }
 0xc4c   :  { %v2375_v42 = vadd.f32 %v872_v39, %v871_v41  ;;  %v1780_v41 = vld [vmem:[%s2635_s0 + $0x14] sm:$0xf] }
 0xc4e   :  { %v983_v43 = vpack.c.bf16 %v2375_v42, %v2375_v42 }
 0xc50   :  { %1930 = vmatmul.mubr.msk.bf16.vlgmr.msra.gmra.mrb[16].mxu1 %vm42_vm1, %v983_v43 }
 0xc51   :  { %1942 = vmatpush3.bf16.msra.mxu1 %v2206_v36  ;;  %1945 = vmatprep.mubr.msk.bf16.mxu1 %vm2123_vm0, %v2122_v0 }
 0xc52   :  { %1943 = vmatprep.subr.bf16.mxu1 %v2122_v0 }
 0xc55   :  { %1944 = vmatpush3.bf16.msra.mxu1 %v2212_v37 }
 0xc56   :  { %1957 = vmatprep.subr.bf16.mxu1 %v2122_v0 }
 0xcad   :  { %v971_v44 = vpop.permute.xlu1 %970 }
 0xcae   :  { %v973_v46 = vadd.f32 %v1771_v13, %v971_v44 }
 0xcb0   :  { %2060 = vtanh.f32 %v973_v46 }
 0xcba   :  { %v2061_v47 = vpop.eup %2060 }
 0xcbb   :  { %977 = vrot.lane.b32.xlu0 %v2061_v47, %s2127_s21 }
 0xd23   :  { %v1021_v48 = vpop.f32.mrb[16].mxu1 }
 0xd24   :  { %v1034_v49 = vrot.slane %v1021_v48, %v2181_v11  ;;  %v1931_v50 = vpop.f32.mrb[17].mxu1  ;;  %v1055_v60 = vadd.f32 %v1021_v48, %v2234_v59 }
 0xd25   :  { %v1024_v51 = vpop.f32.mrb[18].mxu1 }
 0xd26   :  { %v1932_v52 = vpop.f32.mrb[19].mxu1  ;;  %1035 = vrot.lane.b32.xlu0 %v1034_v49, %s2127_s21  ;;  %v1063_v62 = vrot.slane %v1055_v60, %v2181_v11 }
 0xd2a   :  { %1068 = vrot.lane.b32.xlu0 %v1772_v53, %s2127_s21 }
 0xd2d   :  { %v978_v55 = vpop.permute.xlu0 %977 }
 0xd2e   :  { %v980_v57 = vmul.f32 %v978_v55, %v975_v54 }
 0xd30   :  { %v2394_v58 = vadd.f32 %v981_v56, %v980_v57 }
 0xd32   :  { %v1108_v61 = vpack.c.bf16 %v2394_v58, %v2394_v58 }
 0xd34   :  { %1110 = vrot.lane.b32.xlu1 %v1108_v61, %s2127_s21  ;;  %v1781_v61 = vld [vmem:[%s2635_s0 + $0x8] sm:$0xf] }
 0xd38   :  { %1064 = vrot.lane.b32.xlu1 %v1063_v62, %s2128_s2 }
 0xd98   :  { %v1036_v63 = vpop.permute.xlu0 %1035 }
 0xd99   :  { %v1038_v3 = vadd.f32 %v1772_v53, %v1036_v63  ;;  %v1048_v15 = vadd.f32 %v1046_v14, %v1036_v63 }
 0xd9b   :  { %v1776_v4 = vmul.f32 -1.442695, %v1038_v3  ;;  %v1777_v16 = vmul.f32 -1.442695, %v1048_v15 }
 0xd9c   :  { %v1069_v17 = vpop.permute.xlu0 %1068 }
 0xd9d   :  { %2062 = vpow2.f32 %v1776_v4  ;;  %v1070_v19 = vrot.slane %v1069_v17, 2  ;;  %v2120_v17 = vld [vmem:[%s2633_s1] sm:$0xff]  }
 0xda6   :  { %v1111_v5 = vpop.permute.xlu1 %1110 }
 0xda7   :  { %v2063_v6 = vpop.eup %2062  ;;  %1938 = vmatmul.mubr.msk.bf16.vlgmr.msra.gmra.mrb[20].mxu0 %vm42_vm1, %v1111_v5 }
 0xda8   :  { %v1042_v7 = vadd.f32 1.0, %v2063_v6  ;;  %1950 = vmatpush3.bf16.msra.mxu0 %v2153_v1  ;;  %1953 = vmatprep.mubr.msk.bf16.mxu0 %vm2123_vm0, %v2122_v0 }
 0xda9   :  { %1951 = vmatprep.subr.bf16.mxu0 %v2122_v0 }
 0xdaa   :  { %2064 = vrcp.f32 %v1042_v7  ;;  %v1065_v12 = vpop.permute.xlu1 %1064 }
 0xdab   :  { %2066 = vpow2.f32 %v1777_v16 }
 0xdac   :  { %1952 = vmatpush3.bf16.msra.mxu0 %v2164_v2 }
 0xdad   :  { %1965 = vmatprep.subr.bf16.mxu0 %v2122_v0 }
 0xdb4   :  { %v2065_v9 = vpop.eup %2064 }
 0xdb5   :  { %v1067_v13 = vmul.f32 %v2065_v9, %v1065_v12  ;;  %v2067_v1 = vpop.eup %2066 }
 0xdb6   :  { %v1052_v18 = vadd.f32 1.0, %v2067_v1 }
 0xdb7   :  { %1073 = vrot.lane.b32.xlu1 %v1067_v13, %s2128_s2 }
 0xdb8   :  { %2068 = vrcp.f32 %v1052_v18 }
 0xdc2   :  { %v2069_v2 = vpop.eup %2068 }
 0xdc3   :  { %v1078_v22 = vsub.f32 1.0, %v2069_v2  ;;  %v1080_v24 = vmul.f32 %v2069_v2, %v2375_v42  ;;  %v1252_v2 = vrot.slane %v1781_v61, 2 }
 0xe29   :  { %v1074_v20 = vpop.permute.xlu1 %1073 }
 0xe2a   :  { %v1076_v21 = vadd.f32 %v1074_v20, %v1070_v19 }
 0xe2c   :  { %2070 = vtanh.f32 %v1076_v21  ;;  %v2121_v21 = vld [vmem:[%s2633_s1 + $0x8] sm:$0xff]  }
 0xe36   :  { %v2071_v23 = vpop.eup %2070 }
 0xe37   :  { %v1079_v25 = vmul.f32 %v2071_v23, %v1078_v22 }
 0xe39   :  { %v2411_v26 = vadd.f32 %v1080_v24, %v1079_v25 }
 0xe3b   :  { %v1189_v28 = vpack.c.bf16 %v2411_v26, %v2411_v26 }
 0xe3d   :  { %1946 = vmatmul.mubr.msk.bf16.vlgmr.msra.gmra.mrb[20].mxu1 %vm42_vm1, %v1189_v28 }
 0xe3e   :  { %1958 = vmatpush3.bf16.msra.mxu1 %v2206_v36  ;;  %1961 = vmatprep.mubr.msk.bf16.mxu1 %vm2123_vm0, %v2122_v0 }
 0xe3f   :  { %1959 = vmatprep.subr.bf16.mxu1 %v2122_v0 }
 0xe42   :  { %1960 = vmatpush3.bf16.msra.mxu1 %v2212_v37 }
 0xe43   :  { %1973 = vmatprep.subr.bf16.mxu1 %v2122_v0 }
 0xe7a   :  { %v1149_v29 = vpop.f32.mrb[20].mxu0 }
 0xe7b   :  { %v1162_v30 = vadd.f32 %v1149_v29, %v2179_v10  ;;  %v1939_v31 = vpop.f32.mrb[21].mxu0  ;;  %v1155_v43 = vadd.f32 %v1780_v41, %v1149_v29 }
 0xe7c   :  { %v1152_v32 = vpop.f32.mrb[22].mxu0 }
 0xe7d   :  { %v1170_v34 = vrot.slane %v1162_v30, %v2181_v11  ;;  %v1940_v39 = vpop.f32.mrb[23].mxu0  ;;  %v1783_v44 = vmul.f32 -1.442695, %v1155_v43 }
 0xe7f   :  { %1171 = vrot.lane.b32.xlu0 %v1170_v34, %s2124_s18  ;;  %2072 = vpow2.f32 %v1783_v44 }
 0xe89   :  { %v2073_v46 = vpop.eup %2072 }
 0xe8a   :  { %v1159_v47 = vadd.f32 1.0, %v2073_v46 }
 0xe8c   :  { %2074 = vrcp.f32 %v1159_v47 }
 0xe96   :  { %v2075_v48 = vpop.eup %2074 }
 0xe97   :  { %v1181_v62 = vsub.f32 1.0, %v2075_v48  ;;  %v1187_v3 = vmul.f32 %v2075_v48, %v2394_v58 }
 0xef1   :  { %v1172_v49 = vpop.permute.xlu0 %1171 }
 0xef2   :  { %v1174_v50 = vmul.f32 %v2075_v48, %v1172_v49 }
 0xef4   :  { %1176 = vrot.lane.b32.xlu1 %v1174_v50, %s2124_s18 }
 0xf10   :  { %v1227_v51 = vpop.f32.mrb[20].mxu1 }
 0xf11   :  { %v1947_v52 = vpop.f32.mrb[21].mxu1  ;;  %v1240_v60 = vrot.slane %v1227_v51, %v2181_v11  ;;  %v1261_v6 = vadd.f32 %v1227_v51, %v2234_v59 }
 0xf12   :  { %v1230_v53 = vpop.f32.mrb[22].mxu1 }
 0xf13   :  { %v1948_v54 = vpop.f32.mrb[23].mxu1  ;;  %v1269_v9 = vrot.slane %v1261_v6, %v2181_v11 }
 0xf66   :  { %v1177_v55 = vpop.permute.xlu1 %1176 }
 0xf67   :  { %v1179_v56 = vadd.f32 %v1780_v41, %v1177_v55 }
 0xf69   :  { %2076 = vtanh.f32 %v1179_v56 }
 0xf73   :  { %v2077_v57 = vpop.eup %2076 }
 0xf74   :  { %1183 = vrot.lane.b32.xlu0 %v2077_v57, %s2127_s21 }
 0xf78   :  { %1241 = vrot.lane.b32.xlu0 %v1240_v60, %s2127_s21 }
 0xf7c   :  { %1274 = vrot.lane.b32.xlu0 %v1781_v61, %s2127_s21 }
 0xfe6   :  { %v1184_v63 = vpop.permute.xlu0 %1183 }
 0xfe7   :  { %v1186_v4 = vmul.f32 %v1184_v63, %v1181_v62 }
 0xfe9   :  { %v2437_v5 = vadd.f32 %v1187_v3, %v1186_v4 }
 0xfea   :  { %v1242_v12 = vpop.permute.xlu0 %1241 }
 0xfeb   :  { %v1314_v7 = vpack.c.bf16 %v2437_v5, %v2437_v5  ;;  %v1244_v13 = vadd.f32 %v1781_v61, %v1242_v12  ;;  %v1254_v22 = vadd.f32 %v1252_v2, %v1242_v12 }
 0xfed   :  { %1316 = vrot.lane.b32.xlu1 %v1314_v7, %s2127_s21  ;;  %v1785_v14 = vmul.f32 -1.442695, %v1244_v13  ;;  %v1786_v23 = vmul.f32 -1.442695, %v1254_v22  ;;  %v1790_v7 = vld [vmem:[%s2635_s0 + $0x4] sm:$0xf] }
 0xfee   :  { %v1275_v25 = vpop.permute.xlu0 %1274 }
 0xfef   :  { %2078 = vpow2.f32 %v1785_v14  ;;  %v1276_v29 = vrot.slane %v1275_v25, 2 }
 0xff1   :  { %1270 = vrot.lane.b32.xlu1 %v1269_v9, %s2128_s2 }
 0xff9   :  { %v2079_v15 = vpop.eup %2078 }
 0xffa   :  { %v1248_v16 = vadd.f32 1.0, %v2079_v15 }
 0xffc   :  { %2080 = vrcp.f32 %v1248_v16 }
 0xffd   :  { %2082 = vpow2.f32 %v1786_v23 }
0x1006   :  { %v2081_v18 = vpop.eup %2080 }
0x1007   :  { %v2083_v24 = vpop.eup %2082 }
0x1008   :  { %v1258_v28 = vadd.f32 1.0, %v2083_v24 }
0x100a   :  { %2084 = vrcp.f32 %v1258_v28  ;;  %v1458_v28 = vrot.slane %v1790_v7, 2 }
0x1014   :  { %v2085_v32 = vpop.eup %2084 }
0x1015   :  { %v1284_v34 = vsub.f32 1.0, %v2085_v32  ;;  %v1286_v41 = vmul.f32 %v2085_v32, %v2411_v26 }
0x105f   :  { %v1317_v1 = vpop.permute.xlu1 %1316 }
0x1060   :  { %1954 = vmatmul.mubr.msk.bf16.vlgmr.msra.gmra.mrb[24].mxu0 %vm42_vm1, %v1317_v1 }
0x1061   :  { %1966 = vmatpush3.bf16.msra.mxu0 %v2120_v17  ;;  %1969 = vmatprep.mubr.msk.bf16.mxu0 %vm2123_vm0, %v2122_v0 }
0x1062   :  { %1967 = vmatprep.subr.bf16.mxu0 %v2122_v0 }
0x1063   :  { %v1271_v19 = vpop.permute.xlu1 %1270 }
0x1064   :  { %v1273_v20 = vmul.f32 %v2081_v18, %v1271_v19 }
0x1065   :  { %1968 = vmatpush3.bf16.msra.mxu0 %v2121_v21 }
0x1066   :  { %1279 = vrot.lane.b32.xlu1 %v1273_v20, %s2128_s2 }
0x10d8   :  { %v1280_v30 = vpop.permute.xlu1 %1279 }
0x10d9   :  { %v1282_v31 = vadd.f32 %v1280_v30, %v1276_v29 }
0x10db   :  { %2086 = vtanh.f32 %v1282_v31 }
0x10e5   :  { %v2087_v39 = vpop.eup %2086 }
0x10e6   :  { %v1285_v43 = vmul.f32 %v2087_v39, %v1284_v34 }
0x10e8   :  { %v2457_v44 = vadd.f32 %v1286_v41, %v1285_v43 }
0x10ea   :  { %v1395_v46 = vpack.c.bf16 %v2457_v44, %v2457_v44 }
0x10ec   :  { %1962 = vmatmul.mubr.msk.bf16.vlgmr.msra.gmra.mrb[24].mxu1 %vm42_vm1, %v1395_v46 }
0x10ed   :  { %1974 = vmatpush3.bf16.msra.mxu1 %v2206_v36  ;;  %1977 = vmatprep.mubr.msk.bf16.mxu1 %vm2123_vm0, %v2122_v0  ;;  %v1789_v36 = vld [vmem:[%s2635_s0 + $0x18] sm:$0xf] }
0x10ee   :  { %1975 = vmatprep.subr.bf16.mxu1 %v2122_v0 }
0x10f1   :  { %1976 = vmatpush3.bf16.msra.mxu1 %v2212_v37 }
0x1133   :  { %v1355_v47 = vpop.f32.mrb[24].mxu0 }
0x1134   :  { %v1368_v48 = vadd.f32 %v1355_v47, %v2179_v10  ;;  %v1955_v49 = vpop.f32.mrb[25].mxu0  ;;  %v1361_v53 = vadd.f32 %v1789_v36, %v1355_v47 }
0x1135   :  { %v1358_v50 = vpop.f32.mrb[26].mxu0 }
0x1136   :  { %v1376_v51 = vrot.slane %v1368_v48, %v2181_v11  ;;  %v1956_v52 = vpop.f32.mrb[27].mxu0  ;;  %v1792_v54 = vmul.f32 -1.442695, %v1361_v53 }
0x1138   :  { %1377 = vrot.lane.b32.xlu0 %v1376_v51, %s2124_s18  ;;  %2088 = vpow2.f32 %v1792_v54 }
0x1142   :  { %v2089_v0 = vpop.eup %2088 }
0x1143   :  { %v1365_v55 = vadd.f32 1.0, %v2089_v0 }
0x1145   :  { %2090 = vrcp.f32 %v1365_v55 }
0x114f   :  { %v2091_v37 = vpop.eup %2090 }
0x1150   :  { %v1387_v18 = vsub.f32 1.0, %v2091_v37  ;;  %v1393_v20 = vmul.f32 %v2091_v37, %v2437_v5 }
0x11aa   :  { %v1378_v56 = vpop.permute.xlu0 %1377 }
0x11ab   :  { %v1380_v57 = vmul.f32 %v2091_v37, %v1378_v56 }
0x11ad   :  { %1382 = vrot.lane.b32.xlu1 %v1380_v57, %s2124_s18 }
0x11bf   :  { %v1433_v60 = vpop.f32.mrb[24].mxu1 }
0x11c0   :  { %v1446_v61 = vrot.slane %v1433_v60, %v2181_v11  ;;  %v1467_v62 = vadd.f32 %v1433_v60, %v2234_v59  ;;  %v1963_v63 = vpop.f32.mrb[25].mxu1 }
0x11c1   :  { %v1436_v3 = vpop.f32.mrb[26].mxu1 }
0x11c2   :  { %v1964_v4 = vpop.f32.mrb[27].mxu1  ;;  %1447 = vrot.lane.b32.xlu0 %v1446_v61, %s2127_s21  ;;  %v1475_v6 = vrot.slane %v1467_v62, %v2181_v11 }
0x11c6   :  { %1476 = vrot.lane.b32.xlu0 %v1475_v6, %s2128_s2  ;;  %v1798_v6 = vld [vmem:[%s2635_s0 + $0x1c] sm:$0xf] }
0x11ca   :  { %1480 = vrot.lane.b32.xlu0 %v1790_v7, %s2127_s21 }
0x121f   :  { %v1383_v9 = vpop.permute.xlu1 %1382 }
0x1220   :  { %v1385_v12 = vadd.f32 %v1789_v36, %v1383_v9 }
0x1222   :  { %2092 = vtanh.f32 %v1385_v12 }
0x122c   :  { %v2093_v13 = vpop.eup %2092 }
0x122d   :  { %1389 = vrot.lane.b32.xlu1 %v2093_v13, %s2127_s21 }
0x1234   :  { %v1448_v14 = vpop.permute.xlu0 %1447 }
0x1235   :  { %v1450_v15 = vadd.f32 %v1790_v7, %v1448_v14  ;;  %v1460_v29 = vadd.f32 %v1458_v28, %v1448_v14  ;;  %v881_v28 = vrot.slane %v2345_v45, %v2181_v11 }
0x1237   :  { %v1794_v16 = vmul.f32 -1.442695, %v1450_v15  ;;  %v1795_v30 = vmul.f32 -1.442695, %v1460_v29 }
0x1238   :  { %v1477_v24 = vpop.permute.xlu0 %1476 }
0x1239   :  { %2094 = vpow2.f32 %v1794_v16 }
0x123c   :  { %v1481_v32 = vpop.permute.xlu0 %1480 }
0x123d   :  { %v1482_v41 = vrot.slane %v1481_v32, 2 }
0x1243   :  { %v2095_v1 = vpop.eup %2094 }
0x1244   :  { %v1454_v17 = vadd.f32 1.0, %v2095_v1 }
0x1246   :  { %2096 = vrcp.f32 %v1454_v17 }
0x1247   :  { %2098 = vpow2.f32 %v1795_v30 }
0x1250   :  { %v2097_v23 = vpop.eup %2096 }
0x1251   :  { %v1479_v25 = vmul.f32 %v2097_v23, %v1477_v24  ;;  %v2099_v31 = vpop.eup %2098  ;;  %v250_v23 = vrot.slane %v2191_v33, %v2181_v11  ;;  %v461_v24 = vrot.slane %v2246_v8, %v2181_v11  ;;  %v1089_v33 = vrot.slane %v2394_v58, %v2181_v11 }
0x1252   :  { %v1464_v34 = vadd.f32 1.0, %v2099_v31  ;;  %v1295_v8 = vrot.slane %v2437_v5, %v2181_v11  ;;  %v263_v58 = vrot.slane %v2260_v38, %v2181_v11  ;;  %v474_v5 = vrot.slane %v2296_v40, %v2181_v11 }
0x1253   :  { %v1101_v38 = vrot.slane %v2411_v26, %v2181_v11  ;;  %v1307_v40 = vrot.slane %v2457_v44, %v2181_v11 }
0x1254   :  { %2100 = vrcp.f32 %v1464_v34  ;;  %v684_v34 = vrot.slane %v2333_v35, %v2181_v11 }
0x125e   :  { %v2101_v47 = vpop.eup %2100 }
0x125f   :  { %v1490_v48 = vsub.f32 1.0, %v2101_v47  ;;  %v1492_v50 = vmul.f32 %v2101_v47, %v2457_v44 }
0x129f   :  { %v1390_v19 = vpop.permute.xlu1 %1389 }
0x12a0   :  { %v1392_v21 = vmul.f32 %v1390_v19, %v1387_v18 }
0x12a2   :  { %v2485_v2 = vadd.f32 %v1393_v20, %v1392_v21 }
0x12a4   :  { %v1520_v22 = vpack.c.bf16 %v2485_v2, %v2485_v2 }
0x12a6   :  { %1522 = vrot.lane.b32.xlu1 %v1520_v22, %s2127_s21 }
0x12aa   :  { %1485 = vrot.lane.b32.xlu1 %v1479_v25, %s2128_s2  ;;  %v671_v25 = vrot.slane %v2290_v27, %v2181_v11  ;;  %v1501_v27 = vrot.slane %v2485_v2, %v2181_v11 }
0x1318   :  { %v1523_v39 = vpop.permute.xlu1 %1522 }
0x1319   :  { %1970 = vmatmul.mubr.msk.bf16.vlgmr.msra.gmra.mrb[28].mxu0 %vm42_vm1, %v1523_v39 }
0x131c   :  { %v1486_v43 = vpop.permute.xlu1 %1485 }
0x131d   :  { %v1488_v46 = vadd.f32 %v1486_v43, %v1482_v41  ;;  %v894_v41 = vrot.slane %v2375_v42, %v2181_v11 }
0x131f   :  { %2102 = vtanh.f32 %v1488_v46 }
0x1329   :  { %v2103_v49 = vpop.eup %2102 }
0x132a   :  { %v1491_v51 = vmul.f32 %v2103_v49, %v1490_v48 }
0x132c   :  { %v2493_v52 = vadd.f32 %v1492_v50, %v1491_v51 }
0x132e   :  { %v1601_v36 = vpack.c.bf16 %v2493_v52, %v2493_v52  ;;  %v1513_v35 = vrot.slane %v2493_v52, %v2181_v11 }
0x1330   :  { %1978 = vmatmul.mubr.msk.bf16.vlgmr.msra.gmra.mrb[28].mxu1 %vm42_vm1, %v1601_v36 }
0x13ec   :  { %v1561_v53 = vpop.f32.mrb[28].mxu0 }
0x13ed   :  { %v1574_v54 = vadd.f32 %v1561_v53, %v2179_v10  ;;  %v1971_v0 = vpop.f32.mrb[29].mxu0  ;;  %v1519_v10 = vld [vmem:[%s2635_s0] sm:$0xf] }
0x13ee   :  { %v1564_v55 = vpop.f32.mrb[30].mxu0  ;;  %v1664_v31 = vrot.slane %v1519_v10, 2 }
0x13ef   :  { %v1582_v37 = vrot.slane %v1574_v54, %v2181_v11  ;;  %v1972_v56 = vpop.f32.mrb[31].mxu0 }
0x13f1   :  { %1583 = vrot.lane.b32.xlu0 %v1582_v37, %s2124_s18 }
0x1403   :  { %v1639_v57 = vpop.f32.mrb[28].mxu1 }
0x1404   :  { %v1652_v60 = vrot.slane %v1639_v57, %v2181_v11  ;;  %v1673_v61 = vadd.f32 %v1639_v57, %v2234_v59  ;;  %v1979_v62 = vpop.f32.mrb[29].mxu1  ;;  %v1567_v59 = vadd.f32 %v1798_v6, %v1561_v53 }
0x1405   :  { %v1642_v63 = vpop.f32.mrb[30].mxu1 }
0x1406   :  { %v1681_v3 = vrot.slane %v1673_v61, %v2181_v11  ;;  %1653 = vrot.lane.b32.xlu1 %v1652_v60, %s2127_s21  ;;  %v1980_v4 = vpop.f32.mrb[31].mxu1  ;;  %v1800_v7 = vmul.f32 -1.442695, %v1567_v59 }
0x1408   :  { %1682 = vrot.lane.b32.xlu0 %v1681_v3, %s2128_s2  ;;  %2104 = vpow2.f32 %v1800_v7 }
0x140c   :  { %1686 = vrot.lane.b32.xlu0 %v1519_v10, %s2127_s21 }
0x1412   :  { %v2105_v9 = vpop.eup %2104 }
0x1413   :  { %v1571_v12 = vadd.f32 1.0, %v2105_v9 }
0x1415   :  { %2106 = vrcp.f32 %v1571_v12 }
0x141f   :  { %v2513_v13 = vpop.eup %2106 }
0x1420   :  { %v1593_v60 = vsub.f32 1.0, %v2513_v13  ;;  %v1599_v62 = vmul.f32 %v2513_v13, %v2485_v2 }
0x1463   :  { %v1584_v14 = vpop.permute.xlu0 %1583 }
0x1464   :  { %v1586_v15 = vmul.f32 %v2513_v13, %v1584_v14 }
0x1466   :  { %1588 = vrot.lane.b32.xlu1 %v1586_v15, %s2124_s18 }
0x1478   :  { %v1654_v16 = vpop.permute.xlu1 %1653 }
0x1479   :  { %v1656_v1 = vadd.f32 %v1654_v16, %v1519_v10  ;;  %v1666_v32 = vadd.f32 %v1664_v31, %v1654_v16 }
0x147a   :  { %v1683_v21 = vpop.permute.xlu0 %1682 }
0x147b   :  { %v1802_v17 = vmul.f32 -1.442695, %v1656_v1  ;;  %v1803_v39 = vmul.f32 -1.442695, %v1666_v32 }
0x147d   :  { %2108 = vpow2.f32 %v1802_v17 }
0x147e   :  { %v1687_v42 = vpop.permute.xlu0 %1686 }
0x147f   :  { %v1688_v47 = vrot.slane %v1687_v42, 2 }
0x1487   :  { %v2109_v18 = vpop.eup %2108 }
0x1488   :  { %v1660_v19 = vadd.f32 1.0, %v2109_v18 }
0x148a   :  { %2110 = vrcp.f32 %v1660_v19 }
0x1494   :  { %v2111_v20 = vpop.eup %2110 }
0x1495   :  { %v1685_v22 = vmul.f32 %v2111_v20, %v1683_v21 }
0x1497   :  { %1691 = vrot.lane.b32.xlu1 %v1685_v22, %s2128_s2 }
0x149b   :  { %251 = vrot.lane.b32.xlu1 %v250_v23, %s2127_s21 }
0x149f   :  { %462 = vrot.lane.b32.xlu1 %v461_v24, %s2127_s21 }
0x14a3   :  { %672 = vrot.lane.b32.xlu1 %v671_v25, %s2127_s21 }
0x14a7   :  { %882 = vrot.lane.b32.xlu1 %v881_v28, %s2127_s21 }
0x14ab   :  { %1090 = vrot.lane.b32.xlu1 %v1089_v33, %s2127_s21 }
0x14af   :  { %1296 = vrot.lane.b32.xlu1 %v1295_v8, %s2127_s21 }
0x14b3   :  { %1502 = vrot.lane.b32.xlu1 %v1501_v27, %s2127_s21 }
0x14d8   :  { %v1589_v29 = vpop.permute.xlu1 %1588 }
0x14d9   :  { %v1591_v30 = vadd.f32 %v1798_v6, %v1589_v29 }
0x14db   :  { %2112 = vtanh.f32 %v1591_v30 }
0x14dc   :  { %2114 = vpow2.f32 %v1803_v39 }
0x14e5   :  { %v2113_v45 = vpop.eup %2112 }
0x14e6   :  { %1595 = vrot.lane.b32.xlu0 %v2113_v45, %s2127_s21  ;;  %v2115_v43 = vpop.eup %2114 }
0x14e7   :  { %v1670_v46 = vadd.f32 1.0, %v2115_v43 }
0x14e9   :  { %2116 = vrcp.f32 %v1670_v46 }
0x14ea   :  { %264 = vrot.lane.b32.xlu0 %v263_v58, %s2128_s2 }
0x14ee   :  { %475 = vrot.lane.b32.xlu0 %v474_v5, %s2128_s2 }
0x14f2   :  { %685 = vrot.lane.b32.xlu0 %v684_v34, %s2128_s2 }
0x14f3   :  { %v2117_v50 = vpop.eup %2116 }
0x14f4   :  { %v1696_v36 = vsub.f32 1.0, %v2117_v50  ;;  %v1698_v0 = vmul.f32 %v2117_v50, %v2493_v52 }
0x14f6   :  { %895 = vrot.lane.b32.xlu0 %v894_v41, %s2128_s2 }
0x14fa   :  { %1102 = vrot.lane.b32.xlu0 %v1101_v38, %s2128_s2 }
0x14fe   :  { %1308 = vrot.lane.b32.xlu0 %v1307_v40, %s2128_s2 }
0x1502   :  { %1514 = vrot.lane.b32.xlu0 %v1513_v35, %s2128_s2 }
0x1509   :  { %v1692_v48 = vpop.permute.xlu1 %1691 }
0x150a   :  { %v1694_v49 = vadd.f32 %v1692_v48, %v1688_v47 }
0x150c   :  { %2118 = vtanh.f32 %v1694_v49 }
0x150d   :  { %v252_v26 = vpop.permute.xlu1 %251 }
0x150e   :  { %255 = vst.msk [vmem:[%s2636_s3] sm:$0x3] %vm254_vm2, %v252_v26 }
0x1511   :  { %v463_v44 = vpop.permute.xlu1 %462 }
0x1512   :  { %1751 = vst.msk [vmem:[%s2636_s3 + $0x2] sm:$0x3] %vm254_vm2, %v463_v44 }
0x1515   :  { %v673_v51 = vpop.permute.xlu1 %672 }
0x1516   :  { %v2119_v53 = vpop.eup %2118  ;;  %1760 = vst.msk [vmem:[%s2636_s3 + $0x4] sm:$0x3] %vm254_vm2, %v673_v51 }
0x1517   :  { %v1697_v54 = vmul.f32 %v2119_v53, %v1696_v36 }
0x1519   :  { %v883_v55 = vpop.permute.xlu1 %882  ;;  %v1699_v37 = vadd.f32 %v1698_v0, %v1697_v54 }
0x151a   :  { %1769 = vst.msk [vmem:[%s2636_s3 + $0x6] sm:$0x3] %vm254_vm2, %v883_v55 }
0x151b   :  { %v1719_v56 = vrot.slane %v1699_v37, %v2181_v11 }
0x151d   :  { %1720 = vrot.lane.b32.xlu0 %v1719_v56, %s2128_s2  ;;  %v1091_v57 = vpop.permute.xlu1 %1090 }
0x1521   :  { %v1297_v52 = vpop.permute.xlu1 %1296 }
0x1525   :  { %v1503_v59 = vpop.permute.xlu1 %1502 }
0x1558   :  { %v1596_v61 = vpop.permute.xlu0 %1595 }
0x1559   :  { %v1598_v63 = vmul.f32 %v1596_v61, %v1593_v60 }
0x155b   :  { %v1600_v3 = vadd.f32 %v1599_v62, %v1598_v63 }
0x155c   :  { %v265_v4 = vpop.permute.xlu0 %264 }
0x155d   :  { %1743 = vst.msk [vmem:[%s2636_s3 + $0xe] sm:$0x3] %vm268_vm3, %v265_v4  ;;  %v1707_v10 = vrot.slane %v1600_v3, %v2181_v11 }
0x155f   :  { %1708 = vrot.lane.b32.xlu1 %v1707_v10, %s2127_s21 }
0x1560   :  { %v476_v6 = vpop.permute.xlu0 %475 }
0x1561   :  { %1752 = vst.msk [vmem:[%s2636_s3 + $0xc] sm:$0x3] %vm268_vm3, %v476_v6 }
0x1562   :  { %1796 = vst.msk [vmem:[%s2636_s3 + $0xc] sm:$0x3] %vm254_vm2, %v1503_v59 }
0x1564   :  { %v686_v2 = vpop.permute.xlu0 %685 }
0x1565   :  { %1761 = vst.msk [vmem:[%s2636_s3 + $0xa] sm:$0x3] %vm268_vm3, %v686_v2 }
0x1566   :  { %1787 = vst.msk [vmem:[%s2636_s3 + $0xa] sm:$0x3] %vm254_vm2, %v1297_v52 }
0x1568   :  { %v896_v11 = vpop.permute.xlu0 %895 }
0x1569   :  { %1770 = vst.msk [vmem:[%s2636_s3 + $0x8] sm:$0x3] %vm268_vm3, %v896_v11 }
0x156a   :  { %1778 = vst.msk [vmem:[%s2636_s3 + $0x8] sm:$0x3] %vm254_vm2, %v1091_v57 }
0x156c   :  { %v1103_v7 = vpop.permute.xlu0 %1102 }
0x156d   :  { %1779 = vst.msk [vmem:[%s2636_s3 + $0x6] sm:$0x3] %vm268_vm3, %v1103_v7 }
0x1570   :  { %v1309_v9 = vpop.permute.xlu0 %1308 }
0x1571   :  { %1788 = vst.msk [vmem:[%s2636_s3 + $0x4] sm:$0x3] %vm268_vm3, %v1309_v9 }
0x1574   :  { %v1515_v12 = vpop.permute.xlu0 %1514 }
0x1575   :  { %1797 = vst.msk [vmem:[%s2636_s3 + $0x2] sm:$0x3] %vm268_vm3, %v1515_v12 }
0x158f   :  { %v1721_v13 = vpop.permute.xlu0 %1720 }
0x1590   :  { %1723 = vst.msk [vmem:[%s2636_s3] sm:$0x3] %vm268_vm3, %v1721_v13 }
0x15d1   :  { %v1709_v14 = vpop.permute.xlu1 %1708 }
0x15d2   :  { %1804 = vst.msk [vmem:[%s2636_s3 + $0xe] sm:$0x3] %vm254_vm2, %v1709_v14 }

</bundles_post_ra>
